<compile_context>
chip_gen: v5e
topology: v5e:2x2
jax: 0.10.0
libtpu: 0.0.40
codegen_flags: <defaults>
</compile_context>

<pallas_src>
import numpy as np

import jax
import jax.numpy as jnp
from jax import lax
from jax.experimental import pallas as pl
from jax.experimental.pallas import tpu as pltpu


def _fade(t):
    # Horner form of 6t^5 - 15t^4 + 10t^3.
    return t * t * t * (t * (t * 6.0 - 15.0) + 10.0)


def _lerp(t, a, b):
    return a + t * (b - a)


def _grad(h, x, y, z):
    hh = h & 15
    u = jnp.where(hh < 8, x, y)
    v = jnp.where(hh < 4, y, jnp.where((hh == 12) | (hh == 14), x, z))
    # sign flips done arithmetically (cheaper than select + negate):
    su = (1 - 2 * (hh & 1)).astype(jnp.float32)      # +1 / -1
    sv = (1 - (hh & 2)).astype(jnp.float32)          # +1 / -1
    return su * u + sv * v


def _torch_pow(base, e):
    """Elementwise base ** e matching torch.pow(tensor, float_scalar)."""
    abs_p = jnp.exp(e * jnp.log(jnp.abs(base)))
    is_int = jnp.floor(e) == e
    is_odd = jnp.mod(jnp.floor(jnp.abs(e)), 2.0) == 1.0
    neg_val = jnp.where(is_int,
                        jnp.where(is_odd, -abs_p, abs_p),
                        jnp.full_like(abs_p, jnp.nan))
    out = jnp.where(base < 0.0, neg_val, abs_p)
    out = jnp.where(e == 0.0, jnp.ones_like(out), out)
    return out


def _perlin_kernel(ct_ref, invp_ref, octp_ref, invs_ref, maxv_ref,
                   exp_ref, cmin_ref, cmax_ref, out_ref):
    b = pl.program_id(0)
    hi = pl.program_id(1)
    wi = pl.program_id(2)

    tH, tW = out_ref.shape
    max_oct = ct_ref.shape[0]

    inv_scale = invs_ref[b]
    max_value = maxv_ref[b]
    exponent = exp_ref[b]
    cmin = cmin_ref[b]
    cmax = cmax_ref[b]

    inv_perm = invp_ref[...]                          # (256, 1) f32, inverse perm

    # Separable global coordinates, already divided by scale once (the torch
    # reference divides by scale twice: once in x_coords/y_coords/z_coords and
    # once more inside noise(); we reproduce that).
    col = (lax.broadcasted_iota(jnp.int32, (1, tW), 1) + wi * tW).astype(jnp.float32)
    row = (lax.broadcasted_iota(jnp.int32, (tH, 1), 0) + hi * tH).astype(jnp.float32)
    xg = col * inv_scale                              # (1, tW)
    yg = row * inv_scale                              # (tH, 1)

    lane256 = lax.broadcasted_iota(jnp.int32, (1, 256), 1).astype(jnp.float32)

    def octave_body(o, total):
        fsc = octp_ref[b, o * 4 + 0]                  # lacunarity**o / scale
        zf = octp_ref[b, o * 4 + 1]
        wz = octp_ref[b, o * 4 + 2]
        amp = octp_ref[b, o * 4 + 3]                  # 0 for o >= octaves[b]

        # ----------------- x path: per-column (1, tW) ----------------------
        xc = xg * fsc
        xi = jnp.floor(xc)
        X = jnp.mod(xi, 255.0)                        # in [0, 254]
        xf = xc - xi
        u = _fade(xf)
        xm1 = xf - 1.0

        # onehot(perm[X]) and onehot(perm[X+1]) with a single compare:
        #   [j == perm[X]]  ==  [inv_perm[j] == X]
        xcat = jnp.concatenate([X, X + 1.0], axis=1)              # (1, 2tW)
        ohX = jnp.where(inv_perm == xcat, 1.0, 0.0).astype(jnp.bfloat16)  # (256, 2tW)

        # ----------------- y path: per-row (tH, 1) --------------------------
        yc = yg * fsc
        yi = jnp.floor(yc)
        Y = jnp.mod(yi, 255.0)
        yf = yc - yi
        v = _fade(yf)
        ym1 = yf - 1.0

        ycat = jnp.concatenate([Y, Y + 1.0], axis=0)              # (2tH, 1)
        ohY = jnp.where(ycat == lane256, 1.0, 0.0).astype(jnp.bfloat16)   # (2tH, 256)

        # ----------------- 8 corner hashes on the MXU -----------------------
        # ct[s, 0:256]   = T0[(j+s)%256]   (dZ = 0)
        # ct[s, 256:512] = T1[(j+s)%256]   (dZ = 1)
        ct = ct_ref[o]                                            # (256, 512) bf16
        mm = jnp.dot(ohY, ct, preferred_element_type=jnp.float32)  # (2tH, 512)
        m_all = jnp.concatenate([mm[:, 0:256], mm[:, 256:512]],
                                axis=0).astype(jnp.bfloat16)      # (4tH, 256)
        h_all = jnp.dot(m_all, ohX,
                        preferred_element_type=jnp.float32)       # (4tH, 2tW)
        h_all = h_all.astype(jnp.int32)                           # exact ints <=255

        # quadrants: rows (dY,dZ) = (0,0),(1,0),(0,1),(1,1); cols dX = 0 | 1
        hAA = h_all[0 * tH:1 * tH, 0:tW]
        hBA = h_all[0 * tH:1 * tH, tW:2 * tW]
        hAB = h_all[1 * tH:2 * tH, 0:tW]
        hBB = h_all[1 * tH:2 * tH, tW:2 * tW]
        hAA1 = h_all[2 * tH:3 * tH, 0:tW]
        hBA1 = h_all[2 * tH:3 * tH, tW:2 * tW]
        hAB1 = h_all[3 * tH:4 * tH, 0:tW]
        hBB1 = h_all[3 * tH:4 * tH, tW:2 * tW]

        zm1 = zf - 1.0
        g000 = _grad(hAA, xf, yf, zf)
        g100 = _grad(hBA, xm1, yf, zf)
        g010 = _grad(hAB, xf, ym1, zf)
        g110 = _grad(hBB, xm1, ym1, zf)
        g001 = _grad(hAA1, xf, yf, zm1)
        g101 = _grad(hBA1, xm1, yf, zm1)
        g011 = _grad(hAB1, xf, ym1, zm1)
        g111 = _grad(hBB1, xm1, ym1, zm1)

        n = _lerp(wz,
                  _lerp(v, _lerp(u, g000, g100), _lerp(u, g010, g110)),
                  _lerp(v, _lerp(u, g001, g101), _lerp(u, g011, g111)))
        return total + amp * n

    total = lax.fori_loop(0, max_oct, octave_body,
                          jnp.zeros((tH, tW), jnp.float32))

    result = _torch_pow(total / max_value, exponent)
    # Per-image min/max normalization happens in the JAX epilogue.
    out_ref[...] = jnp.clip(result, cmin, cmax)


def _adjust(lst, n):
    return lst + [lst[-1]] * (n - len(lst)) if len(lst) < n else lst


def _round_up(x, m):
    return (x + m - 1) // m * m


def _pick_tile(dim, max_tile, align):
    best = align
    d = align
    while d <= min(dim, max_tile):
        if dim % d == 0:
            best = d
        d += align
    return best


def perlin_power_fractal_noise(width, height, scale, octaves, persistence,
                               lacunarity, exponent, seeds, clamp_min,
                               clamp_max, batch_size=1):
    B, H, W = batch_size, height, width
    scale = _adjust(list(scale), B)
    octaves = _adjust(list(octaves), B)
    persistence = _adjust(list(persistence), B)
    lacunarity = _adjust(list(lacunarity), B)
    exponent = _adjust(list(exponent), B)
    seeds = _adjust(list(seeds), B)
    clamp_min = _adjust(list(clamp_min), B)
    clamp_max = _adjust(list(clamp_max), B)

    # Pad H to a multiple of 8 and W to a multiple of 128 (lane-dense stores);
    # padded rows/cols are cropped before the per-image min/max normalization.
    Hp = _round_up(H, 8)
    Wp = _round_up(W, 128)
    tH = _pick_tile(Hp, 256, 8)       # up to 256 rows (MXU M dim on v6e/v7x)
    tW = _pick_tile(Wp, 512, 128)     # lane-dense, >=128, prefer 512

    max_oct = max(1, max(int(o) for o in octaves))

    # ------------------------- host-side precompute -------------------------
    # Per-batch permutations.
    # TODO(synk): jax.random.permutation, not torch.manual_seed/torch.randperm,
    # so outputs are not bit-identical to the PyTorch module for a given seed.
    base_key = jax.random.PRNGKey(0)
    perms = np.stack([
        np.asarray(jax.random.permutation(jax.random.fold_in(base_key, int(s)), 256))
        for s in seeds]).astype(np.int64)                          # (B, 256)
    inv_perm = np.zeros_like(perms)
    ar256 = np.arange(256)
    for bi in range(B):
        inv_perm[bi, perms[bi]] = ar256

    jidx = np.arange(256)
    rot = (jidx[None, :] + jidx[:, None]) % 256                    # (256, 256)

    ct = np.zeros((B, max_oct, 256, 512), np.float32)
    octp = np.zeros((B, max_oct * 4), np.float32)
    max_values = np.zeros((B,), np.float32)
    for bi in range(B):
        sc = np.float32(scale[bi])
        lac = float(lacunarity[bi])
        pers = float(persistence[bi])
        p = perms[bi]
        mv = 0.0
        for o in range(max_oct):
            freq = lac ** o
            # z path (per-image constant): z = (bi/scale) * freq / scale
            zc = np.float32(np.float32(np.float32(bi) / sc) * np.float32(freq) / sc)
            zi = np.floor(zc)
            Z = int(zi % 255)
            zf = np.float32(zc - zi)
            wz = np.float32(zf * zf * zf * (zf * (zf * 6.0 - 15.0) + 10.0))
            active = o < int(octaves[bi])
            amp = float(pers ** o) if active else 0.0
            if active:
                mv += pers ** o
            t0 = p[(p + Z) % 256]           # T0[j] = perm[(perm[j] + Z)     % 256]
            t1 = p[(p + Z + 1) % 256]       # T1[j] = perm[(perm[j] + Z + 1) % 256]
            ct[bi, o, :, 0:256] = t0[rot]   # circulant: CT0[s, j] = T0[(j+s) % 256]
            ct[bi, o, :, 256:512] = t1[rot]
            octp[bi, o * 4 + 0] = np.float32(freq) / sc
            octp[bi, o * 4 + 1] = zf
            octp[bi, o * 4 + 2] = wz
            octp[bi, o * 4 + 3] = amp
        max_values[bi] = np.float32(mv)

    ct_dev = jnp.asarray(ct, jnp.bfloat16)                         # ints <=255, exact
    invp_dev = jnp.asarray(inv_perm.astype(np.float32)[:, :, None])  # (B, 256, 1)
    octp_dev = jnp.asarray(octp)                                   # (B, max_oct*4)
    invs_dev = jnp.asarray([1.0 / float(s) for s in scale], jnp.float32)
    maxv_dev = jnp.asarray(max_values, jnp.float32)
    exp_dev = jnp.asarray([float(e) for e in exponent], jnp.float32)
    cmin_dev = jnp.asarray([float(c) for c in clamp_min], jnp.float32)
    cmax_dev = jnp.asarray([float(c) for c in clamp_max], jnp.float32)

    smem = pl.BlockSpec(memory_space=pltpu.MemorySpace.SMEM)

    clamped = pl.pallas_call(
        _perlin_kernel,
        out_shape=jax.ShapeDtypeStruct((B, Hp, Wp), jnp.float32),
        grid=(B, Hp // tH, Wp // tW),
        in_specs=[
            pl.BlockSpec((None, max_oct, 256, 512), lambda b, i, j: (b, 0, 0, 0)),
            pl.BlockSpec((None, 256, 1), lambda b, i, j: (b, 0, 0)),
            smem, smem, smem, smem, smem, smem,
        ],
        out_specs=pl.BlockSpec((None, tH, tW), lambda b, i, j: (b, i, j)),
        compiler_params=pltpu.CompilerParams(
            dimension_semantics=("parallel", "parallel", "parallel"),
            vmem_limit_bytes=40 * 1024 * 1024),
    )(ct_dev, invp_dev, octp_dev, invs_dev, maxv_dev, exp_dev, cmin_dev, cmax_dev)

    # Crop padding, per-image min/max normalization (tiny, mem-bound) in JAX.
    # NOTE: like the torch reference, a constant image yields 0/0 here.
    noise = clamped[:, :H, :W]
    mn = jnp.min(noise, axis=(1, 2), keepdims=True)
    mx = jnp.max(noise, axis=(1, 2), keepdims=True)
    normalized = (noise - mn) / (mx - mn)

    # images[i, :, :, c] = normalized_noise for c in 0..2  ->  (B, H, W, 3)
    return jnp.broadcast_to(normalized[..., None], (B, H, W, 3))


if __name__ == "__main__":
    width, height, batch = 16, 16, 2
    images = perlin_power_fractal_noise(
        width=width, height=height,
        scale=[10.0, 7.5],
        octaves=[4, 3],
        persistence=[0.5],
        lacunarity=[2.0],
        exponent=[2.0, 3.0],
        seeds=[0, 1],
        clamp_min=[-1.0],
        clamp_max=[1.0],
        batch_size=batch,
    )
    images = jax.block_until_ready(images)
    assert images.shape == (batch, height, width, 3), images.shape
    assert images.dtype == jnp.float32, images.dtype
    print("KERNEL_OK")
</pallas_src>

<mosaic_0001>
module attributes {stable_mosaic.version = 11 : i64} {
  func.func @_perlin_kernel(%arg0: i32, %arg1: i32, %arg2: i32, %arg3: memref<1x4x256x512xbf16, #tpu.memory_space<vmem>>, %arg4: memref<1x256x1xf32, #tpu.memory_space<vmem>>, %arg5: memref<2x16xf32, #tpu.memory_space<smem>>, %arg6: memref<2xf32, #tpu.memory_space<smem>>, %arg7: memref<2xf32, #tpu.memory_space<smem>>, %arg8: memref<2xf32, #tpu.memory_space<smem>>, %arg9: memref<2xf32, #tpu.memory_space<smem>>, %arg10: memref<2xf32, #tpu.memory_space<smem>>, %arg11: memref<1x16x128xf32, #tpu.memory_space<vmem>>) attributes {dimension_semantics = [#tpu.dimension_semantics<parallel>, #tpu.dimension_semantics<parallel>, #tpu.dimension_semantics<parallel>], iteration_bounds = array<i64: 2, 1, 1>, scalar_prefetch = 0 : i64, scratch_operands = 0 : i64, tpu.core_type = #tpu.core_type<tc>, window_params = [{transform_indices = @transform_0, window_bounds = array<i64: 1, 4, 256, 512>}, {transform_indices = @transform_1, window_bounds = array<i64: 1, 256, 1>}, {transform_indices = @transform_2, window_bounds = array<i64: 2, 16>}, {transform_indices = @transform_3, window_bounds = array<i64: 2>}, {transform_indices = @transform_4, window_bounds = array<i64: 2>}, {transform_indices = @transform_5, window_bounds = array<i64: 2>}, {transform_indices = @transform_6, window_bounds = array<i64: 2>}, {transform_indices = @transform_7, window_bounds = array<i64: 2>}, {transform_indices = @transform_8, window_bounds = array<i64: 1, 16, 128>}]} {
    %0 = arith.index_cast %arg0 : i32 to index
    %1 = memref.load %arg6[%0] : memref<2xf32, #tpu.memory_space<smem>>
    %2 = arith.index_cast %arg0 : i32 to index
    %3 = memref.load %arg7[%2] : memref<2xf32, #tpu.memory_space<smem>>
    %4 = arith.index_cast %arg0 : i32 to index
    %5 = memref.load %arg8[%4] : memref<2xf32, #tpu.memory_space<smem>>
    %6 = arith.index_cast %arg0 : i32 to index
    %7 = memref.load %arg9[%6] : memref<2xf32, #tpu.memory_space<smem>>
    %8 = arith.index_cast %arg0 : i32 to index
    %9 = memref.load %arg10[%8] : memref<2xf32, #tpu.memory_space<smem>>
    %c0 = arith.constant 0 : index
    %c0_0 = arith.constant 0 : index
    %c0_1 = arith.constant 0 : index
    %10 = vector.load %arg4[%c0, %c0_0, %c0_1] : memref<1x256x1xf32, #tpu.memory_space<vmem>>, vector<1x256x1xf32>
    %11 = vector.shape_cast %10 : vector<1x256x1xf32> to vector<256x1xf32>
    %12 = tpu.iota {dimensions = array<i32: 1>} : vector<1x128xi32>
    %c128_i32 = arith.constant 128 : i32
    %13 = arith.muli %arg2, %c128_i32 : i32
    %14 = vector.broadcast %13 : i32 to vector<1x128xi32>
    %15 = arith.addi %12, %14 : vector<1x128xi32>
    %16 = arith.sitofp %15 : vector<1x128xi32> to vector<1x128xf32>
    %17 = tpu.iota {dimensions = array<i32: 0>} : vector<16x1xi32>
    %c16_i32 = arith.constant 16 : i32
    %18 = arith.muli %arg1, %c16_i32 : i32
    %19 = vector.broadcast %18 : i32 to vector<16x1xi32>
    %20 = arith.addi %17, %19 : vector<16x1xi32>
    %21 = arith.sitofp %20 : vector<16x1xi32> to vector<16x1xf32>
    %22 = vector.broadcast %1 : f32 to vector<1x128xf32>
    %23 = arith.mulf %16, %22 : vector<1x128xf32>
    %24 = vector.broadcast %1 : f32 to vector<16x1xf32>
    %25 = arith.mulf %21, %24 : vector<16x1xf32>
    %26 = tpu.iota {dimensions = array<i32: 1>} : vector<1x256xi32>
    %27 = arith.sitofp %26 : vector<1x256xi32> to vector<1x256xf32>
    %cst = arith.constant 0.000000e+00 : f32
    %28 = vector.broadcast %cst : f32 to vector<16x128xf32>
    %c0_i32 = arith.constant 0 : i32
    %c4_i32 = arith.constant 4 : i32
    %29 = arith.addi %c0_i32, %c4_i32 : i32
    %c1_i32 = arith.constant 1 : i32
    %30 = scf.for %arg12 = %c0_i32 to %29 step %c1_i32 iter_args(%arg13 = %28) -> (vector<16x128xf32>)  : i32 {
      %c4_i32_16 = arith.constant 4 : i32
      %69 = arith.muli %arg12, %c4_i32_16 : i32
      %c0_i32_17 = arith.constant 0 : i32
      %70 = arith.addi %69, %c0_i32_17 : i32
      %71 = arith.index_cast %arg0 : i32 to index
      %72 = arith.index_cast %70 : i32 to index
      %73 = memref.load %arg5[%71, %72] : memref<2x16xf32, #tpu.memory_space<smem>>
      %c4_i32_18 = arith.constant 4 : i32
      %74 = arith.muli %arg12, %c4_i32_18 : i32
      %c1_i32_19 = arith.constant 1 : i32
      %75 = arith.addi %74, %c1_i32_19 : i32
      %76 = arith.index_cast %arg0 : i32 to index
      %77 = arith.index_cast %75 : i32 to index
      %78 = memref.load %arg5[%76, %77] : memref<2x16xf32, #tpu.memory_space<smem>>
      %c4_i32_20 = arith.constant 4 : i32
      %79 = arith.muli %arg12, %c4_i32_20 : i32
      %c2_i32 = arith.constant 2 : i32
      %80 = arith.addi %79, %c2_i32 : i32
      %81 = arith.index_cast %arg0 : i32 to index
      %82 = arith.index_cast %80 : i32 to index
      %83 = memref.load %arg5[%81, %82] : memref<2x16xf32, #tpu.memory_space<smem>>
      %c4_i32_21 = arith.constant 4 : i32
      %84 = arith.muli %arg12, %c4_i32_21 : i32
      %c3_i32 = arith.constant 3 : i32
      %85 = arith.addi %84, %c3_i32 : i32
      %86 = arith.index_cast %arg0 : i32 to index
      %87 = arith.index_cast %85 : i32 to index
      %88 = memref.load %arg5[%86, %87] : memref<2x16xf32, #tpu.memory_space<smem>>
      %89 = vector.broadcast %73 : f32 to vector<1x128xf32>
      %90 = arith.mulf %23, %89 : vector<1x128xf32>
      %91 = math.floor %90 : vector<1x128xf32>
      %cst_22 = arith.constant 2.550000e+02 : f32
      %92 = vector.broadcast %cst_22 : f32 to vector<1x128xf32>
      %93 = arith.remf %91, %92 : vector<1x128xf32>
      %cst_23 = arith.constant 0.000000e+00 : f32
      %94 = vector.broadcast %cst_23 : f32 to vector<1x128xf32>
      %95 = arith.cmpf one, %93, %94 : vector<1x128xf32>
      %cst_24 = arith.constant 0.000000e+00 : f32
      %96 = vector.broadcast %cst_24 : f32 to vector<1x128xf32>
      %97 = arith.cmpf olt, %93, %96 : vector<1x128xf32>
      %cst_25 = arith.constant 0.000000e+00 : f32
      %98 = arith.cmpf olt, %cst_22, %cst_25 : f32
      %99 = vector.broadcast %98 : i1 to vector<1x128xi1>
      %100 = vector.broadcast %99 : vector<1x128xi1> to vector<1x128xi1>
      %101 = arith.xori %97, %100 : vector<1x128xi1>
      %102 = arith.andi %101, %95 : vector<1x128xi1>
      %103 = vector.broadcast %cst_22 : f32 to vector<1x128xf32>
      %104 = arith.addf %93, %103 : vector<1x128xf32>
      %105 = arith.select %102, %104, %93 : vector<1x128xi1>, vector<1x128xf32>
      %106 = arith.subf %90, %91 : vector<1x128xf32>
      %107 = arith.mulf %106, %106 : vector<1x128xf32>
      %108 = arith.mulf %107, %106 : vector<1x128xf32>
      %cst_26 = arith.constant 6.000000e+00 : f32
      %109 = vector.broadcast %cst_26 : f32 to vector<1x128xf32>
      %110 = arith.mulf %106, %109 : vector<1x128xf32>
      %cst_27 = arith.constant 1.500000e+01 : f32
      %111 = vector.broadcast %cst_27 : f32 to vector<1x128xf32>
      %112 = arith.subf %110, %111 : vector<1x128xf32>
      %113 = arith.mulf %106, %112 : vector<1x128xf32>
      %cst_28 = arith.constant 1.000000e+01 : f32
      %114 = vector.broadcast %cst_28 : f32 to vector<1x128xf32>
      %115 = arith.addf %113, %114 : vector<1x128xf32>
      %116 = arith.mulf %108, %115 : vector<1x128xf32>
      %cst_29 = arith.constant 1.000000e+00 : f32
      %117 = vector.broadcast %cst_29 : f32 to vector<1x128xf32>
      %118 = arith.subf %106, %117 : vector<1x128xf32>
      %cst_30 = arith.constant 1.000000e+00 : f32
      %119 = vector.broadcast %cst_30 : f32 to vector<1x128xf32>
      %120 = arith.addf %105, %119 : vector<1x128xf32>
      %121 = tpu.concatenate %105, %120 in 1 : vector<1x128xf32>, vector<1x128xf32> -> vector<1x256xf32>
      %122 = vector.broadcast %11 : vector<256x1xf32> to vector<256x256xf32>
      %123 = vector.broadcast %121 : vector<1x256xf32> to vector<256x256xf32>
      %124 = arith.cmpf oeq, %122, %123 : vector<256x256xf32>
      %cst_31 = arith.constant 1.000000e+00 : f32
      %cst_32 = arith.constant 0.000000e+00 : f32
      %125 = vector.broadcast %cst_31 : f32 to vector<256x256xf32>
      %126 = vector.broadcast %cst_32 : f32 to vector<256x256xf32>
      %127 = arith.select %124, %125, %126 : vector<256x256xi1>, vector<256x256xf32>
      %128 = arith.truncf %127 : vector<256x256xf32> to vector<256x256xbf16>
      %129 = vector.broadcast %73 : f32 to vector<16x1xf32>
      %130 = arith.mulf %25, %129 : vector<16x1xf32>
      %131 = math.floor %130 : vector<16x1xf32>
      %cst_33 = arith.constant 2.550000e+02 : f32
      %132 = vector.broadcast %cst_33 : f32 to vector<16x1xf32>
      %133 = arith.remf %131, %132 : vector<16x1xf32>
      %cst_34 = arith.constant 0.000000e+00 : f32
      %134 = vector.broadcast %cst_34 : f32 to vector<16x1xf32>
      %135 = arith.cmpf one, %133, %134 : vector<16x1xf32>
      %cst_35 = arith.constant 0.000000e+00 : f32
      %136 = vector.broadcast %cst_35 : f32 to vector<16x1xf32>
      %137 = arith.cmpf olt, %133, %136 : vector<16x1xf32>
      %cst_36 = arith.constant 0.000000e+00 : f32
      %138 = arith.cmpf olt, %cst_33, %cst_36 : f32
      %139 = vector.broadcast %138 : i1 to vector<16x1xi1>
      %140 = vector.broadcast %139 : vector<16x1xi1> to vector<16x1xi1>
      %141 = arith.xori %137, %140 : vector<16x1xi1>
      %142 = arith.andi %141, %135 : vector<16x1xi1>
      %143 = vector.broadcast %cst_33 : f32 to vector<16x1xf32>
      %144 = arith.addf %133, %143 : vector<16x1xf32>
      %145 = arith.select %142, %144, %133 : vector<16x1xi1>, vector<16x1xf32>
      %146 = arith.subf %130, %131 : vector<16x1xf32>
      %147 = arith.mulf %146, %146 : vector<16x1xf32>
      %148 = arith.mulf %147, %146 : vector<16x1xf32>
      %cst_37 = arith.constant 6.000000e+00 : f32
      %149 = vector.broadcast %cst_37 : f32 to vector<16x1xf32>
      %150 = arith.mulf %146, %149 : vector<16x1xf32>
      %cst_38 = arith.constant 1.500000e+01 : f32
      %151 = vector.broadcast %cst_38 : f32 to vector<16x1xf32>
      %152 = arith.subf %150, %151 : vector<16x1xf32>
      %153 = arith.mulf %146, %152 : vector<16x1xf32>
      %cst_39 = arith.constant 1.000000e+01 : f32
      %154 = vector.broadcast %cst_39 : f32 to vector<16x1xf32>
      %155 = arith.addf %153, %154 : vector<16x1xf32>
      %156 = arith.mulf %148, %155 : vector<16x1xf32>
      %cst_40 = arith.constant 1.000000e+00 : f32
      %157 = vector.broadcast %cst_40 : f32 to vector<16x1xf32>
      %158 = arith.subf %146, %157 : vector<16x1xf32>
      %cst_41 = arith.constant 1.000000e+00 : f32
      %159 = vector.broadcast %cst_41 : f32 to vector<16x1xf32>
      %160 = arith.addf %145, %159 : vector<16x1xf32>
      %161 = tpu.concatenate %145, %160 in 0 : vector<16x1xf32>, vector<16x1xf32> -> vector<32x1xf32>
      %162 = vector.broadcast %161 : vector<32x1xf32> to vector<32x256xf32>
      %163 = vector.broadcast %27 : vector<1x256xf32> to vector<32x256xf32>
      %164 = arith.cmpf oeq, %162, %163 : vector<32x256xf32>
      %cst_42 = arith.constant 1.000000e+00 : f32
      %cst_43 = arith.constant 0.000000e+00 : f32
      %165 = vector.broadcast %cst_42 : f32 to vector<32x256xf32>
      %166 = vector.broadcast %cst_43 : f32 to vector<32x256xf32>
      %167 = arith.select %164, %165, %166 : vector<32x256xi1>, vector<32x256xf32>
      %168 = arith.truncf %167 : vector<32x256xf32> to vector<32x256xbf16>
      %c0_44 = arith.constant 0 : index
      %169 = arith.index_cast %arg12 : i32 to index
      %c0_45 = arith.constant 0 : index
      %c0_46 = arith.constant 0 : index
      %170 = vector.load %arg3[%c0_44, %169, %c0_45, %c0_46] : memref<1x4x256x512xbf16, #tpu.memory_space<vmem>>, vector<1x1x256x512xbf16>
      %171 = vector.shape_cast %170 : vector<1x1x256x512xbf16> to vector<256x512xbf16>
      %cst_47 = arith.constant dense<0.000000e+00> : vector<32x512xf32>
      %172 = tpu.matmul %168, %171, %cst_47 {dimension_numbers = #tpu.dot_dimension_numbers<[1], [0], [0], [1], [0, 0, 1, 1], [], []>} : vector<32x256xbf16>, vector<256x512xbf16>, vector<32x512xf32> -> vector<32x512xf32>
      %173 = vector.extract_strided_slice %172 {offsets = [0, 0], sizes = [32, 256], strides = [1, 1]} : vector<32x512xf32> to vector<32x256xf32>
      %174 = vector.extract_strided_slice %172 {offsets = [0, 256], sizes = [32, 256], strides = [1, 1]} : vector<32x512xf32> to vector<32x256xf32>
      %175 = tpu.concatenate %173, %174 in 0 : vector<32x256xf32>, vector<32x256xf32> -> vector<64x256xf32>
      %176 = arith.truncf %175 : vector<64x256xf32> to vector<64x256xbf16>
      %cst_48 = arith.constant dense<0.000000e+00> : vector<64x256xf32>
      %177 = tpu.matmul %176, %128, %cst_48 {dimension_numbers = #tpu.dot_dimension_numbers<[1], [0], [0], [1], [0, 0, 1, 1], [], []>} : vector<64x256xbf16>, vector<256x256xbf16>, vector<64x256xf32> -> vector<64x256xf32>
      %178 = arith.fptosi %177 : vector<64x256xf32> to vector<64x256xi32>
      %179 = vector.extract_strided_slice %178 {offsets = [0, 0], sizes = [16, 128], strides = [1, 1]} : vector<64x256xi32> to vector<16x128xi32>
      %180 = vector.extract_strided_slice %178 {offsets = [0, 128], sizes = [16, 128], strides = [1, 1]} : vector<64x256xi32> to vector<16x128xi32>
      %181 = vector.extract_strided_slice %178 {offsets = [16, 0], sizes = [16, 128], strides = [1, 1]} : vector<64x256xi32> to vector<16x128xi32>
      %182 = vector.extract_strided_slice %178 {offsets = [16, 128], sizes = [16, 128], strides = [1, 1]} : vector<64x256xi32> to vector<16x128xi32>
      %183 = vector.extract_strided_slice %178 {offsets = [32, 0], sizes = [16, 128], strides = [1, 1]} : vector<64x256xi32> to vector<16x128xi32>
      %184 = vector.extract_strided_slice %178 {offsets = [32, 128], sizes = [16, 128], strides = [1, 1]} : vector<64x256xi32> to vector<16x128xi32>
      %185 = vector.extract_strided_slice %178 {offsets = [48, 0], sizes = [16, 128], strides = [1, 1]} : vector<64x256xi32> to vector<16x128xi32>
      %186 = vector.extract_strided_slice %178 {offsets = [48, 128], sizes = [16, 128], strides = [1, 1]} : vector<64x256xi32> to vector<16x128xi32>
      %cst_49 = arith.constant 1.000000e+00 : f32
      %187 = arith.subf %78, %cst_49 : f32
      %c15_i32 = arith.constant 15 : i32
      %188 = vector.broadcast %c15_i32 : i32 to vector<16x128xi32>
      %189 = arith.andi %179, %188 : vector<16x128xi32>
      %c8_i32 = arith.constant 8 : i32
      %190 = vector.broadcast %c8_i32 : i32 to vector<16x128xi32>
      %191 = arith.cmpi slt, %189, %190 : vector<16x128xi32>
      %192 = vector.shape_cast %106 : vector<1x128xf32> to vector<1x128xf32>
      %193 = vector.broadcast %192 : vector<1x128xf32> to vector<16x128xf32>
      %194 = vector.shape_cast %146 : vector<16x1xf32> to vector<16x1xf32>
      %195 = vector.broadcast %194 : vector<16x1xf32> to vector<16x128xf32>
      %196 = arith.select %191, %193, %195 : vector<16x128xi1>, vector<16x128xf32>
      %c4_i32_50 = arith.constant 4 : i32
      %197 = vector.broadcast %c4_i32_50 : i32 to vector<16x128xi32>
      %198 = arith.cmpi slt, %189, %197 : vector<16x128xi32>
      %c12_i32 = arith.constant 12 : i32
      %199 = vector.broadcast %c12_i32 : i32 to vector<16x128xi32>
      %200 = arith.cmpi eq, %189, %199 : vector<16x128xi32>
      %c14_i32 = arith.constant 14 : i32
      %201 = vector.broadcast %c14_i32 : i32 to vector<16x128xi32>
      %202 = arith.cmpi eq, %189, %201 : vector<16x128xi32>
      %203 = arith.ori %200, %202 : vector<16x128xi1>
      %204 = vector.shape_cast %106 : vector<1x128xf32> to vector<1x128xf32>
      %205 = vector.broadcast %204 : vector<1x128xf32> to vector<16x128xf32>
      %206 = vector.broadcast %78 : f32 to vector<16x128xf32>
      %207 = arith.select %203, %205, %206 : vector<16x128xi1>, vector<16x128xf32>
      %208 = vector.shape_cast %146 : vector<16x1xf32> to vector<16x1xf32>
      %209 = vector.broadcast %208 : vector<16x1xf32> to vector<16x128xf32>
      %210 = arith.select %198, %209, %207 : vector<16x128xi1>, vector<16x128xf32>
      %c1_i32_51 = arith.constant 1 : i32
      %211 = vector.broadcast %c1_i32_51 : i32 to vector<16x128xi32>
      %212 = arith.andi %189, %211 : vector<16x128xi32>
      %c2_i32_52 = arith.constant 2 : i32
      %213 = vector.broadcast %c2_i32_52 : i32 to vector<16x128xi32>
      %214 = arith.muli %213, %212 : vector<16x128xi32>
      %c1_i32_53 = arith.constant 1 : i32
      %215 = vector.broadcast %c1_i32_53 : i32 to vector<16x128xi32>
      %216 = arith.subi %215, %214 : vector<16x128xi32>
      %217 = arith.sitofp %216 : vector<16x128xi32> to vector<16x128xf32>
      %c2_i32_54 = arith.constant 2 : i32
      %218 = vector.broadcast %c2_i32_54 : i32 to vector<16x128xi32>
      %219 = arith.andi %189, %218 : vector<16x128xi32>
      %c1_i32_55 = arith.constant 1 : i32
      %220 = vector.broadcast %c1_i32_55 : i32 to vector<16x128xi32>
      %221 = arith.subi %220, %219 : vector<16x128xi32>
      %222 = arith.sitofp %221 : vector<16x128xi32> to vector<16x128xf32>
      %223 = arith.mulf %217, %196 : vector<16x128xf32>
      %224 = arith.mulf %222, %210 : vector<16x128xf32>
      %225 = arith.addf %223, %224 : vector<16x128xf32>
      %c15_i32_56 = arith.constant 15 : i32
      %226 = vector.broadcast %c15_i32_56 : i32 to vector<16x128xi32>
      %227 = arith.andi %180, %226 : vector<16x128xi32>
      %c8_i32_57 = arith.constant 8 : i32
      %228 = vector.broadcast %c8_i32_57 : i32 to vector<16x128xi32>
      %229 = arith.cmpi slt, %227, %228 : vector<16x128xi32>
      %230 = vector.shape_cast %118 : vector<1x128xf32> to vector<1x128xf32>
      %231 = vector.broadcast %230 : vector<1x128xf32> to vector<16x128xf32>
      %232 = vector.shape_cast %146 : vector<16x1xf32> to vector<16x1xf32>
      %233 = vector.broadcast %232 : vector<16x1xf32> to vector<16x128xf32>
      %234 = arith.select %229, %231, %233 : vector<16x128xi1>, vector<16x128xf32>
      %c4_i32_58 = arith.constant 4 : i32
      %235 = vector.broadcast %c4_i32_58 : i32 to vector<16x128xi32>
      %236 = arith.cmpi slt, %227, %235 : vector<16x128xi32>
      %c12_i32_59 = arith.constant 12 : i32
      %237 = vector.broadcast %c12_i32_59 : i32 to vector<16x128xi32>
      %238 = arith.cmpi eq, %227, %237 : vector<16x128xi32>
      %c14_i32_60 = arith.constant 14 : i32
      %239 = vector.broadcast %c14_i32_60 : i32 to vector<16x128xi32>
      %240 = arith.cmpi eq, %227, %239 : vector<16x128xi32>
      %241 = arith.ori %238, %240 : vector<16x128xi1>
      %242 = vector.shape_cast %118 : vector<1x128xf32> to vector<1x128xf32>
      %243 = vector.broadcast %242 : vector<1x128xf32> to vector<16x128xf32>
      %244 = vector.broadcast %78 : f32 to vector<16x128xf32>
      %245 = arith.select %241, %243, %244 : vector<16x128xi1>, vector<16x128xf32>
      %246 = vector.shape_cast %146 : vector<16x1xf32> to vector<16x1xf32>
      %247 = vector.broadcast %246 : vector<16x1xf32> to vector<16x128xf32>
      %248 = arith.select %236, %247, %245 : vector<16x128xi1>, vector<16x128xf32>
      %c1_i32_61 = arith.constant 1 : i32
      %249 = vector.broadcast %c1_i32_61 : i32 to vector<16x128xi32>
      %250 = arith.andi %227, %249 : vector<16x128xi32>
      %c2_i32_62 = arith.constant 2 : i32
      %251 = vector.broadcast %c2_i32_62 : i32 to vector<16x128xi32>
      %252 = arith.muli %251, %250 : vector<16x128xi32>
      %c1_i32_63 = arith.constant 1 : i32
      %253 = vector.broadcast %c1_i32_63 : i32 to vector<16x128xi32>
      %254 = arith.subi %253, %252 : vector<16x128xi32>
      %255 = arith.sitofp %254 : vector<16x128xi32> to vector<16x128xf32>
      %c2_i32_64 = arith.constant 2 : i32
      %256 = vector.broadcast %c2_i32_64 : i32 to vector<16x128xi32>
      %257 = arith.andi %227, %256 : vector<16x128xi32>
      %c1_i32_65 = arith.constant 1 : i32
      %258 = vector.broadcast %c1_i32_65 : i32 to vector<16x128xi32>
      %259 = arith.subi %258, %257 : vector<16x128xi32>
      %260 = arith.sitofp %259 : vector<16x128xi32> to vector<16x128xf32>
      %261 = arith.mulf %255, %234 : vector<16x128xf32>
      %262 = arith.mulf %260, %248 : vector<16x128xf32>
      %263 = arith.addf %261, %262 : vector<16x128xf32>
      %c15_i32_66 = arith.constant 15 : i32
      %264 = vector.broadcast %c15_i32_66 : i32 to vector<16x128xi32>
      %265 = arith.andi %181, %264 : vector<16x128xi32>
      %c8_i32_67 = arith.constant 8 : i32
      %266 = vector.broadcast %c8_i32_67 : i32 to vector<16x128xi32>
      %267 = arith.cmpi slt, %265, %266 : vector<16x128xi32>
      %268 = vector.shape_cast %106 : vector<1x128xf32> to vector<1x128xf32>
      %269 = vector.broadcast %268 : vector<1x128xf32> to vector<16x128xf32>
      %270 = vector.shape_cast %158 : vector<16x1xf32> to vector<16x1xf32>
      %271 = vector.broadcast %270 : vector<16x1xf32> to vector<16x128xf32>
      %272 = arith.select %267, %269, %271 : vector<16x128xi1>, vector<16x128xf32>
      %c4_i32_68 = arith.constant 4 : i32
      %273 = vector.broadcast %c4_i32_68 : i32 to vector<16x128xi32>
      %274 = arith.cmpi slt, %265, %273 : vector<16x128xi32>
      %c12_i32_69 = arith.constant 12 : i32
      %275 = vector.broadcast %c12_i32_69 : i32 to vector<16x128xi32>
      %276 = arith.cmpi eq, %265, %275 : vector<16x128xi32>
      %c14_i32_70 = arith.constant 14 : i32
      %277 = vector.broadcast %c14_i32_70 : i32 to vector<16x128xi32>
      %278 = arith.cmpi eq, %265, %277 : vector<16x128xi32>
      %279 = arith.ori %276, %278 : vector<16x128xi1>
      %280 = vector.shape_cast %106 : vector<1x128xf32> to vector<1x128xf32>
      %281 = vector.broadcast %280 : vector<1x128xf32> to vector<16x128xf32>
      %282 = vector.broadcast %78 : f32 to vector<16x128xf32>
      %283 = arith.select %279, %281, %282 : vector<16x128xi1>, vector<16x128xf32>
      %284 = vector.shape_cast %158 : vector<16x1xf32> to vector<16x1xf32>
      %285 = vector.broadcast %284 : vector<16x1xf32> to vector<16x128xf32>
      %286 = arith.select %274, %285, %283 : vector<16x128xi1>, vector<16x128xf32>
      %c1_i32_71 = arith.constant 1 : i32
      %287 = vector.broadcast %c1_i32_71 : i32 to vector<16x128xi32>
      %288 = arith.andi %265, %287 : vector<16x128xi32>
      %c2_i32_72 = arith.constant 2 : i32
      %289 = vector.broadcast %c2_i32_72 : i32 to vector<16x128xi32>
      %290 = arith.muli %289, %288 : vector<16x128xi32>
      %c1_i32_73 = arith.constant 1 : i32
      %291 = vector.broadcast %c1_i32_73 : i32 to vector<16x128xi32>
      %292 = arith.subi %291, %290 : vector<16x128xi32>
      %293 = arith.sitofp %292 : vector<16x128xi32> to vector<16x128xf32>
      %c2_i32_74 = arith.constant 2 : i32
      %294 = vector.broadcast %c2_i32_74 : i32 to vector<16x128xi32>
      %295 = arith.andi %265, %294 : vector<16x128xi32>
      %c1_i32_75 = arith.constant 1 : i32
      %296 = vector.broadcast %c1_i32_75 : i32 to vector<16x128xi32>
      %297 = arith.subi %296, %295 : vector<16x128xi32>
      %298 = arith.sitofp %297 : vector<16x128xi32> to vector<16x128xf32>
      %299 = arith.mulf %293, %272 : vector<16x128xf32>
      %300 = arith.mulf %298, %286 : vector<16x128xf32>
      %301 = arith.addf %299, %300 : vector<16x128xf32>
      %c15_i32_76 = arith.constant 15 : i32
      %302 = vector.broadcast %c15_i32_76 : i32 to vector<16x128xi32>
      %303 = arith.andi %182, %302 : vector<16x128xi32>
      %c8_i32_77 = arith.constant 8 : i32
      %304 = vector.broadcast %c8_i32_77 : i32 to vector<16x128xi32>
      %305 = arith.cmpi slt, %303, %304 : vector<16x128xi32>
      %306 = vector.shape_cast %118 : vector<1x128xf32> to vector<1x128xf32>
      %307 = vector.broadcast %306 : vector<1x128xf32> to vector<16x128xf32>
      %308 = vector.shape_cast %158 : vector<16x1xf32> to vector<16x1xf32>
      %309 = vector.broadcast %308 : vector<16x1xf32> to vector<16x128xf32>
      %310 = arith.select %305, %307, %309 : vector<16x128xi1>, vector<16x128xf32>
      %c4_i32_78 = arith.constant 4 : i32
      %311 = vector.broadcast %c4_i32_78 : i32 to vector<16x128xi32>
      %312 = arith.cmpi slt, %303, %311 : vector<16x128xi32>
      %c12_i32_79 = arith.constant 12 : i32
      %313 = vector.broadcast %c12_i32_79 : i32 to vector<16x128xi32>
      %314 = arith.cmpi eq, %303, %313 : vector<16x128xi32>
      %c14_i32_80 = arith.constant 14 : i32
      %315 = vector.broadcast %c14_i32_80 : i32 to vector<16x128xi32>
      %316 = arith.cmpi eq, %303, %315 : vector<16x128xi32>
      %317 = arith.ori %314, %316 : vector<16x128xi1>
      %318 = vector.shape_cast %118 : vector<1x128xf32> to vector<1x128xf32>
      %319 = vector.broadcast %318 : vector<1x128xf32> to vector<16x128xf32>
      %320 = vector.broadcast %78 : f32 to vector<16x128xf32>
      %321 = arith.select %317, %319, %320 : vector<16x128xi1>, vector<16x128xf32>
      %322 = vector.shape_cast %158 : vector<16x1xf32> to vector<16x1xf32>
      %323 = vector.broadcast %322 : vector<16x1xf32> to vector<16x128xf32>
      %324 = arith.select %312, %323, %321 : vector<16x128xi1>, vector<16x128xf32>
      %c1_i32_81 = arith.constant 1 : i32
      %325 = vector.broadcast %c1_i32_81 : i32 to vector<16x128xi32>
      %326 = arith.andi %303, %325 : vector<16x128xi32>
      %c2_i32_82 = arith.constant 2 : i32
      %327 = vector.broadcast %c2_i32_82 : i32 to vector<16x128xi32>
      %328 = arith.muli %327, %326 : vector<16x128xi32>
      %c1_i32_83 = arith.constant 1 : i32
      %329 = vector.broadcast %c1_i32_83 : i32 to vector<16x128xi32>
      %330 = arith.subi %329, %328 : vector<16x128xi32>
      %331 = arith.sitofp %330 : vector<16x128xi32> to vector<16x128xf32>
      %c2_i32_84 = arith.constant 2 : i32
      %332 = vector.broadcast %c2_i32_84 : i32 to vector<16x128xi32>
      %333 = arith.andi %303, %332 : vector<16x128xi32>
      %c1_i32_85 = arith.constant 1 : i32
      %334 = vector.broadcast %c1_i32_85 : i32 to vector<16x128xi32>
      %335 = arith.subi %334, %333 : vector<16x128xi32>
      %336 = arith.sitofp %335 : vector<16x128xi32> to vector<16x128xf32>
      %337 = arith.mulf %331, %310 : vector<16x128xf32>
      %338 = arith.mulf %336, %324 : vector<16x128xf32>
      %339 = arith.addf %337, %338 : vector<16x128xf32>
      %c15_i32_86 = arith.constant 15 : i32
      %340 = vector.broadcast %c15_i32_86 : i32 to vector<16x128xi32>
      %341 = arith.andi %183, %340 : vector<16x128xi32>
      %c8_i32_87 = arith.constant 8 : i32
      %342 = vector.broadcast %c8_i32_87 : i32 to vector<16x128xi32>
      %343 = arith.cmpi slt, %341, %342 : vector<16x128xi32>
      %344 = vector.shape_cast %106 : vector<1x128xf32> to vector<1x128xf32>
      %345 = vector.broadcast %344 : vector<1x128xf32> to vector<16x128xf32>
      %346 = vector.shape_cast %146 : vector<16x1xf32> to vector<16x1xf32>
      %347 = vector.broadcast %346 : vector<16x1xf32> to vector<16x128xf32>
      %348 = arith.select %343, %345, %347 : vector<16x128xi1>, vector<16x128xf32>
      %c4_i32_88 = arith.constant 4 : i32
      %349 = vector.broadcast %c4_i32_88 : i32 to vector<16x128xi32>
      %350 = arith.cmpi slt, %341, %349 : vector<16x128xi32>
      %c12_i32_89 = arith.constant 12 : i32
      %351 = vector.broadcast %c12_i32_89 : i32 to vector<16x128xi32>
      %352 = arith.cmpi eq, %341, %351 : vector<16x128xi32>
      %c14_i32_90 = arith.constant 14 : i32
      %353 = vector.broadcast %c14_i32_90 : i32 to vector<16x128xi32>
      %354 = arith.cmpi eq, %341, %353 : vector<16x128xi32>
      %355 = arith.ori %352, %354 : vector<16x128xi1>
      %356 = vector.shape_cast %106 : vector<1x128xf32> to vector<1x128xf32>
      %357 = vector.broadcast %356 : vector<1x128xf32> to vector<16x128xf32>
      %358 = vector.broadcast %187 : f32 to vector<16x128xf32>
      %359 = arith.select %355, %357, %358 : vector<16x128xi1>, vector<16x128xf32>
      %360 = vector.shape_cast %146 : vector<16x1xf32> to vector<16x1xf32>
      %361 = vector.broadcast %360 : vector<16x1xf32> to vector<16x128xf32>
      %362 = arith.select %350, %361, %359 : vector<16x128xi1>, vector<16x128xf32>
      %c1_i32_91 = arith.constant 1 : i32
      %363 = vector.broadcast %c1_i32_91 : i32 to vector<16x128xi32>
      %364 = arith.andi %341, %363 : vector<16x128xi32>
      %c2_i32_92 = arith.constant 2 : i32
      %365 = vector.broadcast %c2_i32_92 : i32 to vector<16x128xi32>
      %366 = arith.muli %365, %364 : vector<16x128xi32>
      %c1_i32_93 = arith.constant 1 : i32
      %367 = vector.broadcast %c1_i32_93 : i32 to vector<16x128xi32>
      %368 = arith.subi %367, %366 : vector<16x128xi32>
      %369 = arith.sitofp %368 : vector<16x128xi32> to vector<16x128xf32>
      %c2_i32_94 = arith.constant 2 : i32
      %370 = vector.broadcast %c2_i32_94 : i32 to vector<16x128xi32>
      %371 = arith.andi %341, %370 : vector<16x128xi32>
      %c1_i32_95 = arith.constant 1 : i32
      %372 = vector.broadcast %c1_i32_95 : i32 to vector<16x128xi32>
      %373 = arith.subi %372, %371 : vector<16x128xi32>
      %374 = arith.sitofp %373 : vector<16x128xi32> to vector<16x128xf32>
      %375 = arith.mulf %369, %348 : vector<16x128xf32>
      %376 = arith.mulf %374, %362 : vector<16x128xf32>
      %377 = arith.addf %375, %376 : vector<16x128xf32>
      %c15_i32_96 = arith.constant 15 : i32
      %378 = vector.broadcast %c15_i32_96 : i32 to vector<16x128xi32>
      %379 = arith.andi %184, %378 : vector<16x128xi32>
      %c8_i32_97 = arith.constant 8 : i32
      %380 = vector.broadcast %c8_i32_97 : i32 to vector<16x128xi32>
      %381 = arith.cmpi slt, %379, %380 : vector<16x128xi32>
      %382 = vector.shape_cast %118 : vector<1x128xf32> to vector<1x128xf32>
      %383 = vector.broadcast %382 : vector<1x128xf32> to vector<16x128xf32>
      %384 = vector.shape_cast %146 : vector<16x1xf32> to vector<16x1xf32>
      %385 = vector.broadcast %384 : vector<16x1xf32> to vector<16x128xf32>
      %386 = arith.select %381, %383, %385 : vector<16x128xi1>, vector<16x128xf32>
      %c4_i32_98 = arith.constant 4 : i32
      %387 = vector.broadcast %c4_i32_98 : i32 to vector<16x128xi32>
      %388 = arith.cmpi slt, %379, %387 : vector<16x128xi32>
      %c12_i32_99 = arith.constant 12 : i32
      %389 = vector.broadcast %c12_i32_99 : i32 to vector<16x128xi32>
      %390 = arith.cmpi eq, %379, %389 : vector<16x128xi32>
      %c14_i32_100 = arith.constant 14 : i32
      %391 = vector.broadcast %c14_i32_100 : i32 to vector<16x128xi32>
      %392 = arith.cmpi eq, %379, %391 : vector<16x128xi32>
      %393 = arith.ori %390, %392 : vector<16x128xi1>
      %394 = vector.shape_cast %118 : vector<1x128xf32> to vector<1x128xf32>
      %395 = vector.broadcast %394 : vector<1x128xf32> to vector<16x128xf32>
      %396 = vector.broadcast %187 : f32 to vector<16x128xf32>
      %397 = arith.select %393, %395, %396 : vector<16x128xi1>, vector<16x128xf32>
      %398 = vector.shape_cast %146 : vector<16x1xf32> to vector<16x1xf32>
      %399 = vector.broadcast %398 : vector<16x1xf32> to vector<16x128xf32>
      %400 = arith.select %388, %399, %397 : vector<16x128xi1>, vector<16x128xf32>
      %c1_i32_101 = arith.constant 1 : i32
      %401 = vector.broadcast %c1_i32_101 : i32 to vector<16x128xi32>
      %402 = arith.andi %379, %401 : vector<16x128xi32>
      %c2_i32_102 = arith.constant 2 : i32
      %403 = vector.broadcast %c2_i32_102 : i32 to vector<16x128xi32>
      %404 = arith.muli %403, %402 : vector<16x128xi32>
      %c1_i32_103 = arith.constant 1 : i32
      %405 = vector.broadcast %c1_i32_103 : i32 to vector<16x128xi32>
      %406 = arith.subi %405, %404 : vector<16x128xi32>
      %407 = arith.sitofp %406 : vector<16x128xi32> to vector<16x128xf32>
      %c2_i32_104 = arith.constant 2 : i32
      %408 = vector.broadcast %c2_i32_104 : i32 to vector<16x128xi32>
      %409 = arith.andi %379, %408 : vector<16x128xi32>
      %c1_i32_105 = arith.constant 1 : i32
      %410 = vector.broadcast %c1_i32_105 : i32 to vector<16x128xi32>
      %411 = arith.subi %410, %409 : vector<16x128xi32>
      %412 = arith.sitofp %411 : vector<16x128xi32> to vector<16x128xf32>
      %413 = arith.mulf %407, %386 : vector<16x128xf32>
      %414 = arith.mulf %412, %400 : vector<16x128xf32>
      %415 = arith.addf %413, %414 : vector<16x128xf32>
      %c15_i32_106 = arith.constant 15 : i32
      %416 = vector.broadcast %c15_i32_106 : i32 to vector<16x128xi32>
      %417 = arith.andi %185, %416 : vector<16x128xi32>
      %c8_i32_107 = arith.constant 8 : i32
      %418 = vector.broadcast %c8_i32_107 : i32 to vector<16x128xi32>
      %419 = arith.cmpi slt, %417, %418 : vector<16x128xi32>
      %420 = vector.shape_cast %106 : vector<1x128xf32> to vector<1x128xf32>
      %421 = vector.broadcast %420 : vector<1x128xf32> to vector<16x128xf32>
      %422 = vector.shape_cast %158 : vector<16x1xf32> to vector<16x1xf32>
      %423 = vector.broadcast %422 : vector<16x1xf32> to vector<16x128xf32>
      %424 = arith.select %419, %421, %423 : vector<16x128xi1>, vector<16x128xf32>
      %c4_i32_108 = arith.constant 4 : i32
      %425 = vector.broadcast %c4_i32_108 : i32 to vector<16x128xi32>
      %426 = arith.cmpi slt, %417, %425 : vector<16x128xi32>
      %c12_i32_109 = arith.constant 12 : i32
      %427 = vector.broadcast %c12_i32_109 : i32 to vector<16x128xi32>
      %428 = arith.cmpi eq, %417, %427 : vector<16x128xi32>
      %c14_i32_110 = arith.constant 14 : i32
      %429 = vector.broadcast %c14_i32_110 : i32 to vector<16x128xi32>
      %430 = arith.cmpi eq, %417, %429 : vector<16x128xi32>
      %431 = arith.ori %428, %430 : vector<16x128xi1>
      %432 = vector.shape_cast %106 : vector<1x128xf32> to vector<1x128xf32>
      %433 = vector.broadcast %432 : vector<1x128xf32> to vector<16x128xf32>
      %434 = vector.broadcast %187 : f32 to vector<16x128xf32>
      %435 = arith.select %431, %433, %434 : vector<16x128xi1>, vector<16x128xf32>
      %436 = vector.shape_cast %158 : vector<16x1xf32> to vector<16x1xf32>
      %437 = vector.broadcast %436 : vector<16x1xf32> to vector<16x128xf32>
      %438 = arith.select %426, %437, %435 : vector<16x128xi1>, vector<16x128xf32>
      %c1_i32_111 = arith.constant 1 : i32
      %439 = vector.broadcast %c1_i32_111 : i32 to vector<16x128xi32>
      %440 = arith.andi %417, %439 : vector<16x128xi32>
      %c2_i32_112 = arith.constant 2 : i32
      %441 = vector.broadcast %c2_i32_112 : i32 to vector<16x128xi32>
      %442 = arith.muli %441, %440 : vector<16x128xi32>
      %c1_i32_113 = arith.constant 1 : i32
      %443 = vector.broadcast %c1_i32_113 : i32 to vector<16x128xi32>
      %444 = arith.subi %443, %442 : vector<16x128xi32>
      %445 = arith.sitofp %444 : vector<16x128xi32> to vector<16x128xf32>
      %c2_i32_114 = arith.constant 2 : i32
      %446 = vector.broadcast %c2_i32_114 : i32 to vector<16x128xi32>
      %447 = arith.andi %417, %446 : vector<16x128xi32>
      %c1_i32_115 = arith.constant 1 : i32
      %448 = vector.broadcast %c1_i32_115 : i32 to vector<16x128xi32>
      %449 = arith.subi %448, %447 : vector<16x128xi32>
      %450 = arith.sitofp %449 : vector<16x128xi32> to vector<16x128xf32>
      %451 = arith.mulf %445, %424 : vector<16x128xf32>
      %452 = arith.mulf %450, %438 : vector<16x128xf32>
      %453 = arith.addf %451, %452 : vector<16x128xf32>
      %c15_i32_116 = arith.constant 15 : i32
      %454 = vector.broadcast %c15_i32_116 : i32 to vector<16x128xi32>
      %455 = arith.andi %186, %454 : vector<16x128xi32>
      %c8_i32_117 = arith.constant 8 : i32
      %456 = vector.broadcast %c8_i32_117 : i32 to vector<16x128xi32>
      %457 = arith.cmpi slt, %455, %456 : vector<16x128xi32>
      %458 = vector.shape_cast %118 : vector<1x128xf32> to vector<1x128xf32>
      %459 = vector.broadcast %458 : vector<1x128xf32> to vector<16x128xf32>
      %460 = vector.shape_cast %158 : vector<16x1xf32> to vector<16x1xf32>
      %461 = vector.broadcast %460 : vector<16x1xf32> to vector<16x128xf32>
      %462 = arith.select %457, %459, %461 : vector<16x128xi1>, vector<16x128xf32>
      %c4_i32_118 = arith.constant 4 : i32
      %463 = vector.broadcast %c4_i32_118 : i32 to vector<16x128xi32>
      %464 = arith.cmpi slt, %455, %463 : vector<16x128xi32>
      %c12_i32_119 = arith.constant 12 : i32
      %465 = vector.broadcast %c12_i32_119 : i32 to vector<16x128xi32>
      %466 = arith.cmpi eq, %455, %465 : vector<16x128xi32>
      %c14_i32_120 = arith.constant 14 : i32
      %467 = vector.broadcast %c14_i32_120 : i32 to vector<16x128xi32>
      %468 = arith.cmpi eq, %455, %467 : vector<16x128xi32>
      %469 = arith.ori %466, %468 : vector<16x128xi1>
      %470 = vector.shape_cast %118 : vector<1x128xf32> to vector<1x128xf32>
      %471 = vector.broadcast %470 : vector<1x128xf32> to vector<16x128xf32>
      %472 = vector.broadcast %187 : f32 to vector<16x128xf32>
      %473 = arith.select %469, %471, %472 : vector<16x128xi1>, vector<16x128xf32>
      %474 = vector.shape_cast %158 : vector<16x1xf32> to vector<16x1xf32>
      %475 = vector.broadcast %474 : vector<16x1xf32> to vector<16x128xf32>
      %476 = arith.select %464, %475, %473 : vector<16x128xi1>, vector<16x128xf32>
      %c1_i32_121 = arith.constant 1 : i32
      %477 = vector.broadcast %c1_i32_121 : i32 to vector<16x128xi32>
      %478 = arith.andi %455, %477 : vector<16x128xi32>
      %c2_i32_122 = arith.constant 2 : i32
      %479 = vector.broadcast %c2_i32_122 : i32 to vector<16x128xi32>
      %480 = arith.muli %479, %478 : vector<16x128xi32>
      %c1_i32_123 = arith.constant 1 : i32
      %481 = vector.broadcast %c1_i32_123 : i32 to vector<16x128xi32>
      %482 = arith.subi %481, %480 : vector<16x128xi32>
      %483 = arith.sitofp %482 : vector<16x128xi32> to vector<16x128xf32>
      %c2_i32_124 = arith.constant 2 : i32
      %484 = vector.broadcast %c2_i32_124 : i32 to vector<16x128xi32>
      %485 = arith.andi %455, %484 : vector<16x128xi32>
      %c1_i32_125 = arith.constant 1 : i32
      %486 = vector.broadcast %c1_i32_125 : i32 to vector<16x128xi32>
      %487 = arith.subi %486, %485 : vector<16x128xi32>
      %488 = arith.sitofp %487 : vector<16x128xi32> to vector<16x128xf32>
      %489 = arith.mulf %483, %462 : vector<16x128xf32>
      %490 = arith.mulf %488, %476 : vector<16x128xf32>
      %491 = arith.addf %489, %490 : vector<16x128xf32>
      %492 = arith.subf %263, %225 : vector<16x128xf32>
      %493 = vector.broadcast %116 : vector<1x128xf32> to vector<16x128xf32>
      %494 = arith.mulf %493, %492 : vector<16x128xf32>
      %495 = arith.addf %225, %494 : vector<16x128xf32>
      %496 = arith.subf %339, %301 : vector<16x128xf32>
      %497 = vector.broadcast %116 : vector<1x128xf32> to vector<16x128xf32>
      %498 = arith.mulf %497, %496 : vector<16x128xf32>
      %499 = arith.addf %301, %498 : vector<16x128xf32>
      %500 = arith.subf %499, %495 : vector<16x128xf32>
      %501 = vector.broadcast %156 : vector<16x1xf32> to vector<16x128xf32>
      %502 = arith.mulf %501, %500 : vector<16x128xf32>
      %503 = arith.addf %495, %502 : vector<16x128xf32>
      %504 = arith.subf %415, %377 : vector<16x128xf32>
      %505 = vector.broadcast %116 : vector<1x128xf32> to vector<16x128xf32>
      %506 = arith.mulf %505, %504 : vector<16x128xf32>
      %507 = arith.addf %377, %506 : vector<16x128xf32>
      %508 = arith.subf %491, %453 : vector<16x128xf32>
      %509 = vector.broadcast %116 : vector<1x128xf32> to vector<16x128xf32>
      %510 = arith.mulf %509, %508 : vector<16x128xf32>
      %511 = arith.addf %453, %510 : vector<16x128xf32>
      %512 = arith.subf %511, %507 : vector<16x128xf32>
      %513 = vector.broadcast %156 : vector<16x1xf32> to vector<16x128xf32>
      %514 = arith.mulf %513, %512 : vector<16x128xf32>
      %515 = arith.addf %507, %514 : vector<16x128xf32>
      %516 = arith.subf %515, %503 : vector<16x128xf32>
      %517 = vector.broadcast %83 : f32 to vector<16x128xf32>
      %518 = arith.mulf %517, %516 : vector<16x128xf32>
      %519 = arith.addf %503, %518 : vector<16x128xf32>
      %520 = vector.broadcast %88 : f32 to vector<16x128xf32>
      %521 = arith.mulf %520, %519 : vector<16x128xf32>
      %522 = arith.addf %arg13, %521 : vector<16x128xf32>
      scf.yield %522 : vector<16x128xf32>
    }
    %c4_i32_2 = arith.constant 4 : i32
    %31 = vector.broadcast %3 : f32 to vector<16x128xf32>
    %32 = arith.divf %30, %31 : vector<16x128xf32>
    %33 = math.absf %32 : vector<16x128xf32>
    %34 = math.log %33 : vector<16x128xf32>
    %35 = vector.broadcast %5 : f32 to vector<16x128xf32>
    %36 = arith.mulf %35, %34 : vector<16x128xf32>
    %37 = math.exp %36 : vector<16x128xf32>
    %38 = math.floor %5 : f32
    %39 = arith.cmpf oeq, %38, %5 : f32
    %40 = math.absf %5 : f32
    %41 = math.floor %40 : f32
    %cst_3 = arith.constant 2.000000e+00 : f32
    %42 = arith.remf %41, %cst_3 : f32
    %cst_4 = arith.constant 0.000000e+00 : f32
    %43 = arith.cmpf one, %42, %cst_4 : f32
    %cst_5 = arith.constant 0.000000e+00 : f32
    %44 = arith.cmpf olt, %42, %cst_5 : f32
    %cst_6 = arith.constant 0.000000e+00 : f32
    %45 = arith.cmpf olt, %cst_3, %cst_6 : f32
    %46 = arith.xori %44, %45 : i1
    %47 = arith.andi %46, %43 : i1
    %48 = arith.addf %42, %cst_3 : f32
    %49 = arith.select %47, %48, %42 : f32
    %cst_7 = arith.constant 1.000000e+00 : f32
    %50 = arith.cmpf oeq, %49, %cst_7 : f32
    %cst_8 = arith.constant 0.000000e+00 : f32
    %51 = vector.broadcast %cst_8 : f32 to vector<16x128xf32>
    %52 = arith.subf %51, %37 : vector<16x128xf32>
    %53 = arith.select %50, %52, %37 : vector<16x128xf32>
    %cst_9 = arith.constant 0x7FC00000 : f32
    %54 = vector.broadcast %cst_9 : f32 to vector<16x128xf32>
    %55 = arith.select %39, %53, %54 : vector<16x128xf32>
    %cst_10 = arith.constant 0.000000e+00 : f32
    %56 = vector.broadcast %cst_10 : f32 to vector<16x128xf32>
    %57 = arith.cmpf olt, %32, %56 : vector<16x128xf32>
    %58 = arith.select %57, %55, %37 : vector<16x128xi1>, vector<16x128xf32>
    %cst_11 = arith.constant 0.000000e+00 : f32
    %59 = arith.cmpf oeq, %5, %cst_11 : f32
    %cst_12 = arith.constant 1.000000e+00 : f32
    %60 = vector.broadcast %cst_12 : f32 to vector<16x128xf32>
    %61 = arith.select %59, %60, %58 : vector<16x128xf32>
    %62 = vector.broadcast %7 : f32 to vector<16x128xf32>
    %63 = arith.maximumf %62, %61 : vector<16x128xf32>
    %64 = vector.broadcast %9 : f32 to vector<16x128xf32>
    %65 = arith.minimumf %64, %63 : vector<16x128xf32>
    %c0_13 = arith.constant 0 : index
    %c0_14 = arith.constant 0 : index
    %c0_15 = arith.constant 0 : index
    %66 = vector.load %arg11[%c0_13, %c0_14, %c0_15] : memref<1x16x128xf32, #tpu.memory_space<vmem>>, vector<1x16x128xf32>
    %67 = vector.shape_cast %66 : vector<1x16x128xf32> to vector<16x128xf32>
    %68 = vector.shape_cast %65 : vector<16x128xf32> to vector<1x16x128xf32>
    tpu.vector_store %arg11[%c0_13, %c0_14, %c0_15], %68 {strides = array<i32>} : memref<1x16x128xf32, #tpu.memory_space<vmem>>, vector<1x16x128xf32>,
    return
  }
  func.func @transform_0(%arg0: i32, %arg1: i32, %arg2: i32) -> (i32, i32, i32, i32) {
    %c0_i32 = arith.constant 0 : i32
    %c0_i32_0 = arith.constant 0 : i32
    %c0_i32_1 = arith.constant 0 : i32
    %c0_i32_2 = arith.constant 0 : i32
    return %arg0, %c0_i32, %c0_i32_0, %c0_i32_1 : i32, i32, i32, i32
  }
  func.func @transform_1(%arg0: i32, %arg1: i32, %arg2: i32) -> (i32, i32, i32) {
    %c0_i32 = arith.constant 0 : i32
    %c0_i32_0 = arith.constant 0 : i32
    %c0_i32_1 = arith.constant 0 : i32
    return %arg0, %c0_i32, %c0_i32_0 : i32, i32, i32
  }
  func.func @transform_2(%arg0: i32, %arg1: i32, %arg2: i32) -> (i32, i32) {
    %c0_i32 = arith.constant 0 : i32
    %c0_i32_0 = arith.constant 0 : i32
    %c0_i32_1 = arith.constant 0 : i32
    return %c0_i32, %c0_i32_0 : i32, i32
  }
  func.func @transform_3(%arg0: i32, %arg1: i32, %arg2: i32) -> i32 {
    %c0_i32 = arith.constant 0 : i32
    %c0_i32_0 = arith.constant 0 : i32
    return %c0_i32 : i32
  }
  func.func @transform_4(%arg0: i32, %arg1: i32, %arg2: i32) -> i32 {
    %c0_i32 = arith.constant 0 : i32
    %c0_i32_0 = arith.constant 0 : i32
    return %c0_i32 : i32
  }
  func.func @transform_5(%arg0: i32, %arg1: i32, %arg2: i32) -> i32 {
    %c0_i32 = arith.constant 0 : i32
    %c0_i32_0 = arith.constant 0 : i32
    return %c0_i32 : i32
  }
  func.func @transform_6(%arg0: i32, %arg1: i32, %arg2: i32) -> i32 {
    %c0_i32 = arith.constant 0 : i32
    %c0_i32_0 = arith.constant 0 : i32
    return %c0_i32 : i32
  }
  func.func @transform_7(%arg0: i32, %arg1: i32, %arg2: i32) -> i32 {
    %c0_i32 = arith.constant 0 : i32
    %c0_i32_0 = arith.constant 0 : i32
    return %c0_i32 : i32
  }
  func.func @transform_8(%arg0: i32, %arg1: i32, %arg2: i32) -> (i32, i32, i32) {
    %c0_i32 = arith.constant 0 : i32
    return %arg0, %arg1, %arg2 : i32, i32, i32
  }
}

</mosaic_0001>

<bundles_post_ra>
// kernel: tpu_custom_call.1
= control target key start
LH: loop header
LB: loop body
LE: loop exit
PB: predicated region body
PF: predicated region fallthrough
CT: control target
= control target key end

     0   :  { %s4282_s0 = inlined_call_operand.hbm [shape: bf16[2,4,256,512], index: 0, kind: input, shape index: {}]   ;;  %s4283_s1 = inlined_call_operand.vmem [shape: f32[2,256,1], index: 1, kind: input, shape index: {}]   ;;  %s4284_s2 = inlined_call_operand.hbm [shape: f32[2,16], index: 2, kind: input, shape index: {}]   ;;  %s4285_s3 = inlined_call_operand.hbm [shape: f32[2], index: 3, kind: input, shape index: {}]   ;;  %s4286_s4 = inlined_call_operand.hbm [shape: f32[2], index: 4, kind: input, shape index: {}]   ;;  %s4287_s5 = inlined_call_operand.hbm [shape: f32[2], index: 5, kind: input, shape index: {}]   ;;  %s4288_s6 = inlined_call_operand.hbm [shape: f32[2], index: 6, kind: input, shape index: {}]   ;;  %s4289_s7 = inlined_call_operand.hbm [shape: f32[2], index: 7, kind: input, shape index: {}]   ;;  %s4290_s8 = inlined_call_operand.hbm [shape: f32[2,16,128], index: 8, kind: output, shape index: {}]  }
   0x1   :  { %4295 = sst [smem:[#allocation41_spill]] %s4282_s0 }
   0x2   :  { %4296 = sst [smem:[#allocation42_spill]] %s4283_s1 }
   0x3   :  { %4297 = sst [smem:[#allocation43_spill]] %s4284_s2 }
   0x4   :  { %4298 = sst [smem:[#allocation44_spill]] %s4285_s3 }
   0x5   :  { %4299 = sst [smem:[#allocation45_spill]] %s4286_s4 }
   0x6   :  { %4300 = sst [smem:[#allocation46_spill]] %s4287_s5 }
   0x7   :  { %4301 = sst [smem:[#allocation47_spill]] %s4288_s6 }
   0x8   :  { %13 = vsyncpa [#allocation3], 0 }
   0x9   :  { %15 = vsyncpa [#allocation3 + $0x1], 0 }
   0xa   :  { %16 = vsyncpa [#allocation5], 0 }
   0xb   :  { %17 = vsyncpa [#allocation8], 0 }
   0xc   :  { %18 = vsyncpa [#allocation11], 0 }
   0xd   :  { %19 = vsyncpa [#allocation14], 0 }
   0xe   :  { %20 = vsyncpa [#allocation4], 0 }
   0xf   :  { %22 = vsyncpa [#allocation4 + $0x1], 0  ;;  %s3352_s27 = smov 0   ;;  %s3354_s28 = smov 0  }
  0x10   :  { %s3356_s29 = smov 0   ;;  %s3358_s30 = smov 0  }
  0x11   :  { %s3360_s9 = smov 0   ;;  %s3362_s10 = smov 0  }
  0x12 LB: > { %s4302_s3 = sld [smem:[#allocation44_spill]]  ;;  %s2331_s14 = sadd.s32 4294967295, %s3279_s10   ;;  %s3279_s10 = sphi %s3362_s10, %s28_s10   ;;  %s3275_s9 = sphi %s3360_s9, %s4371_s9   ;;  %s3271_s30 = sphi %s3358_s30, %s4370_s30   ;;  %s3267_s29 = sphi %s3356_s29, %s4369_s29   ;;  %s3263_s28 = sphi %s3354_s28, %s4368_s28   ;;  %s3259_s27 = sphi %s3352_s27, %s4367_s27  }
  0x13   : > { %p2333_p0 = scmp.ge.s32.totalorder %s3279_s10, 1  ;;  %p3389_p1 = scmp.eq.s32.totalorder %s2331_s14, 0 }
  0x14   : > { %p260_p2 = scmp.lt.s32.totalorder %s3279_s10, 3  ;;  %p2340_p4 = scmp.ge.s32.totalorder %s3279_s10, 2 }
  0x15   : > { %s4305_s5 = sld [smem:[#allocation46_spill]]  ;;  %s3293_s11 = smov [#allocation7]  }
  0x16   : > { %p3394_p3 = pnand %p2333_p0, %p260_p2  ;;  %s4306_s2 = sld [smem:[#allocation43_spill]] }
  0x17   : > { %s4308_s4 = sld [smem:[#allocation45_spill]]  ;;  %s3294_s12 = smov [#allocation10]  }
  0x18   : > { %s282_s13 = sshll.u32 %s4302_s3, 4  ;;  %p2905_p5 = pneg %p3394_p3  ;;  %s283_s13 = int_to_ptr.hbm [resolvable:$true] %s282_s13 }
  0x19   : > { %s3295_s17 = smov [#allocation6]   ;;  %s3296_s18 = smov [#allocation9]  }
  0x1a   : > { %p3409_p6 = pnand %p2905_p5, %p3389_p1  ;;  %s4309_s6 = sld [smem:[#allocation47_spill]] }
  0x1b   : > { %s302_s19 = sshll.u32 %s4305_s5, 4  ;;  %s322_s25 = sshll.u32 %s4289_s7, 4  ;;  %s303_s19 = int_to_ptr.hbm [resolvable:$true] %s302_s19  ;;  %s323_s25 = int_to_ptr.hbm [resolvable:$true] %s322_s25 }
  0x1c   : > { %s272_s22 = sshll.u32 %s4306_s2, 4  ;;  %p61_p8 = scmp.ne.s32.totalorder %s3267_s29, %s3263_s28  ;;  %s273_s22 = int_to_ptr.hbm [resolvable:$true] %s272_s22 }
  0x1d   : > { %s292_s26 = sshll.u32 %s4308_s4, 4  ;;  %p62_p9 = scmp.eq.s32.totalorder %s3279_s10, 0  ;;  %s293_s26 = int_to_ptr.hbm [resolvable:$true] %s292_s26 }
  0x1e   : > { %2911 = dma.hbm_to_smem (!%p3409_p6), %s283_s13, 16, %s3293_s11, [#allocation8]  }
  0x1f   : > { %2917 = dma.hbm_to_smem (!%p3409_p6), %s303_s19, 16, %s3294_s12, [#allocation11]  }
  0x20   : > { %2908 = dma.hbm_to_smem (!%p3409_p6), %s273_s22, 32, %s3295_s17, [#allocation5]  }
  0x21   : > { %2914 = dma.hbm_to_smem (!%p3409_p6), %s293_s26, 16, %s3296_s18, [#allocation8]  }
  0x22   : > { %s312_s13 = sshll.u32 %s4309_s6, 4  ;;  %s3297_s22 = smov [#allocation12]   ;;  %s313_s13 = int_to_ptr.hbm [resolvable:$true] %s312_s13 }
  0x23   : > { %2920 = dma.hbm_to_smem (!%p3409_p6), %s313_s13, 16, %s3297_s22, [#allocation11]  }
  0x24   : > { %s3298_s11 = smov [#allocation13]   ;;  %s2332_s26 = sadd.s32 4294967294, %s3279_s10  }
  0x25   : > { %2923 = dma.hbm_to_smem (!%p3409_p6), %s323_s25, 16, %s3298_s11, [#allocation14]  }
  0x26   : > { %s47_s12 = sadd.s32 1, %s3275_s9  ;;  %s54_s17 = sadd.s32 1, %s3267_s29 }
  0x27   : > { %p49_p7 = scmp.ge.s32.totalorder %s47_s12, 2  ;;  %p3442_p10 = por %p62_p9, %p61_p8 }
  0x28   : > { %p67_p11 = scmp.ne.s32.totalorder %s3263_s28, %s3259_s27  ;;  %p247_p12 = scmp.eq.s32.totalorder %s2331_s14, 1 }
  0x29   : > { %s4373_s12 = smov (%p49_p7, %s47_s12), 0  ;;  %p253_p5 = scmp.eq.s32.totalorder %s2332_s26, 1 }
  0x2a   : > { %s51_s23 = ssub.s32 %s3275_s9, %s4373_s12  ;;  %p3454_p0 = por %p3389_p1, %p67_p11 }
  0x2b   : > { %p52_p13 = scmp.eq.s32.totalorder %s51_s23, 0  ;;  %p3458_p2 = por %p247_p12, %p61_p8 }
  0x2c   : > { %p3465_p6 = por %p253_p5, %p67_p11  ;;  %p2938_p7 = scmp.lt.s32.totalorder %s3279_s10, 2 }
  0x2d   : > { %s3463_s13 = scalar_select %p52_p13, %s3267_s29, %s54_s17  }
  0x2e   : > { %s333_s14 = sand.u32 1, %s3267_s29   ;;  %s2727_s19 = sshll.u32 %s3275_s9, 11 }
  0x2f   : > { %s2341_s25 = sshll.u32 %s333_s14, 11  ;;  %s4314_s0 = sld [smem:[#allocation41_spill]] }
  0x30   : > { %s337_s3 = scalar_lea.vmem [#allocation2], %s2341_s25  ;;  %p2925_p8 = pnand %p2938_p7, %p3442_p10 }
  0x31   : > { %s345_s4 = sshll.u32 %s337_s3, 4  ;;  %s334_s26 = scalar_lea.sflag [#allocation3], %s333_s14  ;;  %s346_s4 = int_to_ptr.vmem [resolvable:$true] %s345_s4 }
  0x32   : > { %s3299_s17 = smov 256   ;;  %s3300_s5 = smov 16  }
  0x33   : > { %365 = sbr.rel (%p3394_p3) target bundleno = 765 (0x2fd), region = 52 }
  0x35   : > { %s342_s23 = scalar_lea.hbm %s4314_s0, %s2727_s19 }
  0x36   : > { %s343_s2 = sshll.u32 %s342_s23, 4  ;;  %s344_s2 = int_to_ptr.hbm [resolvable:$true] %s343_s2 }
  0x37   : > { %2927 = dma.hbm_to_vmem [thread:$0]  (!%p2925_p8), %s344_s2, 32768, %s346_s4, %s334_s26, %s3299_s17, %s3299_s17, %s3300_s5  }
  0x38   : > { %s3480_s6 = sand.u32 1, %s3263_s28  }
  0x39   : > { %s2345_s19 = sshll.u32 %s3480_s6, 11  ;;  %s368_s25 = scalar_lea.sflag [#allocation3], %s3480_s6 }
  0x3a   : > { %s3484_s3 = scalar_lea.vmem [#allocation2], %s2345_s19 }
  0x3b   : > { %3234 = dma.done.wait (%p3454_p0), %s368_s25, 32768  }
  0x3c   : > { %3236 = vsyncadd (%p3454_p0), %s368_s25, 4294934528 }
  0x3d   : > { %3238 = dma.done.wait (%p3389_p1), [#allocation5], 32  }
  0x3e   : > { %3240 = vsyncadd (%p3389_p1), [#allocation5], 4294967264 }
  0x3f   : > { %3242 = dma.done.wait (%p3389_p1), [#allocation8], 32  }
  0x40   : > { %3244 = vsyncadd (%p3389_p1), [#allocation8], 4294967264 }
  0x41   : > { %3246 = dma.done.wait (%p3389_p1), [#allocation11], 32  }
  0x42   : > { %3248 = vsyncadd (%p3389_p1), [#allocation11], 4294967264 }
  0x43   : > { %3250 = dma.done.wait (%p3389_p1), [#allocation14], 16  }
  0x44   : > { %3252 = vsyncadd (%p3389_p1), [#allocation14], 4294967280 }
  0x45   : > { %407 = sfence }
  0x46   : > { %s2352_s2 = sshll.u32 %s3480_s6, 4  ;;  %p441_p3 = scmp.lt.s32.totalorder %s3271_s30, 1  ;;  %v484_v0 = vlaneseq  ;;  %v3638_v45 = vmov 0.0   ;;  %v3640_v46 = vmov 0.0  }
  0x47   : > { %s447_s4 = sld [smem:[#allocation7 + %s3271_s30]]  ;;  %s3636_s26 = scalar_lea.vmem [#allocation15], %s2352_s2 }
  0x48   : > { %s442_s5 = scalar_select %p441_p3, %s3271_s30, 1  ;;  %v485_v1 = vand.u32 127, %v484_v0  ;;  %v491_v2 = vshrl.u32 %v484_v0, 7 }
  0x49   : > { %s3511_s16 = sld [smem:[#allocation9 + %s3271_s30]]  ;;  %s3642_s17 = smov 0  }
  0x4a   : > { %s2728_s15 = sshll.u32 %s442_s5, 8  ;;  %s3514_s18 = sld [smem:[#allocation10 + %s3271_s30]]  ;;  %v3516_v3 = vcvt.s32.f32 %v485_v1  ;;  %v492_v4 = vadd.s32 8, %v491_v2  ;;  %v497_v5 = vcvt.s32.f32 %v491_v2  ;;  %v503_v6 = vadd.s32 128, %v485_v1 }
  0x4b   : > { %s4316_s1 = sld [smem:[#allocation42_spill]] }
  0x4c   : > { %4315 = vst [vmem:[#allocation22_spill] sm:$0xff] %v3516_v3  ;;  %s3524_s11 = sld [smem:[#allocation12 + %s3271_s30]]  ;;  %v498_v10 = vcvt.s32.f32 %v492_v4  ;;  %v3538_v11 = vcvt.s32.f32 %v503_v6 }
  0x4d   : > { %s3527_s23 = sld [smem:[#allocation13 + %s3271_s30]]  ;;  %v499_v15 = vstv %s447_s4 }
  0x4e   : > { %4320 = vst [vmem:[#allocation26_spill] sm:$0xff] %v3538_v11  ;;  %v3559_v19 = vmul.f32 %v499_v15, %v3516_v3  ;;  %v3561_v20 = vmul.f32 %v499_v15, %v497_v5  ;;  %v3563_v21 = vmul.f32 %v499_v15, %v498_v10 }
  0x50   : > { %4327 = vst [vmem:[#allocation33_spill] sm:$0xff] %v3559_v19 }
  0x51   : > { %s3521_s22 = scalar_lea.vmem %s4316_s1, %s2728_s15  ;;  %4328 = vst [vmem:[#allocation34_spill] sm:$0xff] %v3561_v20 }
  0x52   : > { %v3530_v7 = vld [vmem:[%s3521_s22] sm:$0xff]  ;;  %v3533_v8 = vld [vmem:[%s3521_s22 + $0x8] sm:$0xff]  ;;  %v3536_v9 = vld [vmem:[%s3521_s22 + $0x10] sm:$0xff]  ;;  %4329 = vst [vmem:[#allocation35_spill] sm:$0xff] %v3563_v21 }
  0x53   : > { %4317 = vst [vmem:[#allocation23_spill] sm:$0xff] %v3530_v7  ;;  %v3541_v12 = vld [vmem:[%s3521_s22 + $0x18] sm:$0xff]  ;;  %v3544_v13 = vld [vmem:[%s3521_s22 + $0x20] sm:$0xff]  ;;  %v3547_v14 = vld [vmem:[%s3521_s22 + $0x28] sm:$0xff] }
  0x54   : > { %4318 = vst [vmem:[#allocation24_spill] sm:$0xff] %v3533_v8  ;;  %v3550_v16 = vld [vmem:[%s3521_s22 + $0x30] sm:$0xff]  ;;  %v3553_v17 = vld [vmem:[%s3521_s22 + $0x38] sm:$0xff]  ;;  %v3556_v18 = vld [vmem:[%s3521_s22 + $0x40] sm:$0xff] }
  0x55   : > { %4319 = vst [vmem:[#allocation25_spill] sm:$0xff] %v3536_v9  ;;  %v3566_v22 = vld [vmem:[%s3521_s22 + $0x48] sm:$0xff]  ;;  %v3569_v23 = vld [vmem:[%s3521_s22 + $0x50] sm:$0xff]  ;;  %v3572_v24 = vld [vmem:[%s3521_s22 + $0x58] sm:$0xff] }
  0x56   : > { %4321 = vst [vmem:[#allocation27_spill] sm:$0xff] %v3541_v12  ;;  %v3575_v25 = vld [vmem:[%s3521_s22 + $0x60] sm:$0xff]  ;;  %v3578_v26 = vld [vmem:[%s3521_s22 + $0x68] sm:$0xff]  ;;  %v3581_v27 = vld [vmem:[%s3521_s22 + $0x70] sm:$0xff] }
  0x57   : > { %4322 = vst [vmem:[#allocation28_spill] sm:$0xff] %v3544_v13  ;;  %v3584_v28 = vld [vmem:[%s3521_s22 + $0x78] sm:$0xff]  ;;  %v3587_v29 = vld [vmem:[%s3521_s22 + $0x80] sm:$0xff]  ;;  %v3590_v30 = vld [vmem:[%s3521_s22 + $0x88] sm:$0xff] }
  0x58   : > { %4323 = vst [vmem:[#allocation29_spill] sm:$0xff] %v3547_v14  ;;  %v3593_v31 = vld [vmem:[%s3521_s22 + $0x90] sm:$0xff]  ;;  %v3596_v32 = vld [vmem:[%s3521_s22 + $0x98] sm:$0xff]  ;;  %v3599_v33 = vld [vmem:[%s3521_s22 + $0xa0] sm:$0xff] }
  0x59   : > { %4324 = vst [vmem:[#allocation30_spill] sm:$0xff] %v3550_v16  ;;  %v3602_v34 = vld [vmem:[%s3521_s22 + $0xa8] sm:$0xff]  ;;  %v3605_v35 = vld [vmem:[%s3521_s22 + $0xb0] sm:$0xff]  ;;  %v3608_v36 = vld [vmem:[%s3521_s22 + $0xb8] sm:$0xff] }
  0x5a   : > { %4325 = vst [vmem:[#allocation31_spill] sm:$0xff] %v3553_v17  ;;  %v3611_v37 = vld [vmem:[%s3521_s22 + $0xc0] sm:$0xff]  ;;  %v3614_v38 = vld [vmem:[%s3521_s22 + $0xc8] sm:$0xff]  ;;  %v3617_v39 = vld [vmem:[%s3521_s22 + $0xd0] sm:$0xff] }
  0x5b   : > { %4326 = vst [vmem:[#allocation32_spill] sm:$0xff] %v3556_v18  ;;  %v3620_v40 = vld [vmem:[%s3521_s22 + $0xd8] sm:$0xff]  ;;  %v3623_v41 = vld [vmem:[%s3521_s22 + $0xe0] sm:$0xff]  ;;  %v3626_v42 = vld [vmem:[%s3521_s22 + $0xe8] sm:$0xff] }
  0x5c   : > { %4330 = vst [vmem:[#allocation36_spill] sm:$0xff] %v3566_v22  ;;  %v3629_v43 = vld [vmem:[%s3521_s22 + $0xf0] sm:$0xff]  ;;  %v3632_v44 = vld [vmem:[%s3521_s22 + $0xf8] sm:$0xff] }
  0x5d   : > { %4331 = vst [vmem:[#allocation37_spill] sm:$0xff] %v3569_v23 }
  0x5e   : > { %4332 = vst [vmem:[#allocation38_spill] sm:$0xff] %v3572_v24 }
  0x5f   : > { %4333 = vst [vmem:[#allocation39_spill] sm:$0xff] %v3575_v25 }
  0x60   : > { %4334 = vst [vmem:[#allocation40_spill] sm:$0xff] %v3578_v26 }
  0x61 LB: >> { %v4335_v11 = vld [vmem:[#allocation26_spill] sm:$0xff]  ;;  %v3301_v47 = vmov 0   ;;  %v3302_v48 = vmov 255.0   ;;  %s3655_s19 = sshll.u32 %s3291_s17, 2  ;;  %v4338_v19 = vld [vmem:[#allocation33_spill] sm:$0xff]  ;;  %v4339_v21 = vld [vmem:[#allocation35_spill] sm:$0xff]  ;;  %v3287_v46 = vphi %v3640_v46, %v4366_v46   ;;  %v3283_v45 = vphi %v3638_v45, %v4365_v45   ;;  %s3291_s17 = sphi %s3642_s17, %s511_s17  }
  0x62   : >> { %v4336_v3 = vld [vmem:[#allocation22_spill] sm:$0xff]  ;;  %3034 = vset.pattern.permute.xlu2 %v3301_v47  ;;  %3032 = vset.pattern.permute.xlu0 %v3301_v47  ;;  %3035 = vrcp.f32 %v3302_v48  ;;  %s515_s25 = sshra.s32 %s3655_s19, 7  ;;  %s520_s2 = sand.u32 127, %s3655_s19  ;;  %v4346_v12 = vld [vmem:[#allocation27_spill] sm:$0xff]  ;;  %v4347_v18 = vld [vmem:[#allocation32_spill] sm:$0xff] }
  0x63   : >> { %657 = vperm.xlu2 %3034, %v3581_v27   ;;  %3033 = vset.pattern.permute.xlu1 %v3301_v47  ;;  %s517_s4 = sadd.s32 %s3271_s30, %s515_s25  ;;  %v4337_v20 = vld [vmem:[#allocation34_spill] sm:$0xff]  ;;  %v4341_v22 = vld [vmem:[#allocation36_spill] sm:$0xff]  ;;  %s2729_s14 = sshll.u32 %s3291_s17, 9  ;;  %v4348_v7 = vld [vmem:[#allocation23_spill] sm:$0xff] }
  0x64   : >> { %s2356_s5 = sshll.u32 %s517_s4, 7  ;;  %v4342_v16 = vld [vmem:[#allocation30_spill] sm:$0xff]  ;;  %v4344_v23 = vld [vmem:[#allocation37_spill] sm:$0xff]  ;;  %s3688_s22 = scalar_lea.vmem %s3484_s3, %s2729_s14 [#allocation2]  ;;  %v4349_v17 = vld [vmem:[#allocation31_spill] sm:$0xff] }
  0x65   : >> { %s521_s15 = sadd.s32 %s2356_s5, %s520_s2  ;;  %v4345_v24 = vld [vmem:[#allocation38_spill] sm:$0xff]  ;;  %v4350_v13 = vld [vmem:[#allocation28_spill] sm:$0xff]  ;;  %v4351_v14 = vld [vmem:[#allocation29_spill] sm:$0xff]  ;;  %s523_s25 = sadd.s32 1, %s3655_s19 }
  0x66   : >> { %s522_s20 = sld [smem:[#allocation6 + %s521_s15]]  ;;  %v4340_v25 = vld [vmem:[#allocation39_spill] sm:$0xff]  ;;  %v4352_v9 = vld [vmem:[#allocation25_spill] sm:$0xff]  ;;  %v4353_v8 = vld [vmem:[#allocation24_spill] sm:$0xff]  ;;  %s524_s2 = sshra.s32 %s523_s25, 7 }
  0x67   : >> { %v4343_v26 = vld [vmem:[#allocation40_spill] sm:$0xff]  ;;  %s526_s4 = sadd.s32 %s3271_s30, %s524_s2  ;;  %s529_s15 = sand.u32 127, %s523_s25 }
  0x68   : >> { %v3036_v49 = vpop.eup %3035  ;;  %s2357_s5 = sshll.u32 %s526_s4, 7  ;;  %s532_s25 = sadd.s32 2, %s3655_s19 }
  0x69   : >> { %v555_v50 = vmul.f32 255.0, %v3036_v49  ;;  %vm559_vm0 = vweird.f32 %v3036_v49  ;;  %s533_s2 = sshra.s32 %s532_s25, 7  ;;  %s4294_s4 = sadd.s32 3, %s3655_s19 }
  0x6a   : >> { %s4364_s0 = sadd.s32 3, %s3655_s19  ;;  %s511_s17 = sadd.s32 1, %s3291_s17  }
  0x6b   : >> { %v556_v51 = vsub.f32 1.0, %v555_v50  ;;  %662 = vperm.xlu2 %3034, %v3584_v28   ;;  %s547_s1 = sand.u32 127, %s4364_s0  ;;  %p508_p1 = scmp.ge.s32.totalorder %s511_s17, 4  }
  0x6c   : >> { %v550_v53 = vstv %s522_s20  ;;  %s530_s20 = sadd.s32 %s2357_s5, %s529_s15  ;;  %s535_s5 = sadd.s32 %s3271_s30, %s533_s2 }
  0x6d   : >> { %v557_v52 = vmul.f32 %v3036_v49, %v556_v51  ;;  %v907_v55 = vmul.f32 %v550_v53, %v4337_v20  ;;  %v551_v56 = vmul.f32 %v550_v53, %v4338_v19  ;;  %v908_v57 = vmul.f32 %v550_v53, %v4339_v21  ;;  %s4023_s14 = sld [smem:[#allocation6 + %s530_s20]]  ;;  %s542_s15 = sshra.s32 %s4294_s4, 7 }
  0x6e   : >> { %s2358_s20 = sshll.u32 %s535_s5, 7  ;;  %s2079_s3 = sfloor.f32 (%p508_p1), %s3514_s18 }
  0x6f   : >> { %v558_v54 = vadd.f32 %v3036_v49, %v557_v52  ;;  %v909_v58 = vfloor.f32 %v907_v55  ;;  %v552_v59 = vfloor.f32 %v551_v56  ;;  %v910_v61 = vfloor.f32 %v908_v57  ;;  %p2080_p9 = scmp.eq.f32.partialorder (%p508_p1), %s2079_s3, %s3514_s18  ;;  %p2125_p12 = scmp.eq.f32.partialorder (%p508_p1), %s3514_s18, 0.0 }
  0x71   : >> { %v560_v60 = vsel %vm559_vm0, %v3036_v49, %v558_v54  ;;  %v911_v62 = vand.u32 2147483647, %v909_v58  ;;  %v3664_v63 = vsub.f32 %v907_v55, %v909_v58  ;;  %v553_v0 = vand.u32 2147483647, %v552_v59 }
  0x72   : >> { %v3667_v1 = vsub.f32 %v551_v56, %v552_v59  ;;  %v928_v4 = vand.u32 2147483647, %v910_v61  ;;  %v3669_v5 = vsub.f32 %v908_v57, %v910_v61  ;;  %v926_v54 = vand.u32 2147483648, %v909_v58 }
  0x73   : >> { %647 = vperm.xlu2 %3034, %v4340_v25   ;;  %v919_v2 = vmul.f32 %v911_v62, %v560_v60  ;;  %v561_v6 = vmul.f32 %v560_v60, %v553_v0  ;;  %v568_v19 = vand.u32 2147483648, %v552_v59 }
  0x74   : >> { %v936_v15 = vmul.f32 %v928_v4, %v560_v60 }
  0x75   : >> { %v920_v10 = vfloor.f32 %v919_v2  ;;  %v562_v47 = vfloor.f32 %v561_v6  ;;  %v943_v2 = vand.u32 2147483648, %v910_v61  ;;  %v2610_v61 = vld [vmem:[%s3688_s22 + $0x1e0] sm:$0xf] }
  0x76   : >> { %v937_v50 = vfloor.f32 %v936_v15 }
  0x77   : >> { %v921_v48 = vmul.f32 255.0, %v920_v10  ;;  %v563_v49 = vmul.f32 255.0, %v562_v47 }
  0x78   : >> { %v938_v52 = vmul.f32 255.0, %v937_v50  ;;  %v2790_v50 = vld [vmem:[%s3688_s22 + $0x1e4] sm:$0xf] }
  0x79   : >> { %v922_v51 = vsub.f32 %v911_v62, %v921_v48  ;;  %v564_v53 = vsub.f32 %v553_v0, %v563_v49  ;;  %v2792_v48 = vld [vmem:[%s3688_s22 + $0x1ec] sm:$0xf0] }
  0x7a   : >> { %v939_v55 = vsub.f32 %v928_v4, %v938_v52  ;;  %v2611_v49 = vor.u32 %v2792_v48, %v2610_v61  ;;  %v2482_v52 = vld [vmem:[%s3688_s22 + $0xe0] sm:$0xf] }
  0x7b   : >> { %732 = vperm.xlu2 %3034, %v3626_v42   ;;  %vm923_vm1 = vcmp.eq.f32.partialorder %v922_v51, 255.0  ;;  %vm565_vm2 = vcmp.eq.f32.partialorder %v564_v53, 255.0  ;;  %v2578_v48 = vld [vmem:[%s3688_s22 + $0x1a0] sm:$0xf] }
  0x7c   : >> { %v924_v56 = vsel %vm923_vm1, 0.0, %v922_v51  ;;  %v566_v20 = vsel %vm565_vm2, 0.0, %v564_v53  ;;  %vm940_vm3 = vcmp.eq.f32.partialorder %v939_v55, 255.0  ;;  %v2612_v51 = vld [vmem:[%s3688_s22 + $0x1f0] sm:$0xf0]  ;;  %1421 = vmatpush.bf16.msra.mxu1 %v2611_v49 }
  0x7d   : >> { %v925_v57 = vand.u32 2147483647, %v924_v56  ;;  %v567_v60 = vand.u32 2147483647, %v566_v20  ;;  %v941_v6 = vsel %vm940_vm3, 0.0, %v939_v55 }
  0x7e   : >> { %v942_v15 = vand.u32 2147483647, %v941_v6  ;;  %v2760_v53 = vld [vmem:[%s3688_s22 + $0xec] sm:$0xf0]  ;;  %v2758_v56 = vld [vmem:[%s3688_s22 + $0xe4] sm:$0xf] }
  0x7f   : >> { %v927_v10 = vor.u32 %v926_v54, %v925_v57  ;;  %v3672_v47 = vor.u32 %v568_v19, %v567_v60  ;;  %v2615_v54 = vor.u32 %v2790_v50, %v2612_v51  ;;  %v2483_v55 = vor.u32 %v2760_v53, %v2482_v52  ;;  %v2484_v57 = vld [vmem:[%s3688_s22 + $0xf0] sm:$0xf0]  ;;  %v2594_v60 = vld [vmem:[%s3688_s22 + $0x1c0] sm:$0xf]  ;;  %v2788_v6 = vld [vmem:[%s3688_s22 + $0x1cc] sm:$0xf0] }
  0x80   : >> { %v944_v0 = vor.u32 %v943_v2, %v942_v15  ;;  %v2487_v2 = vor.u32 %v2758_v56, %v2484_v57  ;;  %v2595_v15 = vor.u32 %v2788_v6, %v2594_v60  ;;  %v2784_v50 = vld [vmem:[%s3688_s22 + $0x1ac] sm:$0xf0]  ;;  %v2782_v49 = vld [vmem:[%s3688_s22 + $0x1a4] sm:$0xf]  ;;  %v2580_v52 = vld [vmem:[%s3688_s22 + $0x1b0] sm:$0xf0] }
  0x81   : >> { %vm945_vm4 = vcmp.ne.f32.partialorder %v927_v10, 0.0  ;;  %vm947_vm5 = vcmp.lt.f32.partialorder %v927_v10, 0.0  ;;  %v951_v62 = vadd.f32 255.0, %v927_v10  ;;  %1459 = vmatpush.bf16.msra.mxu3 %v2615_v54  ;;  %1402 = vmatpush.bf16.msra.mxu0 %v2483_v55  ;;  %v2579_v51 = vor.u32 %v2784_v50, %v2578_v48  ;;  %v2450_v53 = vld [vmem:[%s3688_s22 + $0xa0] sm:$0xf] }
  0x82   : >> { %vm949_vm6 = vmand %vm947_vm5, %vm945_vm4  ;;  %vm946_vm7 = vcmp.ne.f32.partialorder %v944_v0, 0.0  ;;  %vm948_vm8 = vcmp.lt.f32.partialorder %v944_v0, 0.0  ;;  %v952_v59 = vadd.f32 255.0, %v944_v0  ;;  %1440 = vmatpush.bf16.msra.mxu2 %v2487_v2  ;;  %1422 = vmatpush.bf16.msra.mxu1 %v2595_v15  ;;  %v2752_v54 = vld [vmem:[%s3688_s22 + $0xac] sm:$0xf0]  ;;  %v2583_v55 = vor.u32 %v2782_v49, %v2580_v52 }
  0x83   : >> { %717 = vperm.xlu2 %3034, %v3617_v39   ;;  %v953_v58 = vsel %vm949_vm6, %v951_v62, %v927_v10  ;;  %vm950_vm9 = vmand %vm948_vm8, %vm946_vm7  ;;  %v2786_v10 = vld [vmem:[%s3688_s22 + $0x1c4] sm:$0xf]  ;;  %v2596_v62 = vld [vmem:[%s3688_s22 + $0x1d0] sm:$0xf0]  ;;  %v2451_v56 = vor.u32 %v2752_v54, %v2450_v53  ;;  %vm570_vm10 = vcmp.ne.f32.partialorder %v3672_v47, 0.0  ;;  %vm571_vm11 = vcmp.lt.f32.partialorder %v3672_v47, 0.0 }
  0x84   : >> { %977 = vperm.xlu0 %3032, %v953_v58   ;;  %v973_v4 = vadd.f32 1.0, %v953_v58  ;;  %v954_v20 = vsel %vm950_vm9, %v952_v59, %v944_v0  ;;  %v2599_v0 = vor.u32 %v2786_v10, %v2596_v62  ;;  %v2466_v58 = vld [vmem:[%s3688_s22 + $0xc0] sm:$0xf]  ;;  %v2756_v59 = vld [vmem:[%s3688_s22 + $0xcc] sm:$0xf0]  ;;  %vm572_vm12 = vmand %vm571_vm11, %vm570_vm10 }
  0x85   : >> { %v974_v19 = vadd.f32 1.0, %v954_v20  ;;  %v2750_v57 = vld [vmem:[%s3688_s22 + $0xa4] sm:$0xf]  ;;  %v2452_v2 = vld [vmem:[%s3688_s22 + $0xb0] sm:$0xf0] }
  0x86   : >> { %987 = vperm.xlu1 %3033, %v973_v4   ;;  %v2754_v4 = vld [vmem:[%s3688_s22 + $0xc4] sm:$0xf]  ;;  %1460 = vmatpush.bf16.msra.mxu3 %v2599_v0  ;;  %v2455_v60 = vor.u32 %v2750_v57, %v2452_v2  ;;  %v2562_v6 = vld [vmem:[%s3688_s22 + $0x180] sm:$0xf]  ;;  %v2780_v10 = vld [vmem:[%s3688_s22 + $0x18c] sm:$0xf0] }
  0x87   : >> { %1423 = vmatpush.bf16.msra.mxu1 %v2579_v51  ;;  %v2778_v15 = vld [vmem:[%s3688_s22 + $0x184] sm:$0xf]  ;;  %v2563_v62 = vor.u32 %v2780_v10, %v2562_v6  ;;  %v2564_v0 = vld [vmem:[%s3688_s22 + $0x190] sm:$0xf0]  ;;  %v2546_v50 = vld [vmem:[%s3688_s22 + $0x160] sm:$0xf] }
  0x88   : >> { %v2776_v49 = vld [vmem:[%s3688_s22 + $0x16c] sm:$0xf0]  ;;  %v2774_v51 = vld [vmem:[%s3688_s22 + $0x164] sm:$0xf]  ;;  %v2548_v53 = vld [vmem:[%s3688_s22 + $0x170] sm:$0xf0] }
  0x89   : >> { %v2547_v52 = vor.u32 %v2776_v49, %v2546_v50  ;;  %v2418_v54 = vld [vmem:[%s3688_s22 + $0x60] sm:$0xf]  ;;  %v2742_v2 = vld [vmem:[%s3688_s22 + $0x64] sm:$0xf]  ;;  %v2768_v49 = vld [vmem:[%s3688_s22 + $0x12c] sm:$0xf0] }
  0x8a   : >> { %1461 = vmatpush.bf16.msra.mxu3 %v2583_v55  ;;  %v2744_v55 = vld [vmem:[%s3688_s22 + $0x6c] sm:$0xf0]  ;;  %v2530_v6 = vld [vmem:[%s3688_s22 + $0x140] sm:$0xf] }
  0x8b   : >> { %632 = vperm.xlu2 %3034, %v4341_v22   ;;  %1424 = vmatpush.bf16.msra.mxu1 %v2563_v62  ;;  %v2419_v57 = vor.u32 %v2744_v55, %v2418_v54  ;;  %v2770_v62 = vld [vmem:[%s3688_s22 + $0x144] sm:$0xf]  ;;  %v2514_v50 = vld [vmem:[%s3688_s22 + $0x120] sm:$0xf] }
  0x8c   : >> { %982 = vperm.xlu0 %3032, %v954_v20   ;;  %v2467_v20 = vor.u32 %v2756_v59, %v2466_v58  ;;  %v2567_v58 = vor.u32 %v2778_v15, %v2564_v0  ;;  %v2434_v59 = vld [vmem:[%s3688_s22 + $0x80] sm:$0xf]  ;;  %v2772_v15 = vld [vmem:[%s3688_s22 + $0x14c] sm:$0xf0]  ;;  %v2532_v0 = vld [vmem:[%s3688_s22 + $0x150] sm:$0xf0]  ;;  %v2515_v55 = vor.u32 %v2768_v49, %v2514_v50 }
  0x8d   : >> { %v2386_v54 = vld [vmem:[%s3688_s22 + $0x20] sm:$0xf] }
  0x8e   : >> { %992 = vperm.xlu1 %3033, %v974_v19   ;;  %v2468_v19 = vld [vmem:[%s3688_s22 + $0xd0] sm:$0xf0]  ;;  %1403 = vmatpush.bf16.msra.mxu0 %v2467_v20  ;;  %v2746_v20 = vld [vmem:[%s3688_s22 + $0x84] sm:$0xf]  ;;  %v2370_v50 = vld [vmem:[%s3688_s22] sm:$0xf] }
  0x8f   : >> { %v2471_v61 = vor.u32 %v2754_v4, %v2468_v19  ;;  %v2748_v4 = vld [vmem:[%s3688_s22 + $0x8c] sm:$0xf0]  ;;  %1462 = vmatpush.bf16.msra.mxu3 %v2567_v58  ;;  %1425 = vmatpush.bf16.msra.mxu1 %v2547_v52  ;;  %v2531_v58 = vor.u32 %v2772_v15, %v2530_v6  ;;  %v2766_v52 = vld [vmem:[%s3688_s22 + $0x124] sm:$0xf]  ;;  %v2498_v6 = vld [vmem:[%s3688_s22 + $0x100] sm:$0xf] }
  0x90   : >> { %v2435_v19 = vor.u32 %v2748_v4, %v2434_v59  ;;  %v2535_v59 = vor.u32 %v2770_v62, %v2532_v0  ;;  %v2402_v4 = vld [vmem:[%s3688_s22 + $0x40] sm:$0xf]  ;;  %v2764_v15 = vld [vmem:[%s3688_s22 + $0x10c] sm:$0xf0]  ;;  %v2762_v62 = vld [vmem:[%s3688_s22 + $0x104] sm:$0xf] }
  0x91   : >> { %1441 = vmatpush.bf16.msra.mxu2 %v2471_v61  ;;  %v2436_v61 = vld [vmem:[%s3688_s22 + $0x90] sm:$0xf0] }
  0x92   : >> { %1404 = vmatpush.bf16.msra.mxu0 %v2451_v56  ;;  %v2439_v48 = vor.u32 %v2746_v20, %v2436_v61  ;;  %v2551_v56 = vor.u32 %v2774_v51, %v2548_v53  ;;  %v2740_v20 = vld [vmem:[%s3688_s22 + $0x4c] sm:$0xf0]  ;;  %v2516_v53 = vld [vmem:[%s3688_s22 + $0x130] sm:$0xf0] }
  0x93   : >> { %617 = vperm.xlu2 %3034, %v4342_v16   ;;  %v2403_v61 = vor.u32 %v2740_v20, %v2402_v4  ;;  %1426 = vmatpush.bf16.msra.mxu1 %v2531_v58  ;;  %v2500_v0 = vld [vmem:[%s3688_s22 + $0x110] sm:$0xf0]  ;;  %v2618_v4 = vld [vmem:[%s3688_s22 + $0x1e8] sm:$0xf]  ;;  %v2793_v20 = vld [vmem:[%s3688_s22 + $0x1f4] sm:$0xf0] }
  0x94   : >> { %737 = vperm.xlu0 %3032, %v3629_v43   ;;  %1463 = vmatpush.bf16.msra.mxu3 %v2551_v56  ;;  %v2736_v56 = vld [vmem:[%s3688_s22 + $0x2c] sm:$0xf0]  ;;  %v2503_v49 = vor.u32 %v2762_v62, %v2500_v0  ;;  %v2789_v62 = vld [vmem:[%s3688_s22 + $0x1d4] sm:$0xf0]  ;;  %v2787_v0 = vld [vmem:[%s3688_s22 + $0x1cc] sm:$0xf] }
  0x95   : >> { %1442 = vmatpush.bf16.msra.mxu2 %v2455_v60  ;;  %v2420_v60 = vld [vmem:[%s3688_s22 + $0x70] sm:$0xf0] }
  0x96   : >> { %742 = vperm.xlu1 %3033, %v3632_v44   ;;  %1405 = vmatpush.bf16.msra.mxu0 %v2435_v19  ;;  %v2423_v10 = vor.u32 %v2742_v2, %v2420_v60  ;;  %v2738_v19 = vld [vmem:[%s3688_s22 + $0x44] sm:$0xf]  ;;  %v2519_v2 = vor.u32 %v2766_v52, %v2516_v53  ;;  %v2388_v60 = vld [vmem:[%s3688_s22 + $0x30] sm:$0xf0] }
  0x97   : >> { %1427 = vmatpush.bf16.msra.mxu1 %v2515_v55  ;;  %v2730_v52 = vld [vmem:[%s3688_s22 + $0x4] sm:$0xf]  ;;  %v2372_v53 = vld [vmem:[%s3688_s22 + $0x10] sm:$0xf0]  ;;  %v2492_v55 = vld [vmem:[%s3688_s22 + $0xf8] sm:$0xf0] }
  0x98   : >> { %1464 = vmatpush.bf16.msra.mxu3 %v2535_v59  ;;  %v2791_v59 = vld [vmem:[%s3688_s22 + $0x1ec] sm:$0xf] }
  0x99   : >> { %1443 = vmatpush.bf16.msra.mxu2 %v2439_v48  ;;  %v2404_v48 = vld [vmem:[%s3688_s22 + $0x50] sm:$0xf0] }
  0x9a   : >> { %1406 = vmatpush.bf16.msra.mxu0 %v2419_v57  ;;  %v2407_v51 = vor.u32 %v2738_v19, %v2404_v48  ;;  %v2734_v57 = vld [vmem:[%s3688_s22 + $0x24] sm:$0xf]  ;;  %v2499_v19 = vor.u32 %v2764_v15, %v2498_v6  ;;  %v2620_v48 = vld [vmem:[%s3688_s22 + $0x1f8] sm:$0xf0]  ;;  %v2375_v6 = vor.u32 %v2730_v52, %v2372_v53  ;;  %v2602_v15 = vld [vmem:[%s3688_s22 + $0x1c8] sm:$0xf] }
  0x9b   : >> { %702 = vperm.xlu2 %3034, %v3608_v36   ;;  %v2391_v58 = vor.u32 %v2734_v57, %v2388_v60  ;;  %v2761_v57 = vld [vmem:[%s3688_s22 + $0xf4] sm:$0xf0]  ;;  %v2759_v60 = vld [vmem:[%s3688_s22 + $0xec] sm:$0xf]  ;;  %v2586_v52 = vld [vmem:[%s3688_s22 + $0x1a8] sm:$0xf] }
  0x9c   : >> { %652 = vperm.xlu0 %3032, %v4343_v26   ;;  %1465 = vmatpush.bf16.msra.mxu3 %v2519_v2  ;;  %v2783_v53 = vld [vmem:[%s3688_s22 + $0x1ac] sm:$0xf] }
  0x9d   : >> { %1444 = vmatpush.bf16.msra.mxu2 %v2423_v10  ;;  %v2387_v10 = vor.u32 %v2736_v56, %v2386_v54  ;;  %v2619_v54 = vor.u32 %v2793_v20, %v2618_v4  ;;  %v2623_v56 = vor.u32 %v2791_v59, %v2620_v48  ;;  %1428 = vmatpush.bf16.msra.mxu1 %v2499_v19  ;;  %v2604_v20 = vld [vmem:[%s3688_s22 + $0x1d8] sm:$0xf0]  ;;  %v2474_v59 = vld [vmem:[%s3688_s22 + $0xc8] sm:$0xf]  ;;  %v2757_v48 = vld [vmem:[%s3688_s22 + $0xd4] sm:$0xf0] }
  0x9e   : >> { %727 = vperm.xlu1 %3033, %v3623_v41   ;;  %1407 = vmatpush.bf16.msra.mxu0 %v2403_v61  ;;  %v2732_v61 = vld [vmem:[%s3688_s22 + $0xc] sm:$0xf0]  ;;  %v2495_v4 = vor.u32 %v2759_v60, %v2492_v55  ;;  %v2785_v19 = vld [vmem:[%s3688_s22 + $0x1b4] sm:$0xf0]  ;;  %v2458_v60 = vld [vmem:[%s3688_s22 + $0xa8] sm:$0xf] }
  0x9f   : >> { %v2371_v2 = vor.u32 %v2732_v61, %v2370_v50  ;;  %v2603_v50 = vor.u32 %v2789_v62, %v2602_v15  ;;  %v2607_v61 = vor.u32 %v2787_v0, %v2604_v20  ;;  %v2753_v55 = vld [vmem:[%s3688_s22 + $0xb4] sm:$0xf0]  ;;  %v2570_v62 = vld [vmem:[%s3688_s22 + $0x188] sm:$0xf]  ;;  %v2572_v20 = vld [vmem:[%s3688_s22 + $0x198] sm:$0xf0] }
  0xa0   : >> { %1466 = vmatpush.bf16.msra.mxu3 %v2503_v49  ;;  %v2475_v49 = vor.u32 %v2757_v48, %v2474_v59  ;;  %v2781_v0 = vld [vmem:[%s3688_s22 + $0x194] sm:$0xf0]  ;;  %v2442_v48 = vld [vmem:[%s3688_s22 + $0x88] sm:$0xf] }
  0xa1   : >> { %1445 = vmatpush.bf16.msra.mxu2 %v2407_v51  ;;  %v2490_v51 = vld [vmem:[%s3688_s22 + $0xe8] sm:$0xf]  ;;  %1497 = vmatpush.bf16.msrb.mxu1 %v2619_v54  ;;  %v2587_v54 = vor.u32 %v2785_v19, %v2586_v52  ;;  %v2444_v52 = vld [vmem:[%s3688_s22 + $0x98] sm:$0xf0] }
  0xa2   : >> { %1408 = vmatpush.bf16.msra.mxu0 %v2387_v10  ;;  %v2491_v10 = vor.u32 %v2761_v57, %v2490_v51  ;;  %v2588_v51 = vld [vmem:[%s3688_s22 + $0x1b8] sm:$0xf0]  ;;  %v2554_v19 = vld [vmem:[%s3688_s22 + $0x168] sm:$0xf] }
  0xa3   : >> { %687 = vperm.xlu2 %3034, %v3599_v33  }
  0xa4   : >> { %637 = vperm.xlu0 %3032, %v4344_v23   ;;  %1535 = vmatpush.bf16.msrb.mxu3 %v2623_v56  ;;  %v2591_v56 = vor.u32 %v2783_v53, %v2588_v51  ;;  %v2777_v53 = vld [vmem:[%s3688_s22 + $0x174] sm:$0xf0] }
  0xa5   : >> { %1446 = vmatpush.bf16.msra.mxu2 %v2391_v58  ;;  %v2476_v58 = vld [vmem:[%s3688_s22 + $0xd8] sm:$0xf0]  ;;  %1498 = vmatpush.bf16.msrb.mxu1 %v2603_v50  ;;  %v2747_v50 = vld [vmem:[%s3688_s22 + $0x8c] sm:$0xf] }
  0xa6   : >> { %642 = vperm.xlu1 %3033, %v4345_v24   ;;  %1409 = vmatpush.bf16.msra.mxu0 %v2371_v2  ;;  %v2751_v2 = vld [vmem:[%s3688_s22 + $0xac] sm:$0xf]  ;;  %v2447_v51 = vor.u32 %v2747_v50, %v2444_v52  ;;  %v2741_v50 = vld [vmem:[%s3688_s22 + $0x54] sm:$0xf0] }
  0xa8   : >> { %1536 = vmatpush.bf16.msrb.mxu3 %v2607_v61 }
  0xa9   : >> { %1447 = vmatpush.bf16.msra.mxu2 %v2375_v6  ;;  %v2460_v6 = vld [vmem:[%s3688_s22 + $0xb8] sm:$0xf0]  ;;  %1499 = vmatpush.bf16.msrb.mxu1 %v2587_v54 }
  0xaa   : >> { %1478 = vmatpush.bf16.msrb.mxu0 %v2491_v10  ;;  %v2463_v15 = vor.u32 %v2751_v2, %v2460_v6  ;;  %v2779_v10 = vld [vmem:[%s3688_s22 + $0x18c] sm:$0xf]  ;;  %v2556_v54 = vld [vmem:[%s3688_s22 + $0x178] sm:$0xf0] }
  0xab   : >> { %602 = vperm.xlu2 %3034, %v4346_v12   ;;  %v2575_v59 = vor.u32 %v2779_v10, %v2572_v20  ;;  %v2743_v2 = vld [vmem:[%s3688_s22 + $0x6c] sm:$0xf]  ;;  %v2428_v6 = vld [vmem:[%s3688_s22 + $0x78] sm:$0xf0]  ;;  %v2773_v10 = vld [vmem:[%s3688_s22 + $0x154] sm:$0xf0] }
  0xac   : >> { %722 = vperm.xlu0 %3032, %v3620_v40   ;;  %1537 = vmatpush.bf16.msrb.mxu3 %v2591_v56  ;;  %v961_v12 = vmul.f32 6.0, %v3664_v63 }
  0xad   : >> { %1516 = vmatpush.bf16.msrb.mxu2 %v2495_v4  ;;  %v2571_v4 = vor.u32 %v2781_v0, %v2570_v62  ;;  %v2431_v62 = vor.u32 %v2743_v2, %v2428_v6  ;;  %v2538_v0 = vld [vmem:[%s3688_s22 + $0x148] sm:$0xf]  ;;  %v2737_v2 = vld [vmem:[%s3688_s22 + $0x34] sm:$0xf0] }
  0xae   : >> { %627 = vperm.xlu1 %3033, %v4347_v18   ;;  %1479 = vmatpush.bf16.msrb.mxu0 %v2475_v49  ;;  %v2555_v49 = vor.u32 %v2777_v53, %v2554_v19  ;;  %v2539_v20 = vor.u32 %v2773_v10, %v2538_v0  ;;  %v2412_v19 = vld [vmem:[%s3688_s22 + $0x58] sm:$0xf0]  ;;  %v2522_v53 = vld [vmem:[%s3688_s22 + $0x128] sm:$0xf] }
  0xaf   : >> { %1500 = vmatpush.bf16.msrb.mxu1 %v2571_v4  ;;  %v2771_v4 = vld [vmem:[%s3688_s22 + $0x14c] sm:$0xf]  ;;  %v2506_v10 = vld [vmem:[%s3688_s22 + $0x108] sm:$0xf] }
  0xb0   : >> { %1538 = vmatpush.bf16.msrb.mxu3 %v2575_v59  ;;  %v2540_v59 = vld [vmem:[%s3688_s22 + $0x158] sm:$0xf0] }
  0xb3   : >> { %587 = vperm.xlu2 %3034, %v4348_v7   ;;  %v2755_v7 = vld [vmem:[%s3688_s22 + $0xcc] sm:$0xf]  ;;  %1501 = vmatpush.bf16.msrb.mxu1 %v2555_v49 }
  0xb4   : >> { %707 = vperm.xlu0 %3032, %v3611_v37   ;;  %v2479_v57 = vor.u32 %v2755_v7, %v2476_v58  ;;  %v2459_v7 = vor.u32 %v2753_v55, %v2458_v60  ;;  %v2749_v58 = vld [vmem:[%s3688_s22 + $0x94] sm:$0xf0]  ;;  %v2426_v60 = vld [vmem:[%s3688_s22 + $0x68] sm:$0xf] }
  0xb5   : >> { %v2443_v61 = vor.u32 %v2749_v58, %v2442_v48  ;;  %v2745_v55 = vld [vmem:[%s3688_s22 + $0x74] sm:$0xf0]  ;;  %v2543_v48 = vor.u32 %v2771_v4, %v2540_v59  ;;  %v2410_v58 = vld [vmem:[%s3688_s22 + $0x48] sm:$0xf] }
  0xb6   : >> { %712 = vperm.xlu1 %3033, %v3614_v38   ;;  %1517 = vmatpush.bf16.msrb.mxu2 %v2479_v57  ;;  %v2775_v57 = vld [vmem:[%s3688_s22 + $0x16c] sm:$0xf]  ;;  %v2411_v52 = vor.u32 %v2741_v50, %v2410_v58  ;;  %v2765_v4 = vld [vmem:[%s3688_s22 + $0x114] sm:$0xf0] }
  0xb7   : >> { %1480 = vmatpush.bf16.msrb.mxu0 %v2459_v7  ;;  %v2559_v56 = vor.u32 %v2775_v57, %v2556_v54  ;;  %v2427_v7 = vor.u32 %v2745_v55, %v2426_v60  ;;  %1502 = vmatpush.bf16.msrb.mxu1 %v2539_v20  ;;  %v2767_v54 = vld [vmem:[%s3688_s22 + $0x12c] sm:$0xf]  ;;  %v2394_v55 = vld [vmem:[%s3688_s22 + $0x28] sm:$0xf]  ;;  %v2507_v59 = vor.u32 %v2765_v4, %v2506_v10 }
  0xb8   : >> { %v2395_v6 = vor.u32 %v2737_v2, %v2394_v55  ;;  %v2763_v20 = vld [vmem:[%s3688_s22 + $0x10c] sm:$0xf] }
  0xb9   : >> { %1539 = vmatpush.bf16.msrb.mxu3 %v2559_v56  ;;  %v2524_v56 = vld [vmem:[%s3688_s22 + $0x138] sm:$0xf0] }
  0xba   : >> { %1518 = vmatpush.bf16.msrb.mxu2 %v2463_v15  ;;  %v2527_v60 = vor.u32 %v2767_v54, %v2524_v56 }
  0xbb   : >> { %672 = vperm.xlu2 %3034, %v3590_v30   ;;  %1481 = vmatpush.bf16.msrb.mxu0 %v2443_v61  ;;  %v2739_v61 = vld [vmem:[%s3688_s22 + $0x4c] sm:$0xf] }
  0xbc   : >> { %622 = vperm.xlu0 %3032, %v4349_v17   ;;  %v2415_v49 = vor.u32 %v2739_v61, %v2412_v19  ;;  %v2378_v61 = vld [vmem:[%s3688_s22 + $0x8] sm:$0xf]  ;;  %v2731_v19 = vld [vmem:[%s3688_s22 + $0xc] sm:$0xf] }
  0xbd   : >> { %v3810_v15 = vpop.permute.xlu2 %657  ;;  %1540 = vmatpush.bf16.msrb.mxu3 %v2543_v48  ;;  %v2508_v48 = vld [vmem:[%s3688_s22 + $0x118] sm:$0xf0] }
  0xbe   : >> { %697 = vperm.xlu1 %3033, %v3605_v35   ;;  %1519 = vmatpush.bf16.msrb.mxu2 %v2447_v51  ;;  %v2769_v51 = vld [vmem:[%s3688_s22 + $0x134] sm:$0xf0]  ;;  %v2511_v50 = vor.u32 %v2763_v20, %v2508_v48  ;;  %v3303_v20 = vmov 1.0|1.0  }
  0xbf   : >> { %1482 = vmatpush.bf16.msrb.mxu0 %v2427_v7  ;;  %v2523_v57 = vor.u32 %v2769_v51, %v2522_v53  ;;  %v2735_v7 = vld [vmem:[%s3688_s22 + $0x2c] sm:$0xf]  ;;  %v2380_v51 = vld [vmem:[%s3688_s22 + $0x18] sm:$0xf0] }
  0xc1   : >> { %1503 = vmatpush.bf16.msrb.mxu1 %v2523_v57  ;;  %1541 = vmatpush.bf16.msrb.mxu3 %v2527_v60  ;;  %v573_v57 = vadd.f32 255.0, %v3672_v47 }
  0xc2   : >> { %1520 = vmatpush.bf16.msrb.mxu2 %v2431_v62  ;;  %v2396_v62 = vld [vmem:[%s3688_s22 + $0x38] sm:$0xf0] }
  0xc3   : >> { %1483 = vmatpush.bf16.msrb.mxu0 %v2411_v52  ;;  %v2399_v0 = vor.u32 %v2735_v7, %v2396_v62  ;;  %v2733_v52 = vld [vmem:[%s3688_s22 + $0x14] sm:$0xf0]  ;;  %v574_v54 = vsel %vm572_vm12, %v573_v57, %v3672_v47  ;;  %s2720_s22 = sadd.f32 -1.0, %s4023_s14 }
  0xc4   : >> { %607 = vperm.xlu0 %3032, %v4350_v13   ;;  %v2379_v53 = vor.u32 %v2733_v52, %v2378_v61  ;;  %v584_v60 = vadd.f32 1.0, %v574_v54  ;;  %v3840_v7 = vperm.slane %v574_v54, 0 }
  0xc5   : >> { %v663_v58 = vpop.permute.xlu2 %662  ;;  %1504 = vmatpush.bf16.msrb.mxu1 %v2507_v59  ;;  %1542 = vmatpush.bf16.msrb.mxu3 %v2511_v50 }
  0xc6   : >> { %612 = vperm.xlu1 %3033, %v4351_v14   ;;  %1521 = vmatpush.bf16.msrb.mxu2 %v2415_v49  ;;  %v2383_v49 = vor.u32 %v2731_v19, %v2380_v51  ;;  %vm775_vm13 = vcmp.eq.f32.partialorder %v3810_v15, %v3840_v7  ;;  %vm777_vm14 = vcmp.eq.f32.partialorder %v663_v58, %v3840_v7 }
  0xc7   : >> { %1484 = vmatpush.bf16.msrb.mxu0 %v2395_v6  ;;  %v3842_v6 = vperm.slane %v584_v60, 0  ;;  %vm3850_vm1 = vmpackc.low %vm777_vm14, %vm775_vm13 }
  0xc9   : >> { %vm776_vm15 = vcmp.eq.f32.partialorder %v3810_v15, %v3842_v6  ;;  %vm778_vm0 = vcmp.eq.f32.partialorder %v663_v58, %v3842_v6 }
  0xca   : >> { %1522 = vmatpush.bf16.msrb.mxu2 %v2399_v0  ;;  %vm2688_vm2 = vmpackc.low %vm778_vm0, %vm776_vm15 }
  0xcb   : >> { %1485 = vmatpush.bf16.msrb.mxu0 %v2379_v53 }
  0xcc   : >> { %692 = vperm.xlu0 %3032, %v3602_v34  }
  0xcd   : >> { %v648_v56 = vpop.permute.xlu2 %647 }
  0xce   : >> { %597 = vperm.xlu1 %3033, %v4352_v9   ;;  %1523 = vmatpush.bf16.msrb.mxu2 %v2383_v49 }
  0xd4   : >> { %677 = vperm.xlu0 %3032, %v3593_v31  }
  0xd5   : >> { %v733_v62 = vpop.permute.xlu2 %732 }
  0xd6   : >> { %682 = vperm.xlu1 %3033, %v3596_v32  }
  0xdc   : >> { %592 = vperm.xlu0 %3032, %v4353_v8  }
  0xdd   : >> { %v718_v48 = vpop.permute.xlu2 %717 }
  0xde   : >> { %667 = vperm.xlu1 %3033, %v3587_v29  }
  0xe5   : >> { %v633_v53 = vpop.permute.xlu2 %632 }
  0xed   : >> { %v618_v57 = vpop.permute.xlu2 %617 }
  0xf5   : >> { %v703_v60 = vpop.permute.xlu2 %702 }
  0xf6   : >> { %v978_v55 = vpop.permute.xlu0 %977 }
  0xf7   : >> { %vm995_vm3 = vcmp.eq.f32.partialorder %v978_v55, %v4336_v3  ;;  %vm996_vm6 = vcmp.eq.f32.partialorder %v978_v55, %v4335_v11 }
  0xf8   : >> { %v988_v2 = vpop.permute.xlu1 %987 }
  0xf9   : >> { %vm999_vm14 = vcmp.eq.f32.partialorder %v988_v2, %v4336_v3 }
  0xfe   : >> { %v983_v0 = vpop.permute.xlu0 %982 }
  0xff   : >> { %vm997_vm4 = vcmp.eq.f32.partialorder %v983_v0, %v4336_v3  ;;  %vm998_vm5 = vcmp.eq.f32.partialorder %v983_v0, %v4335_v11 }
 0x100   : >> { %vm3858_vm7 = vmpackc.low %vm997_vm4, %vm995_vm3  ;;  %v993_v15 = vpop.permute.xlu1 %992  ;;  %vm771_vm3 = vcmp.eq.f32.partialorder %v648_v56, %v3840_v7  ;;  %vm772_vm4 = vcmp.eq.f32.partialorder %v648_v56, %v3842_v6 }
 0x101   : >> { %vm3862_vm8 = vmpackc.low %vm998_vm5, %vm996_vm6  ;;  %2625 = vmatmul.msk.bf16.vlgmr.msra.gmra.mxu0 %vm3858_vm7, %v3303_v20  ;;  %2633 = vmatmul.msk.bf16.vlgmr.msra.gmra.mxu2 %vm3858_vm7, %v3303_v20  ;;  %vm1001_vm15 = vcmp.eq.f32.partialorder %v993_v15, %v4336_v3  ;;  %vm805_vm6 = vcmp.eq.f32.partialorder %v733_v62, %v3840_v7 }
 0x102   : >> { %2629 = vmatmul.msk.bf16.vlgmr.msra.gmra.mxu1 %vm3862_vm8, %v3303_v20  ;;  %2637 = vmatmul.msk.bf16.vlgmr.msra.gmra.mxu3 %vm3862_vm8, %v3303_v20  ;;  %vm3894_vm5 = vmpackc.low %vm1001_vm15, %vm999_vm14 }
 0x103   : >> { %2657 = vmatpush.bf16.msk.msra.mxu0 %vm3850_vm1, %v3303_v20  ;;  %2689 = vmatpush.bf16.msk.msra.mxu2 %vm2688_vm2, %v3303_v20  ;;  %vm1000_vm1 = vcmp.eq.f32.partialorder %v988_v2, %v4335_v11  ;;  %vm1002_vm2 = vcmp.eq.f32.partialorder %v993_v15, %v4335_v11  ;;  %v957_v11 = vmul.f32 %v3664_v63, %v3664_v63 }
 0x106   : >> { %v738_v59 = vpop.permute.xlu0 %737 }
 0x107   : >> { %vm807_vm9 = vcmp.eq.f32.partialorder %v738_v59, %v3840_v7  ;;  %vm808_vm12 = vcmp.eq.f32.partialorder %v738_v59, %v3842_v6 }
 0x108   : >> { %v743_v58 = vpop.permute.xlu1 %742 }
 0x109   : >> { %vm809_vm10 = vcmp.eq.f32.partialorder %v743_v58, %v3840_v7  ;;  %vm810_vm11 = vcmp.eq.f32.partialorder %v743_v58, %v3842_v6 }
 0x10a   : >> { %vm2672_vm13 = vmpackc.low %vm809_vm10, %vm807_vm9 }
 0x10b   : >> { %vm2704_vm0 = vmpackc.low %vm810_vm11, %vm808_vm12  ;;  %2673 = vmatpush.bf16.msk.msra.mxu1 %vm2672_vm13, %v3303_v20  ;;  %vm806_vm12 = vcmp.eq.f32.partialorder %v733_v62, %v3842_v6  ;;  %v688_v62 = vpop.permute.xlu2 %687 }
 0x10c   : >> { %2705 = vmatpush.bf16.msk.msra.mxu3 %vm2704_vm0, %v3303_v20  ;;  %vm3899_vm9 = vmpackc.low %vm1002_vm2, %vm1000_vm1 }
 0x10e   : >> { %v653_v61 = vpop.permute.xlu0 %652 }
 0x10f   : >> { %vm773_vm10 = vcmp.eq.f32.partialorder %v653_v61, %v3840_v7  ;;  %vm774_vm11 = vcmp.eq.f32.partialorder %v653_v61, %v3842_v6 }
 0x110   : >> { %vm2658_vm13 = vmpackc.low %vm773_vm10, %vm771_vm3  ;;  %v728_v19 = vpop.permute.xlu1 %727 }
 0x111   : >> { %vm2690_vm0 = vmpackc.low %vm774_vm11, %vm772_vm4  ;;  %vm803_vm14 = vcmp.eq.f32.partialorder %v728_v19, %v3840_v7  ;;  %vm804_vm15 = vcmp.eq.f32.partialorder %v728_v19, %v3842_v6  ;;  %2627 = vmatmul.msk.bf16.gmra.mxu0 %vm3894_vm5, %v3303_v20  ;;  %2635 = vmatmul.msk.bf16.gmra.mxu2 %vm3894_vm5, %v3303_v20 }
 0x112   : >> { %vm2674_vm1 = vmpackc.low %vm805_vm6, %vm803_vm14  ;;  %2631 = vmatmul.msk.bf16.gmra.mxu1 %vm3899_vm9, %v3303_v20  ;;  %2639 = vmatmul.msk.bf16.gmra.mxu3 %vm3899_vm9, %v3303_v20  ;;  %vm765_vm14 = vcmp.eq.f32.partialorder %v633_v53, %v3840_v7 }
 0x113   : >> { %vm2706_vm2 = vmpackc.low %vm806_vm12, %vm804_vm15  ;;  %2659 = vmatpush.bf16.msk.msra.mxu0 %vm2658_vm13, %v3303_v20  ;;  %2691 = vmatpush.bf16.msk.msra.mxu2 %vm2690_vm0, %v3303_v20  ;;  %vm799_vm13 = vcmp.eq.f32.partialorder %v718_v48, %v3840_v7  ;;  %vm800_vm0 = vcmp.eq.f32.partialorder %v718_v48, %v3842_v6  ;;  %v603_v4 = vpop.permute.xlu2 %602 }
 0x114   : >> { %2675 = vmatpush.bf16.msk.msra.mxu1 %vm2674_vm1, %v3303_v20  ;;  %2707 = vmatpush.bf16.msk.msra.mxu3 %vm2706_vm2, %v3303_v20  ;;  %vm766_vm2 = vcmp.eq.f32.partialorder %v633_v53, %v3842_v6 }
 0x116   : >> { %v638_v51 = vpop.permute.xlu0 %637 }
 0x117   : >> { %vm767_vm3 = vcmp.eq.f32.partialorder %v638_v51, %v3840_v7  ;;  %vm768_vm10 = vcmp.eq.f32.partialorder %v638_v51, %v3842_v6 }
 0x118   : >> { %v643_v49 = vpop.permute.xlu1 %642 }
 0x119   : >> { %vm769_vm4 = vcmp.eq.f32.partialorder %v643_v49, %v3840_v7  ;;  %vm770_vm6 = vcmp.eq.f32.partialorder %v643_v49, %v3842_v6 }
 0x11a   : >> { %vm2660_vm11 = vmpackc.low %vm769_vm4, %vm767_vm3 }
 0x11b   : >> { %vm2692_vm12 = vmpackc.low %vm770_vm6, %vm768_vm10  ;;  %2661 = vmatpush.bf16.msk.msra.mxu0 %vm2660_vm11, %v3303_v20  ;;  %v588_v58 = vpop.permute.xlu2 %587 }
 0x11c   : >> { %2693 = vmatpush.bf16.msk.msra.mxu2 %vm2692_vm12, %v3303_v20 }
 0x11e   : >> { %v723_v54 = vpop.permute.xlu0 %722 }
 0x11f   : >> { %vm801_vm15 = vcmp.eq.f32.partialorder %v723_v54, %v3840_v7  ;;  %vm802_vm1 = vcmp.eq.f32.partialorder %v723_v54, %v3842_v6 }
 0x120   : >> { %vm2676_vm3 = vmpackc.low %vm801_vm15, %vm799_vm13  ;;  %v628_v56 = vpop.permute.xlu1 %627 }
 0x121   : >> { %vm2708_vm4 = vmpackc.low %vm802_vm1, %vm800_vm0  ;;  %vm763_vm6 = vcmp.eq.f32.partialorder %v628_v56, %v3840_v7  ;;  %vm764_vm10 = vcmp.eq.f32.partialorder %v628_v56, %v3842_v6  ;;  %2641 = vmatmul.msk.bf16.vlgmr.msrb.gmra.mxu0 %vm3858_vm7, %v3303_v20  ;;  %2649 = vmatmul.msk.bf16.vlgmr.msrb.gmra.mxu2 %vm3858_vm7, %v3303_v20  ;;  %vm759_vm1 = vcmp.eq.f32.partialorder %v618_v57, %v3840_v7 }
 0x122   : >> { %vm2662_vm11 = vmpackc.low %vm765_vm14, %vm763_vm6  ;;  %2645 = vmatmul.msk.bf16.vlgmr.msrb.gmra.mxu1 %vm3862_vm8, %v3303_v20  ;;  %2653 = vmatmul.msk.bf16.vlgmr.msrb.gmra.mxu3 %vm3862_vm8, %v3303_v20 }
 0x123   : >> { %vm2694_vm12 = vmpackc.low %vm766_vm2, %vm764_vm10  ;;  %2677 = vmatpush.bf16.msk.msra.mxu1 %vm2676_vm3, %v3303_v20  ;;  %2709 = vmatpush.bf16.msk.msra.mxu3 %vm2708_vm4, %v3303_v20  ;;  %vm760_vm2 = vcmp.eq.f32.partialorder %v618_v57, %v3842_v6  ;;  %vm793_vm3 = vcmp.eq.f32.partialorder %v703_v60, %v3840_v7  ;;  %vm794_vm10 = vcmp.eq.f32.partialorder %v703_v60, %v3842_v6  ;;  %v673_v52 = vpop.permute.xlu2 %672 }
 0x124   : >> { %2663 = vmatpush.bf16.msk.msra.mxu0 %vm2662_vm11, %v3303_v20  ;;  %2695 = vmatpush.bf16.msk.msra.mxu2 %vm2694_vm12, %v3303_v20 }
 0x126   : >> { %v708_v55 = vpop.permute.xlu0 %707 }
 0x127   : >> { %vm795_vm7 = vcmp.eq.f32.partialorder %v708_v55, %v3840_v7  ;;  %vm796_vm8 = vcmp.eq.f32.partialorder %v708_v55, %v3842_v6 }
 0x128   : >> { %v713_v2 = vpop.permute.xlu1 %712 }
 0x129   : >> { %vm797_vm13 = vcmp.eq.f32.partialorder %v713_v2, %v3840_v7  ;;  %vm798_vm0 = vcmp.eq.f32.partialorder %v713_v2, %v3842_v6 }
 0x12a   : >> { %vm2678_vm14 = vmpackc.low %vm797_vm13, %vm795_vm7 }
 0x12b   : >> { %vm2710_vm15 = vmpackc.low %vm798_vm0, %vm796_vm8  ;;  %2679 = vmatpush.bf16.msk.msra.mxu1 %vm2678_vm14, %v3303_v20 }
 0x12c   : >> { %2711 = vmatpush.bf16.msk.msra.mxu3 %vm2710_vm15, %v3303_v20 }
 0x12e   : >> { %v623_v47 = vpop.permute.xlu0 %622 }
 0x12f   : >> { %vm761_vm4 = vcmp.eq.f32.partialorder %v623_v47, %v3840_v7  ;;  %vm762_vm6 = vcmp.eq.f32.partialorder %v623_v47, %v3842_v6 }
 0x130   : >> { %vm2664_vm11 = vmpackc.low %vm761_vm4, %vm759_vm1  ;;  %v698_v0 = vpop.permute.xlu1 %697 }
 0x131   : >> { %vm2696_vm12 = vmpackc.low %vm762_vm6, %vm760_vm2  ;;  %vm791_vm7 = vcmp.eq.f32.partialorder %v698_v0, %v3840_v7  ;;  %vm792_vm13 = vcmp.eq.f32.partialorder %v698_v0, %v3842_v6  ;;  %2643 = vmatmul.msk.bf16.gmra.mxu0 %vm3894_vm5, %v3303_v20  ;;  %2651 = vmatmul.msk.bf16.gmra.mxu2 %vm3894_vm5, %v3303_v20 }
 0x132   : >> { %vm2680_vm0 = vmpackc.low %vm793_vm3, %vm791_vm7  ;;  %2647 = vmatmul.msk.bf16.gmra.mxu1 %vm3899_vm9, %v3303_v20  ;;  %2655 = vmatmul.msk.bf16.gmra.mxu3 %vm3899_vm9, %v3303_v20  ;;  %vm787_vm3 = vcmp.eq.f32.partialorder %v688_v62, %v3840_v7 }
 0x133   : >> { %vm2712_vm8 = vmpackc.low %vm794_vm10, %vm792_vm13  ;;  %2665 = vmatpush.bf16.msk.msra.mxu0 %vm2664_vm11, %v3303_v20  ;;  %2697 = vmatpush.bf16.msk.msra.mxu2 %vm2696_vm12, %v3303_v20  ;;  %vm788_vm10 = vcmp.eq.f32.partialorder %v688_v62, %v3842_v6  ;;  %vm753_vm12 = vcmp.eq.f32.partialorder %v603_v4, %v3840_v7 }
 0x134   : >> { %2681 = vmatpush.bf16.msk.msra.mxu1 %vm2680_vm0, %v3303_v20  ;;  %2713 = vmatpush.bf16.msk.msra.mxu3 %vm2712_vm8, %v3303_v20  ;;  %vm754_vm8 = vcmp.eq.f32.partialorder %v603_v4, %v3842_v6 }
 0x136   : >> { %v608_v10 = vpop.permute.xlu0 %607 }
 0x137   : >> { %vm755_vm5 = vcmp.eq.f32.partialorder %v608_v10, %v3840_v7  ;;  %vm756_vm9 = vcmp.eq.f32.partialorder %v608_v10, %v3842_v6 }
 0x138   : >> { %v613_v15 = vpop.permute.xlu1 %612 }
 0x139   : >> { %vm757_vm14 = vcmp.eq.f32.partialorder %v613_v15, %v3840_v7  ;;  %vm758_vm15 = vcmp.eq.f32.partialorder %v613_v15, %v3842_v6 }
 0x13a   : >> { %vm2666_vm1 = vmpackc.low %vm757_vm14, %vm755_vm5 }
 0x13b   : >> { %vm2698_vm2 = vmpackc.low %vm758_vm15, %vm756_vm9  ;;  %2667 = vmatpush.bf16.msk.msra.mxu0 %vm2666_vm1, %v3303_v20 }
 0x13c   : >> { %2699 = vmatpush.bf16.msk.msra.mxu2 %vm2698_vm2, %v3303_v20 }
 0x13e   : >> { %v693_v59 = vpop.permute.xlu0 %692 }
 0x13f   : >> { %vm789_vm4 = vcmp.eq.f32.partialorder %v693_v59, %v3840_v7  ;;  %vm790_vm6 = vcmp.eq.f32.partialorder %v693_v59, %v3842_v6 }
 0x140   : >> { %vm2682_vm11 = vmpackc.low %vm789_vm4, %vm787_vm3  ;;  %v598_v48 = vpop.permute.xlu1 %597 }
 0x141   : >> { %vm2714_vm7 = vmpackc.low %vm790_vm6, %vm788_vm10  ;;  %vm751_vm13 = vcmp.eq.f32.partialorder %v598_v48, %v3840_v7  ;;  %vm752_vm0 = vcmp.eq.f32.partialorder %v598_v48, %v3842_v6  ;;  %2683 = vmatpush.bf16.msk.msra.mxu1 %vm2682_vm11, %v3303_v20  ;;  %vm747_vm6 = vcmp.eq.f32.partialorder %v588_v58, %v3840_v7 }
 0x142   : >> { %vm2668_vm5 = vmpackc.low %vm753_vm12, %vm751_vm13  ;;  %2715 = vmatpush.bf16.msk.msra.mxu3 %vm2714_vm7, %v3303_v20  ;;  %vm748_vm12 = vcmp.eq.f32.partialorder %v588_v58, %v3842_v6  ;;  %vm781_vm13 = vcmp.eq.f32.partialorder %v673_v52, %v3840_v7 }
 0x143   : >> { %vm2700_vm14 = vmpackc.low %vm754_vm8, %vm752_vm0  ;;  %2669 = vmatpush.bf16.msk.msra.mxu0 %vm2668_vm5, %v3303_v20 }
 0x144   : >> { %2701 = vmatpush.bf16.msk.msra.mxu2 %vm2700_vm14, %v3303_v20  ;;  %vm782_vm14 = vcmp.eq.f32.partialorder %v673_v52, %v3842_v6 }
 0x146   : >> { %v678_v50 = vpop.permute.xlu0 %677 }
 0x147   : >> { %vm783_vm15 = vcmp.eq.f32.partialorder %v678_v50, %v3840_v7  ;;  %vm784_vm2 = vcmp.eq.f32.partialorder %v678_v50, %v3842_v6 }
 0x148   : >> { %v683_v61 = vpop.permute.xlu1 %682 }
 0x149   : >> { %vm785_vm9 = vcmp.eq.f32.partialorder %v683_v61, %v3840_v7  ;;  %vm786_vm1 = vcmp.eq.f32.partialorder %v683_v61, %v3842_v6 }
 0x14a   : >> { %vm2684_vm3 = vmpackc.low %vm785_vm9, %vm783_vm15 }
 0x14b   : >> { %vm2716_vm4 = vmpackc.low %vm786_vm1, %vm784_vm2  ;;  %2685 = vmatpush.bf16.msk.msra.mxu1 %vm2684_vm3, %v3303_v20 }
 0x14c   : >> { %2717 = vmatpush.bf16.msk.msra.mxu3 %vm2716_vm4, %v3303_v20 }
 0x14e   : >> { %v593_v19 = vpop.permute.xlu0 %592 }
 0x14f   : >> { %vm749_vm10 = vcmp.eq.f32.partialorder %v593_v19, %v3840_v7  ;;  %vm750_vm11 = vcmp.eq.f32.partialorder %v593_v19, %v3842_v6 }
 0x150   : >> { %vm2670_vm7 = vmpackc.low %vm749_vm10, %vm747_vm6  ;;  %v668_v53 = vpop.permute.xlu1 %667 }
 0x151   : >> { %vm2702_vm0 = vmpackc.low %vm750_vm11, %vm748_vm12  ;;  %vm779_vm8 = vcmp.eq.f32.partialorder %v668_v53, %v3840_v7  ;;  %vm780_vm5 = vcmp.eq.f32.partialorder %v668_v53, %v3842_v6  ;;  %2671 = vmatpush.bf16.msk.msra.mxu0 %vm2670_vm7, %v3303_v20 }
 0x152   : >> { %vm2686_vm15 = vmpackc.low %vm781_vm13, %vm779_vm8  ;;  %2703 = vmatpush.bf16.msk.msra.mxu2 %vm2702_vm0, %v3303_v20 }
 0x153   : >> { %vm2718_vm9 = vmpackc.low %vm782_vm14, %vm780_vm5  ;;  %2687 = vmatpush.bf16.msk.msra.mxu1 %vm2686_vm15, %v3303_v20 }
 0x154   : >> { %2719 = vmatpush.bf16.msk.msra.mxu3 %vm2718_vm9, %v3303_v20 }
 0x17e   : >> { %v1411_v51 = vpop.f32.mrf.mxu0 }
 0x17f   : >> { %v1430_v49 = vpop.f32.mrf.mxu1 }
 0x180   : >> { %v1431_v60 = vadd.f32 %v1430_v49, %v1411_v51 }
 0x184   : >> { %v1449_v57 = vpop.f32.mrf.mxu2 }
 0x185   : >> { %v1468_v54 = vpop.f32.mrf.mxu3 }
 0x186   : >> { %v1413_v56 = vpop.f32.mrf.mxu0  ;;  %v1469_v62 = vadd.f32 %v1468_v54, %v1449_v57 }
 0x187   : >> { %v1432_v7 = vpop.f32.mrf.mxu1 }
 0x188   : >> { %v1433_v55 = vadd.f32 %v1432_v7, %v1413_v56 }
 0x18a   : >> { %v1554_v2 = vpack.c.bf16 %v1433_v55, %v1431_v60 }
 0x18c   : >> { %1570 = vmatmul.bf16.vlgmr.msra.gmra.mxu0 %v1554_v2  ;;  %1628 = vmatmul.bf16.vlgmr.msra.gmra.mxu2 %v1554_v2  ;;  %v1451_v6 = vpop.f32.mrf.mxu2 }
 0x18d   : >> { %v1470_v47 = vpop.f32.mrf.mxu3 }
 0x18e   : >> { %v1471_v0 = vadd.f32 %v1470_v47, %v1451_v6  ;;  %v1416_v10 = vpop.f32.mrf.mxu0 }
 0x18f   : >> { %v1435_v15 = vpop.f32.mrf.mxu1 }
 0x190   : >> { %v1555_v4 = vpack.c.bf16 %v1471_v0, %v1469_v62  ;;  %v1436_v50 = vadd.f32 %v1435_v15, %v1416_v10 }
 0x192   : >> { %1599 = vmatmul.bf16.vlgmr.msra.gmra.mxu1 %v1555_v4  ;;  %1657 = vmatmul.bf16.vlgmr.msra.gmra.mxu3 %v1555_v4 }
 0x194   : >> { %v1454_v20 = vpop.f32.mrf.mxu2 }
 0x195   : >> { %v1473_v59 = vpop.f32.mrf.mxu3 }
 0x196   : >> { %v1418_v48 = vpop.f32.mrf.mxu0  ;;  %v1474_v51 = vadd.f32 %v1473_v59, %v1454_v20 }
 0x197   : >> { %v1437_v58 = vpop.f32.mrf.mxu1 }
 0x198   : >> { %v1438_v61 = vadd.f32 %v1437_v58, %v1418_v48 }
 0x19a   : >> { %v1556_v52 = vpack.c.bf16 %v1438_v61, %v1436_v50 }
 0x19c   : >> { %1575 = vmatmul.bf16.gmra.mxu0 %v1556_v52  ;;  %1633 = vmatmul.bf16.gmra.mxu2 %v1556_v52  ;;  %v1456_v19 = vpop.f32.mrf.mxu2 }
 0x19d   : >> { %v1475_v53 = vpop.f32.mrf.mxu3 }
 0x19e   : >> { %v1476_v49 = vadd.f32 %v1475_v53, %v1456_v19  ;;  %v1487_v57 = vpop.f32.mrf.mxu0 }
 0x19f   : >> { %v1506_v54 = vpop.f32.mrf.mxu1 }
 0x1a0   : >> { %v1557_v56 = vpack.c.bf16 %v1476_v49, %v1474_v51  ;;  %v1507_v6 = vadd.f32 %v1506_v54, %v1487_v57 }
 0x1a2   : >> { %1604 = vmatmul.bf16.gmra.mxu1 %v1557_v56  ;;  %1662 = vmatmul.bf16.gmra.mxu3 %v1557_v56 }
 0x1a4   : >> { %v1525_v7 = vpop.f32.mrf.mxu2 }
 0x1a5   : >> { %v1544_v60 = vpop.f32.mrf.mxu3 }
 0x1a6   : >> { %v1489_v55 = vpop.f32.mrf.mxu0  ;;  %v1545_v15 = vadd.f32 %v1544_v60, %v1525_v7  ;;  %v578_v60 = vmul.f32 6.0, %v3667_v1 }
 0x1a7   : >> { %v1508_v2 = vpop.f32.mrf.mxu1 }
 0x1a8   : >> { %v1509_v47 = vadd.f32 %v1508_v2, %v1489_v55 }
 0x1aa   : >> { %v1558_v62 = vpack.c.bf16 %v1509_v47, %v1507_v6  ;;  %v2360_v6 = vadd.f32 -15.0, %v578_v60 }
 0x1ac   : >> { %1580 = vmatmul.bf16.gmra.mxu0 %v1558_v62  ;;  %1638 = vmatmul.bf16.gmra.mxu2 %v1558_v62  ;;  %v1527_v0 = vpop.f32.mrf.mxu2 }
 0x1ad   : >> { %v1546_v10 = vpop.f32.mrf.mxu3 }
 0x1ae   : >> { %v1547_v4 = vadd.f32 %v1546_v10, %v1527_v0  ;;  %v1492_v20 = vpop.f32.mrf.mxu0 }
 0x1af   : >> { %v1511_v59 = vpop.f32.mrf.mxu1 }
 0x1b0   : >> { %v1559_v48 = vpack.c.bf16 %v1547_v4, %v1545_v15  ;;  %v1512_v19 = vadd.f32 %v1511_v59, %v1492_v20  ;;  %v576_v15 = vmul.f32 %v3667_v1, %v3667_v1  ;;  %v580_v4 = vmul.f32 %v2360_v6, %v3667_v1 }
 0x1b2   : >> { %1609 = vmatmul.bf16.gmra.mxu1 %v1559_v48  ;;  %1667 = vmatmul.bf16.gmra.mxu3 %v1559_v48 }
 0x1b4   : >> { %v1530_v58 = vpop.f32.mrf.mxu2 }
 0x1b5   : >> { %v1549_v50 = vpop.f32.mrf.mxu3 }
 0x1b6   : >> { %v1494_v61 = vpop.f32.mrf.mxu0  ;;  %v1550_v54 = vadd.f32 %v1549_v50, %v1530_v58  ;;  %v4029_v58 = vstv %s4023_s14  ;;  %s538_s14 = sand.u32 127, %s532_s25 }
 0x1b7   : >> { %v1513_v52 = vpop.f32.mrf.mxu1  ;;  %s539_s2 = sadd.s32 %s2358_s20, %s538_s14  ;;  %s2794_s14 = sshll.u32 (%p508_p1), %s3271_s30, 4 }
 0x1b8   : >> { %v1514_v53 = vadd.f32 %v1513_v52, %v1494_v61  ;;  %s4207_s25 = sld [smem:[#allocation6 + %s539_s2]]  ;;  %s2154_s2 = scalar_lea.hbm (%p508_p1), %s4290_s8, %s2794_s14 }
 0x1ba   : >> { %v1560_v51 = vpack.c.bf16 %v1514_v53, %v1512_v19  ;;  %v577_v19 = vmul.f32 %v576_v15, %v3667_v1  ;;  %v581_v53 = vadd.f32 10.0, %v580_v4 }
 0x1bc   : >> { %1585 = vmatmul.bf16.gmra.mxu0 %v1560_v51  ;;  %1643 = vmatmul.bf16.gmra.mxu2 %v1560_v51  ;;  %v1532_v49 = vpop.f32.mrf.mxu2  ;;  %v4033_v51 = vadd.f32 -1.0, %v3667_v1 }
 0x1bd   : >> { %v1551_v57 = vpop.f32.mrf.mxu3 }
 0x1be   : >> { %v1552_v56 = vadd.f32 %v1551_v57, %v1532_v49 }
 0x1c0   : >> { %v1561_v7 = vpack.c.bf16 %v1552_v56, %v1550_v54 }
 0x1c2   : >> { %1614 = vmatmul.bf16.gmra.mxu1 %v1561_v7  ;;  %1672 = vmatmul.bf16.gmra.mxu3 %v1561_v7 }
 0x209   : >> { %v1571_v55 = vpop.f32.mrf.mxu0 }
 0x20f   : >> { %v1600_v2 = vpop.f32.mrf.mxu1  ;;  %v1629_v10 = vpop.f32.mrf.mxu2 }
 0x210   : >> { %v1601_v47 = vadd.f32 %v1600_v2, %v1571_v55 }
 0x211   : >> { %v1573_v52 = vpop.f32.mrf.mxu0 }
 0x212   : >> { %vm2795_vm1 = vcmp.lt.s32.totalorder %v1601_v47, 0  ;;  %v2796_v62 = vceil.f32 %v1601_v47  ;;  %v2797_v0 = vfloor.f32 %v1601_v47 }
 0x214   : >> { %v2798_v20 = vsel %vm2795_vm1, %v2796_v62, %v2797_v0 }
 0x215   : >> { %v2799_v59 = vcvt.f32.s32 %v2798_v20  ;;  %v1658_v48 = vpop.f32.mrf.mxu3  ;;  %v4041_v20 = vstv %s2720_s22  ;;  %s544_s22 = sadd.s32 %s3271_s30, %s542_s15  ;;  %s2155_s30 = sshll.u32 (%p508_p1), %s3636_s26, 4  ;;  %s2156_s30 = int_to_ptr.vmem [resolvable:$true] %s2155_s30 }
 0x216   : >> { %v1659_v50 = vadd.f32 %v1658_v48, %v1629_v10  ;;  %s2359_s4 = sshll.u32 %s544_s22, 7 }
 0x217   : >> { %v1695_v61 = vand.u32 15, %v2799_v59  ;;  %v1602_v49 = vpop.f32.mrf.mxu1  ;;  %v4043_v59 = vmul.f32 %v581_v53, %v577_v19  ;;  %s548_s0 = sadd.s32 %s2359_s4, %s547_s1  ;;  %s2081_s1 = sand.u32 (%p508_p1), 2147483647, %s3514_s18 }
 0x218   : >> { %vm2800_vm2 = vcmp.lt.s32.totalorder %v1659_v50, 0  ;;  %v2801_v57 = vceil.f32 %v1659_v50  ;;  %v2802_v54 = vfloor.f32 %v1659_v50  ;;  %v1603_v56 = vadd.f32 %v1602_v49, %v1573_v52  ;;  %v1631_v50 = vpop.f32.mrf.mxu2  ;;  %s549_s19 = sld [smem:[#allocation6 + %s548_s0]]  ;;  %s2082_s4 = sfloor.f32 (%p508_p1), %s2081_s1 }
 0x219   : >> { %vm1697_vm3 = vcmp.lt.s32.totalorder %v1695_v61, 8  ;;  %vm1701_vm4 = vcmp.lt.s32.totalorder %v1695_v61, 4  ;;  %vm1703_vm6 = vcmp.eq.s32.totalorder %v1695_v61, 12  ;;  %vm1705_vm10 = vcmp.eq.s32.totalorder %v1695_v61, 14  ;;  %s2140_s0 = scalar_lea.sflag (%p508_p1), [#allocation4], %s3480_s6 }
 0x21a   : >> { %v1699_v7 = vsel %vm1697_vm3, %v3667_v1, %v3664_v63  ;;  %vm1707_vm11 = vmor %vm1703_vm6, %vm1705_vm10  ;;  %v1714_v60 = vand.u32 1, %v1695_v61  ;;  %v1722_v55 = vand.u32 2, %v1695_v61  ;;  %v2803_v2 = vsel %vm2800_vm2, %v2801_v57, %v2802_v54 }
 0x21b   : >> { %v1710_v6 = vsel %vm1707_vm11, %v3667_v1, %v4029_v58  ;;  %v2804_v47 = vcvt.f32.s32 %v2803_v2  ;;  %vm2805_vm12 = vcmp.lt.s32.totalorder %v1603_v56, 0  ;;  %v2806_v62 = vceil.f32 %v1603_v56 }
 0x21c   : >> { %v1712_v0 = vsel %vm1701_vm4, %v3664_v63, %v1710_v6  ;;  %v1716_v10 = vmul.u32 2, %v1714_v60  ;;  %v1724_v15 = vsub.s32 1, %v1722_v55  ;;  %v2807_v4 = vfloor.f32 %v1603_v56 }
 0x21d   : >> { %v1734_v48 = vand.u32 15, %v2804_v47  ;;  %v1660_v52 = vpop.f32.mrf.mxu3  ;;  %v4046_v61 = vadd.f32 -1.0, %v3664_v63 }
 0x21e   : >> { %v1718_v49 = vsub.s32 1, %v1716_v10  ;;  %v1726_v57 = vcvt.s32.f32 %v1724_v15  ;;  %v2808_v54 = vsel %vm2805_vm12, %v2806_v62, %v2807_v4  ;;  %v1661_v2 = vadd.f32 %v1660_v52, %v1631_v50  ;;  %v1576_v50 = vpop.f32.mrf.mxu0 }
 0x21f   : >> { %vm1736_vm7 = vcmp.lt.s32.totalorder %v1734_v48, 8  ;;  %vm1740_vm13 = vcmp.lt.s32.totalorder %v1734_v48, 4  ;;  %vm1742_vm0 = vcmp.eq.s32.totalorder %v1734_v48, 12  ;;  %vm1744_vm8 = vcmp.eq.s32.totalorder %v1734_v48, 14  ;;  %v1605_v55 = vpop.f32.mrf.mxu1 }
 0x220   : >> { %v1720_v60 = vcvt.s32.f32 %v1718_v49  ;;  %v1730_v56 = vmul.f32 %v1726_v57, %v1712_v0  ;;  %v1738_v19 = vsel %vm1736_vm7, %v4033_v51, %v3664_v63  ;;  %vm1746_vm5 = vmor %vm1742_vm0, %vm1744_vm8  ;;  %v1752_v53 = vand.u32 1, %v1734_v48  ;;  %v1634_v16 = vpop.f32.mrf.mxu2 }
 0x221   : >> { %v1748_v6 = vsel %vm1746_vm5, %v4033_v51, %v4029_v58  ;;  %v1760_v47 = vand.u32 2, %v1734_v48  ;;  %v2809_v10 = vcvt.f32.s32 %v2808_v54  ;;  %vm2810_vm14 = vcmp.lt.s32.totalorder %v1661_v2, 0 }
 0x222   : >> { %v1728_v62 = vmul.f32 %v1720_v60, %v1699_v7  ;;  %v1750_v15 = vsel %vm1740_vm13, %v3664_v63, %v1748_v6  ;;  %v1754_v4 = vmul.u32 2, %v1752_v53  ;;  %v2811_v52 = vceil.f32 %v1661_v2 }
 0x223   : >> { %v1762_v49 = vsub.s32 1, %v1760_v47  ;;  %v1696_v0 = vand.u32 15, %v2809_v10  ;;  %v2812_v57 = vfloor.f32 %v1661_v2  ;;  %v1606_v3 = vadd.f32 %v1605_v55, %v1576_v50 }
 0x224   : >> { %v1732_v8 = vadd.f32 %v1730_v56, %v1728_v62  ;;  %v1756_v9 = vsub.s32 1, %v1754_v4  ;;  %v959_v2 = vmul.f32 %v957_v11, %v3664_v63 }
 0x225   : >> { %v1764_v48 = vcvt.s32.f32 %v1762_v49  ;;  %vm1698_vm15 = vcmp.lt.s32.totalorder %v1696_v0, 8  ;;  %vm1702_vm9 = vcmp.lt.s32.totalorder %v1696_v0, 4  ;;  %vm1704_vm1 = vcmp.eq.s32.totalorder %v1696_v0, 12  ;;  %v1663_v4 = vpop.f32.mrf.mxu3 }
 0x226   : >> { %v1758_v7 = vcvt.s32.f32 %v1756_v9  ;;  %v1700_v54 = vsel %vm1698_vm15, %v3667_v1, %v3669_v5  ;;  %vm1706_vm2 = vcmp.eq.s32.totalorder %v1696_v0, 14  ;;  %v1715_v60 = vand.u32 1, %v1696_v0 }
 0x227   : >> { %v1768_v53 = vmul.f32 %v1764_v48, %v1750_v15  ;;  %vm1708_vm3 = vmor %vm1704_vm1, %vm1706_vm2  ;;  %v1723_v55 = vand.u32 2, %v1696_v0  ;;  %v2813_v56 = vsel %vm2810_vm14, %v2811_v52, %v2812_v57  ;;  %vm2815_vm4 = vcmp.lt.s32.totalorder %v1606_v3, 0 }
 0x228   : >> { %v1766_v6 = vmul.f32 %v1758_v7, %v1738_v19  ;;  %v1711_v47 = vsel %vm1708_vm3, %v3667_v1, %v4029_v58  ;;  %v1717_v10 = vmul.u32 2, %v1715_v60  ;;  %v2814_v62 = vcvt.f32.s32 %v2813_v56 }
 0x229   : >> { %v1713_v9 = vsel %vm1702_vm9, %v3669_v5, %v1711_v47  ;;  %v1725_v50 = vsub.s32 1, %v1723_v55  ;;  %v2816_v49 = vceil.f32 %v1606_v3  ;;  %v2817_v13 = vfloor.f32 %v1606_v3 }
 0x22a   : >> { %v1770_v14 = vadd.f32 %v1768_v53, %v1766_v6  ;;  %v1719_v15 = vsub.s32 1, %v1717_v10  ;;  %v1735_v48 = vand.u32 15, %v2814_v62  ;;  %v2362_v57 = vadd.f32 -15.0, %v961_v12 }
 0x22b   : >> { %v1727_v52 = vcvt.s32.f32 %v1725_v50  ;;  %v2818_v19 = vsel %vm2815_vm4, %v2816_v49, %v2817_v13  ;;  %v1664_v7 = vadd.f32 %v1663_v4, %v1634_v16  ;;  %v1578_v50 = vpop.f32.mrf.mxu0 }
 0x22c   : >> { %v2001_v60 = vsub.f32 %v1770_v14, %v1732_v8  ;;  %v1721_v56 = vcvt.s32.f32 %v1719_v15  ;;  %vm1737_vm6 = vcmp.lt.s32.totalorder %v1735_v48, 8  ;;  %vm1741_vm10 = vcmp.lt.s32.totalorder %v1735_v48, 4  ;;  %v1607_v14 = vpop.f32.mrf.mxu1 }
 0x22d   : >> { %v1731_v0 = vmul.f32 %v1727_v52, %v1713_v9  ;;  %v1739_v55 = vsel %vm1737_vm6, %v4033_v51, %v3669_v5  ;;  %vm1743_vm11 = vcmp.eq.s32.totalorder %v1735_v48, 12  ;;  %vm1745_vm12 = vcmp.eq.s32.totalorder %v1735_v48, 14 }
 0x22e   : >> { %v2003_v53 = vmul.f32 %v2001_v60, %v4043_v59  ;;  %v1729_v6 = vmul.f32 %v1721_v56, %v1700_v54  ;;  %vm1747_vm7 = vmor %vm1743_vm11, %vm1745_vm12  ;;  %v1753_v11 = vand.u32 1, %v1735_v48  ;;  %v1761_v47 = vand.u32 2, %v1735_v48 }
 0x22f   : >> { %v1749_v3 = vsel %vm1747_vm7, %v4033_v51, %v4029_v58  ;;  %v2819_v12 = vcvt.f32.s32 %v2818_v19  ;;  %v965_v13 = vmul.f32 %v2362_v57, %v3664_v63  ;;  %vm2820_vm13 = vcmp.lt.s32.totalorder %v1664_v7, 0 }
 0x230   : >> { %v4071_v16 = vadd.f32 %v2003_v53, %v1732_v8  ;;  %v1733_v10 = vadd.f32 %v1731_v0, %v1729_v6  ;;  %v1751_v62 = vsel %vm1741_vm10, %v3669_v5, %v1749_v3  ;;  %v1755_v4 = vmul.u32 2, %v1753_v11  ;;  %v1665_v8 = vpop.f32.mrf.mxu3 }
 0x231   : >> { %v1763_v9 = vsub.s32 1, %v1761_v47  ;;  %v1772_v54 = vand.u32 15, %v2819_v12  ;;  %v967_v49 = vadd.f32 10.0, %v965_v13  ;;  %v2821_v15 = vceil.f32 %v1664_v7  ;;  %v1636_v12 = vpop.f32.mrf.mxu2 }
 0x232   : >> { %v1757_v52 = vsub.s32 1, %v1755_v4  ;;  %v2822_v60 = vfloor.f32 %v1664_v7  ;;  %v4076_v19 = vadd.f32 -1.0, %v3669_v5  ;;  %v1608_v57 = vadd.f32 %v1607_v14, %v1578_v50 }
 0x233   : >> { %v1765_v56 = vcvt.s32.f32 %v1763_v9  ;;  %vm1774_vm0 = vcmp.lt.s32.totalorder %v1772_v54, 8  ;;  %vm1778_vm8 = vcmp.lt.s32.totalorder %v1772_v54, 4  ;;  %vm1780_vm5 = vcmp.eq.s32.totalorder %v1772_v54, 12 }
 0x234   : >> { %v1759_v0 = vcvt.s32.f32 %v1757_v52  ;;  %v1776_v48 = vsel %vm1774_vm0, %v3667_v1, %v4046_v61  ;;  %vm1782_vm14 = vcmp.eq.s32.totalorder %v1772_v54, 14  ;;  %v1790_v53 = vand.u32 1, %v1772_v54 }
 0x235   : >> { %v1769_v6 = vmul.f32 %v1765_v56, %v1751_v62  ;;  %vm1784_vm15 = vmor %vm1780_vm5, %vm1782_vm14  ;;  %v1798_v11 = vand.u32 2, %v1772_v54  ;;  %v4080_v47 = vmul.f32 %v967_v49, %v959_v2  ;;  %v2823_v3 = vsel %vm2820_vm13, %v2821_v15, %v2822_v60 }
 0x236   : >> { %v1767_v13 = vmul.f32 %v1759_v0, %v1739_v55  ;;  %v1786_v14 = vsel %vm1784_vm15, %v3667_v1, %v4029_v58  ;;  %v1792_v4 = vmul.u32 2, %v1790_v53  ;;  %v2824_v9 = vcvt.f32.s32 %v2823_v3 }
 0x237   : >> { %v1788_v50 = vsel %vm1778_vm8, %v4046_v61, %v1786_v14  ;;  %v1800_v52 = vsub.s32 1, %v1798_v11  ;;  %vm2825_vm9 = vcmp.lt.s32.totalorder %v1608_v57, 0  ;;  %v2826_v17 = vceil.f32 %v1608_v57 }
 0x238   : >> { %v1771_v62 = vadd.f32 %v1769_v6, %v1767_v13  ;;  %v1794_v56 = vsub.s32 1, %v1792_v4  ;;  %v1810_v18 = vand.u32 15, %v2824_v9  ;;  %v2827_v2 = vfloor.f32 %v1608_v57  ;;  %v1610_v9 = vpop.f32.mrf.mxu1 }
 0x239   : >> { %v1802_v49 = vcvt.s32.f32 %v1800_v52  ;;  %v958_v7 = vmul.f32 %v3669_v5, %v3669_v5  ;;  %v962_v55 = vmul.f32 6.0, %v3669_v5  ;;  %v1666_v15 = vadd.f32 %v1665_v8, %v1636_v12 }
 0x23a   : >> { %v2002_v60 = vsub.f32 %v1771_v62, %v1733_v10  ;;  %v1796_v0 = vcvt.s32.f32 %v1794_v56  ;;  %vm1812_vm1 = vcmp.lt.s32.totalorder %v1810_v18, 8  ;;  %vm1816_vm2 = vcmp.lt.s32.totalorder %v1810_v18, 4 }
 0x23b   : >> { %v1806_v54 = vmul.f32 %v1802_v49, %v1788_v50  ;;  %v1814_v53 = vsel %vm1812_vm1, %v4033_v51, %v4046_v61  ;;  %vm1818_vm3 = vcmp.eq.s32.totalorder %v1810_v18, 12  ;;  %vm1820_vm4 = vcmp.eq.s32.totalorder %v1810_v18, 14  ;;  %v1668_v50 = vpop.f32.mrf.mxu3 }
 0x23c   : >> { %v2004_v6 = vmul.f32 %v2002_v60, %v4043_v59  ;;  %v1804_v11 = vmul.f32 %v1796_v0, %v1776_v48  ;;  %vm1822_vm6 = vmor %vm1818_vm3, %vm1820_vm4  ;;  %v1828_v3 = vand.u32 1, %v1810_v18  ;;  %v1836_v13 = vand.u32 2, %v1810_v18  ;;  %v1581_v0 = vpop.f32.mrf.mxu0 }
 0x23d   : >> { %v1824_v14 = vsel %vm1822_vm6, %v4033_v51, %v4029_v58  ;;  %v2828_v8 = vsel %vm2825_vm9, %v2826_v17, %v2827_v2  ;;  %v960_v12 = vmul.f32 %v958_v7, %v3669_v5  ;;  %v2363_v4 = vadd.f32 -15.0, %v962_v55  ;;  %v1639_v17 = vpop.f32.mrf.mxu2 }
 0x23e   : >> { %v4097_v52 = vadd.f32 %v2004_v6, %v1733_v10  ;;  %v4099_v62 = vadd.f32 %v1806_v54, %v1804_v11  ;;  %v1826_v48 = vsel %vm1816_vm2, %v4046_v61, %v1824_v14  ;;  %v1830_v56 = vmul.u32 2, %v1828_v3 }
 0x23f   : >> { %v1838_v49 = vsub.s32 1, %v1836_v13  ;;  %v2829_v60 = vcvt.f32.s32 %v2828_v8  ;;  %v966_v21 = vmul.f32 %v2363_v4, %v3669_v5  ;;  %vm2830_vm10 = vcmp.lt.s32.totalorder %v1666_v15, 0 }
 0x240   : >> { %v1832_v57 = vsub.s32 1, %v1830_v56  ;;  %v2831_v2 = vceil.f32 %v1666_v15  ;;  %v2832_v7 = vfloor.f32 %v1666_v15  ;;  %v1611_v55 = vadd.f32 %v1610_v9, %v1581_v0 }
 0x241   : >> { %v1840_v22 = vcvt.s32.f32 %v1838_v49  ;;  %v1773_v10 = vand.u32 15, %v2829_v60  ;;  %v968_v6 = vadd.f32 10.0, %v966_v21  ;;  %v4104_v54 = vadd.f32 %v1668_v50, %v1639_v17  ;;  %v1612_v17 = vpop.f32.mrf.mxu1 }
 0x242   : >> { %v1834_v11 = vcvt.s32.f32 %v1832_v57  ;;  %v2833_v18 = vsel %vm2830_vm10, %v2831_v2, %v2832_v7  ;;  %vm2835_vm11 = vcmp.lt.s32.totalorder %v1611_v55, 0  ;;  %v2836_v3 = vceil.f32 %v1611_v55 }
 0x243   : >> { %v1844_v13 = vmul.f32 %v1840_v22, %v1826_v48  ;;  %vm1775_vm12 = vcmp.lt.s32.totalorder %v1773_v10, 8  ;;  %vm1779_vm7 = vcmp.lt.s32.totalorder %v1773_v10, 4  ;;  %vm1781_vm13 = vcmp.eq.s32.totalorder %v1773_v10, 12  ;;  %v1670_v57 = vpop.f32.mrf.mxu3 }
 0x244   : >> { %v1842_v14 = vmul.f32 %v1834_v11, %v1814_v53  ;;  %v1777_v8 = vsel %vm1775_vm12, %v3667_v1, %v4076_v19  ;;  %vm1783_vm0 = vcmp.eq.s32.totalorder %v1773_v10, 14  ;;  %v1791_v15 = vand.u32 1, %v1773_v10  ;;  %v1583_v11 = vpop.f32.mrf.mxu0 }
 0x245   : >> { %vm1785_vm8 = vmor %vm1781_vm13, %vm1783_vm0  ;;  %v1799_v4 = vand.u32 2, %v1773_v10  ;;  %v4108_v9 = vmul.f32 %v968_v6, %v960_v12  ;;  %v2834_v21 = vcvt.f32.s32 %v2833_v18  ;;  %v2837_v50 = vfloor.f32 %v1611_v55  ;;  %v1641_v18 = vpop.f32.mrf.mxu2 }
 0x246   : >> { %v1846_v56 = vadd.f32 %v1844_v13, %v1842_v14  ;;  %v1787_v49 = vsel %vm1785_vm8, %v3667_v1, %v4029_v58  ;;  %v1793_v22 = vmul.u32 2, %v1791_v15  ;;  %vm2840_vm5 = vcmp.lt.s32.totalorder %v4104_v54, 0 }
 0x247   : >> { %v1789_v53 = vsel %vm1779_vm7, %v4076_v19, %v1787_v49  ;;  %v1801_v48 = vsub.s32 1, %v1799_v4  ;;  %v1811_v60 = vand.u32 15, %v2834_v21  ;;  %v2838_v0 = vsel %vm2835_vm11, %v2836_v3, %v2837_v50 }
 0x248   : >> { %v2007_v12 = vsub.f32 %v1846_v56, %v4099_v62  ;;  %v1795_v2 = vsub.s32 1, %v1793_v22  ;;  %v2839_v7 = vcvt.f32.s32 %v2838_v0  ;;  %v2841_v10 = vceil.f32 %v4104_v54 }
 0x249   : >> { %v1803_v6 = vcvt.s32.f32 %v1801_v48  ;;  %vm1813_vm14 = vcmp.lt.s32.totalorder %v1811_v60, 8  ;;  %vm1817_vm15 = vcmp.lt.s32.totalorder %v1811_v60, 4  ;;  %vm1819_vm9 = vcmp.eq.s32.totalorder %v1811_v60, 12 }
 0x24a   : >> { %v2009_v13 = vmul.f32 %v2007_v12, %v4043_v59  ;;  %v1797_v14 = vcvt.s32.f32 %v1795_v2  ;;  %v1815_v55 = vsel %vm1813_vm14, %v4033_v51, %v4076_v19  ;;  %vm1821_vm1 = vcmp.eq.s32.totalorder %v1811_v60, 14 }
 0x24b   : >> { %v1807_v3 = vmul.f32 %v1803_v6, %v1789_v53  ;;  %vm1823_vm2 = vmor %vm1819_vm9, %vm1821_vm1  ;;  %v1829_v15 = vand.u32 1, %v1811_v60  ;;  %v1837_v4 = vand.u32 2, %v1811_v60  ;;  %v1848_v21 = vand.u32 15, %v2839_v7 }
 0x24c   : >> { %v2011_v50 = vadd.f32 %v2009_v13, %v4099_v62  ;;  %v1805_v56 = vmul.f32 %v1797_v14, %v1777_v8  ;;  %v1825_v49 = vsel %vm1823_vm2, %v4033_v51, %v4029_v58  ;;  %v2842_v22 = vfloor.f32 %v4104_v54 }
 0x24d   : >> { %v1827_v48 = vsel %vm1817_vm15, %v4076_v19, %v1825_v49  ;;  %v1831_v0 = vmul.u32 2, %v1829_v15  ;;  %v1839_v12 = vsub.s32 1, %v1837_v4  ;;  %vm1850_vm3 = vcmp.lt.s32.totalorder %v1848_v21, 8 }
 0x24e   : >> { %v2013_v53 = vsub.f32 %v2011_v50, %v4071_v16  ;;  %v1809_v2 = vadd.f32 %v1807_v3, %v1805_v56  ;;  %v1852_v7 = vsel %vm1850_vm3, %v3667_v1, %v3664_v63  ;;  %vm1854_vm4 = vcmp.lt.s32.totalorder %v1848_v21, 4  ;;  %v1615_v50 = vpop.f32.mrf.mxu1  ;;  %v1673_v56 = vpop.f32.mrf.mxu3 }
 0x24f   : >> { %v1833_v62 = vsub.s32 1, %v1831_v0  ;;  %v1841_v8 = vcvt.s32.f32 %v1839_v12  ;;  %vm1856_vm6 = vcmp.eq.s32.totalorder %v1848_v21, 12  ;;  %vm1858_vm10 = vcmp.eq.s32.totalorder %v1848_v21, 14 }
 0x250   : >> { %v2015_v58 = vmul.f32 %v2013_v53, %v4080_v47  ;;  %vm1860_vm11 = vmor %vm1856_vm6, %vm1858_vm10  ;;  %v1867_v6 = vand.u32 1, %v1848_v21  ;;  %v1875_v60 = vand.u32 2, %v1848_v21  ;;  %v2843_v13 = vsel %vm2840_vm5, %v2841_v10, %v2842_v22  ;;  %v1586_v10 = vpop.f32.mrf.mxu0 }
 0x251   : >> { %v1835_v14 = vcvt.s32.f32 %v1833_v62  ;;  %v1845_v15 = vmul.f32 %v1841_v8, %v1827_v48  ;;  %v1863_v3 = vsel %vm1860_vm11, %v3667_v1, %v4041_v20  ;;  %v2844_v4 = vcvt.f32.s32 %v2843_v13  ;;  %v1644_v48 = vpop.f32.mrf.mxu2 }
 0x252   : >> { %v4135_v49 = vadd.f32 %v2015_v58, %v4071_v16  ;;  %v1865_v0 = vsel %vm1854_vm4, %v3664_v63, %v1863_v3  ;;  %v1869_v12 = vmul.u32 2, %v1867_v6  ;;  %v1877_v53 = vsub.s32 1, %v1875_v60 }
 0x253   : >> { %v1843_v23 = vmul.f32 %v1835_v14, %v1815_v55  ;;  %v1887_v24 = vand.u32 15, %v2844_v4  ;;  %v1613_v54 = vadd.f32 %v1612_v17, %v1583_v11  ;;  %v1671_v22 = vadd.f32 %v1670_v57, %v1641_v18 }
 0x254   : >> { %v1871_v62 = vsub.s32 1, %v1869_v12  ;;  %v1879_v8 = vcvt.s32.f32 %v1877_v53  ;;  %v1616_v25 = vadd.f32 %v1615_v50, %v1586_v10  ;;  %v4139_v13 = vadd.f32 %v1673_v56, %v1644_v48 }
 0x255   : >> { %v1847_v26 = vadd.f32 %v1845_v15, %v1843_v23  ;;  %vm1889_vm12 = vcmp.lt.s32.totalorder %v1887_v24, 8  ;;  %vm1893_vm7 = vcmp.lt.s32.totalorder %v1887_v24, 4  ;;  %vm1895_vm13 = vcmp.eq.s32.totalorder %v1887_v24, 12 }
 0x256   : >> { %v1873_v16 = vcvt.s32.f32 %v1871_v62  ;;  %v1883_v21 = vmul.f32 %v1879_v8, %v1865_v0  ;;  %v1891_v58 = vsel %vm1889_vm12, %v4033_v51, %v3664_v63  ;;  %vm1897_vm0 = vcmp.eq.s32.totalorder %v1887_v24, 14 }
 0x257   : >> { %v2008_v55 = vsub.f32 %v1847_v26, %v1809_v2  ;;  %vm1899_vm8 = vmor %vm1895_vm13, %vm1897_vm0  ;;  %v1905_v17 = vand.u32 1, %v1887_v24  ;;  %v1913_v57 = vand.u32 2, %v1887_v24  ;;  %vm2845_vm5 = vcmp.lt.s32.totalorder %v1613_v54, 0 }
 0x258   : >> { %v1881_v11 = vmul.f32 %v1873_v16, %v1852_v7  ;;  %v1901_v18 = vsel %vm1899_vm8, %v4033_v51, %v4041_v20  ;;  %v2846_v6 = vceil.f32 %v1613_v54  ;;  %v2847_v23 = vfloor.f32 %v1613_v54 }
 0x259   : >> { %v2010_v60 = vmul.f32 %v2008_v55, %v4043_v59  ;;  %v1903_v14 = vsel %vm1893_vm7, %v3664_v63, %v1901_v18  ;;  %v1907_v15 = vmul.u32 2, %v1905_v17  ;;  %v1915_v3 = vsub.s32 1, %v1913_v57 }
 0x25a   : >> { %v1885_v4 = vadd.f32 %v1883_v21, %v1881_v11  ;;  %v2848_v50 = vsel %vm2845_vm5, %v2846_v6, %v2847_v23  ;;  %vm2850_vm14 = vcmp.lt.s32.totalorder %v1671_v22, 0  ;;  %v2851_v26 = vceil.f32 %v1671_v22 }
 0x25b   : >> { %v2012_v56 = vadd.f32 %v2010_v60, %v1809_v2  ;;  %v1909_v0 = vsub.s32 1, %v1907_v15  ;;  %v1917_v12 = vcvt.s32.f32 %v1915_v3  ;;  %v2849_v7 = vcvt.f32.s32 %v2848_v50 }
 0x25c   : >> { %v2852_v53 = vfloor.f32 %v1671_v22  ;;  %vm2855_vm15 = vcmp.lt.s32.totalorder %v1616_v25, 0  ;;  %v2856_v10 = vceil.f32 %v1616_v25  ;;  %v2857_v48 = vfloor.f32 %v1616_v25 }
 0x25d   : >> { %v2014_v54 = vsub.f32 %v2012_v56, %v4097_v52  ;;  %v1911_v62 = vcvt.s32.f32 %v1909_v0  ;;  %v1849_v8 = vand.u32 15, %v2849_v7  ;;  %v1921_v24 = vmul.f32 %v1917_v12, %v1903_v14 }
 0x25e   : >> { %v2853_v63 = vsel %vm2850_vm14, %v2851_v26, %v2852_v53  ;;  %v2858_v55 = vsel %vm2855_vm15, %v2856_v10, %v2857_v48  ;;  %vm2860_vm3 = vcmp.lt.s32.totalorder %v4139_v13, 0  ;;  %v2862_v26 = vfloor.f32 %v4139_v13 }
 0x25f   : >> { %v2016_v16 = vmul.f32 %v2014_v54, %v4108_v9  ;;  %v1919_v21 = vmul.f32 %v1911_v62, %v1891_v58  ;;  %vm1851_vm9 = vcmp.lt.s32.totalorder %v1849_v8, 8  ;;  %vm1857_vm1 = vcmp.eq.s32.totalorder %v1849_v8, 12 }
 0x260   : >> { %v1853_v2 = vsel %vm1851_vm9, %v3667_v1, %v3669_v5  ;;  %vm1859_vm2 = vcmp.eq.s32.totalorder %v1849_v8, 14  ;;  %v1868_v22 = vand.u32 1, %v1849_v8  ;;  %v1876_v57 = vand.u32 2, %v1849_v8 }
 0x261   : >> { %v4154_v25 = vadd.f32 %v2016_v16, %v4097_v52  ;;  %v1923_v17 = vadd.f32 %v1921_v24, %v1919_v21  ;;  %vm1861_vm4 = vmor %vm1857_vm1, %vm1859_vm2  ;;  %v2854_v11 = vcvt.f32.s32 %v2853_v63  ;;  %vm1855_vm6 = vcmp.lt.s32.totalorder %v1849_v8, 4 }
 0x262   : >> { %v1864_v58 = vsel %vm1861_vm4, %v3667_v1, %v4041_v20  ;;  %v1870_v18 = vmul.u32 2, %v1868_v22  ;;  %v2859_v6 = vcvt.f32.s32 %v2858_v55  ;;  %v1878_v14 = vsub.s32 1, %v1876_v57  ;;  %v1617_v55 = vpop.f32.mrf.mxu1 }
 0x263   : >> { %v2019_v23 = vsub.f32 %v1923_v17, %v1885_v4  ;;  %v1866_v60 = vsel %vm1855_vm6, %v3669_v5, %v1864_v58  ;;  %v1888_v15 = vand.u32 15, %v2854_v11  ;;  %v2861_v52 = vceil.f32 %v4139_v13  ;;  %v1588_v11 = vpop.f32.mrf.mxu0 }
 0x264   : >> { %v1872_v3 = vsub.s32 1, %v1870_v18  ;;  %v1925_v50 = vand.u32 15, %v2859_v6  ;;  %v1880_v0 = vcvt.s32.f32 %v1878_v14 }
 0x265   : >> { %v2021_v56 = vmul.f32 %v2019_v23, %v4043_v59  ;;  %vm1890_vm10 = vcmp.lt.s32.totalorder %v1888_v15, 8  ;;  %vm1894_vm11 = vcmp.lt.s32.totalorder %v1888_v15, 4  ;;  %vm1896_vm12 = vcmp.eq.s32.totalorder %v1888_v15, 12 }
 0x266   : >> { %v1874_v12 = vcvt.s32.f32 %v1872_v3  ;;  %v1892_v7 = vsel %vm1890_vm10, %v4033_v51, %v3669_v5  ;;  %vm1898_vm7 = vcmp.eq.s32.totalorder %v1888_v15, 14  ;;  %v1884_v10 = vmul.f32 %v1880_v0, %v1866_v60  ;;  %v1675_v3 = vpop.f32.mrf.mxu3 }
 0x267   : >> { %v4164_v53 = vadd.f32 %v2021_v56, %v1885_v4  ;;  %vm1900_vm13 = vmor %vm1896_vm12, %vm1898_vm7  ;;  %v1906_v48 = vand.u32 1, %v1888_v15  ;;  %v1914_v54 = vand.u32 2, %v1888_v15  ;;  %vm1927_vm0 = vcmp.lt.s32.totalorder %v1925_v50, 8 }
 0x268   : >> { %v1882_v62 = vmul.f32 %v1874_v12, %v1853_v2  ;;  %v1902_v8 = vsel %vm1900_vm13, %v4033_v51, %v4041_v20  ;;  %vm1931_vm8 = vcmp.lt.s32.totalorder %v1925_v50, 4  ;;  %v1929_v21 = vsel %vm1927_vm0, %v3667_v1, %v4046_v61 }
 0x269   : >> { %v1904_v24 = vsel %vm1894_vm11, %v3669_v5, %v1902_v8  ;;  %v1908_v63 = vmul.u32 2, %v1906_v48  ;;  %v1916_v16 = vsub.s32 1, %v1914_v54  ;;  %vm1933_vm5 = vcmp.eq.s32.totalorder %v1925_v50, 12 }
 0x26a   : >> { %v1886_v4 = vadd.f32 %v1884_v10, %v1882_v62  ;;  %vm1935_vm14 = vcmp.eq.s32.totalorder %v1925_v50, 14  ;;  %v1943_v22 = vand.u32 1, %v1925_v50  ;;  %v1951_v2 = vand.u32 2, %v1925_v50 }
 0x26b   : >> { %v1910_v17 = vsub.s32 1, %v1908_v63  ;;  %v1918_v57 = vcvt.s32.f32 %v1916_v16  ;;  %vm1937_vm15 = vmor %vm1933_vm5, %vm1935_vm14  ;;  %v2863_v58 = vsel %vm2860_vm3, %v2861_v52, %v2862_v26  ;;  %v1618_v23 = vadd.f32 %v1617_v55, %v1588_v11  ;;  %v1646_v26 = vpop.f32.mrf.mxu2 }
 0x26c   : >> { %v1939_v5 = vsel %vm1937_vm15, %v3667_v1, %v4041_v20  ;;  %v1945_v18 = vmul.u32 2, %v1943_v22  ;;  %v2864_v6 = vcvt.f32.s32 %v2863_v58  ;;  %v1953_v15 = vsub.s32 1, %v1951_v2 }
 0x26d   : >> { %v1912_v60 = vcvt.s32.f32 %v1910_v17  ;;  %v1941_v14 = vsel %vm1931_vm8, %v4046_v61, %v1939_v5  ;;  %v1922_v56 = vmul.f32 %v1918_v57, %v1904_v24  ;;  %v2866_v10 = vceil.f32 %v1618_v23 }
 0x26e   : >> { %v1947_v0 = vsub.s32 1, %v1945_v18  ;;  %v1963_v12 = vand.u32 15, %v2864_v6  ;;  %v1955_v13 = vcvt.s32.f32 %v1953_v15  ;;  %vm2865_vm9 = vcmp.lt.s32.totalorder %v1618_v23, 0 }
 0x26f   : >> { %v1920_v48 = vmul.f32 %v1912_v60, %v1892_v7  ;;  %v2867_v52 = vfloor.f32 %v1618_v23  ;;  %v1676_v62 = vadd.f32 %v1675_v3, %v1646_v26 }
 0x270   : >> { %v1949_v54 = vcvt.s32.f32 %v1947_v0  ;;  %vm1965_vm1 = vcmp.lt.s32.totalorder %v1963_v12, 8  ;;  %vm1971_vm2 = vcmp.eq.s32.totalorder %v1963_v12, 12  ;;  %v1959_v63 = vmul.f32 %v1955_v13, %v1941_v14 }
 0x271   : >> { %v1924_v8 = vadd.f32 %v1922_v56, %v1920_v48  ;;  %v1967_v50 = vsel %vm1965_vm1, %v4033_v51, %v4046_v61  ;;  %vm1973_vm3 = vcmp.eq.s32.totalorder %v1963_v12, 14  ;;  %v1981_v7 = vand.u32 1, %v1963_v12 }
 0x272   : >> { %v1957_v24 = vmul.f32 %v1949_v54, %v1929_v21  ;;  %vm1975_vm4 = vmor %vm1971_vm2, %vm1973_vm3  ;;  %v1989_v16 = vand.u32 2, %v1963_v12  ;;  %v2868_v55 = vsel %vm2865_vm9, %v2866_v10, %v2867_v52  ;;  %vm1969_vm6 = vcmp.lt.s32.totalorder %v1963_v12, 4 }
 0x273   : >> { %v2020_v22 = vsub.f32 %v1924_v8, %v1886_v4  ;;  %v1977_v17 = vsel %vm1975_vm4, %v4033_v51, %v4041_v20  ;;  %v2869_v57 = vcvt.f32.s32 %v2868_v55  ;;  %v1983_v58 = vmul.u32 2, %v1981_v7 }
 0x274   : >> { %v1961_v2 = vadd.f32 %v1959_v63, %v1957_v24  ;;  %v1979_v11 = vsel %vm1969_vm6, %v4046_v61, %v1977_v17  ;;  %v1991_v5 = vsub.s32 1, %v1989_v16  ;;  %vm2870_vm10 = vcmp.lt.s32.totalorder %v1676_v62, 0 }
 0x275   : >> { %v2022_v21 = vmul.f32 %v2020_v22, %v4043_v59  ;;  %v1926_v18 = vand.u32 15, %v2869_v57  ;;  %v1985_v6 = vsub.s32 1, %v1983_v58  ;;  %v2871_v60 = vceil.f32 %v1676_v62 }
 0x276   : >> { %v1993_v23 = vcvt.s32.f32 %v1991_v5  ;;  %v2872_v14 = vfloor.f32 %v1676_v62 }
 0x277   : >> { %v4188_v15 = vadd.f32 %v2022_v21, %v1886_v4  ;;  %vm1928_vm11 = vcmp.lt.s32.totalorder %v1926_v18, 8  ;;  %vm1934_vm12 = vcmp.eq.s32.totalorder %v1926_v18, 12  ;;  %v1987_v61 = vcvt.s32.f32 %v1985_v6 }
 0x278   : >> { %v1930_v3 = vsel %vm1928_vm11, %v3667_v1, %v4076_v19  ;;  %vm1936_vm7 = vcmp.eq.s32.totalorder %v1926_v18, 14  ;;  %vm1932_vm13 = vcmp.lt.s32.totalorder %v1926_v18, 4  ;;  %v1944_v56 = vand.u32 1, %v1926_v18 }
 0x279   : >> { %vm1938_vm0 = vmor %vm1934_vm12, %vm1936_vm7  ;;  %v1952_v0 = vand.u32 2, %v1926_v18  ;;  %v2873_v12 = vsel %vm2870_vm10, %v2871_v60, %v2872_v14  ;;  %v1995_v4 = vmul.f32 %v1987_v61, %v1967_v50  ;;  %v1997_v10 = vmul.f32 %v1993_v23, %v1979_v11 }
 0x27a   : >> { %v1940_v48 = vsel %vm1938_vm0, %v3667_v1, %v4041_v20  ;;  %v2874_v13 = vcvt.f32.s32 %v2873_v12  ;;  %v1946_v26 = vmul.u32 2, %v1944_v56 }
 0x27b   : >> { %v1942_v52 = vsel %vm1932_vm13, %v4076_v19, %v1940_v48  ;;  %v1954_v54 = vsub.s32 1, %v1952_v0  ;;  %v1999_v8 = vadd.f32 %v1997_v10, %v1995_v4  ;;  %v2044_v10 = vstv %s549_s19 }
 0x27c   : >> { %v1964_v63 = vand.u32 15, %v2874_v13  ;;  %v1948_v24 = vsub.s32 1, %v1946_v26 }
 0x27d   : >> { %v1956_v62 = vcvt.s32.f32 %v1954_v54  ;;  %v2025_v50 = vsub.f32 %v1999_v8, %v1961_v2 }
 0x27e   : >> { %vm1966_vm8 = vcmp.lt.s32.totalorder %v1964_v63, 8  ;;  %vm1972_vm5 = vcmp.eq.s32.totalorder %v1964_v63, 12  ;;  %v1950_v1 = vcvt.s32.f32 %v1948_v24  ;;  %vm1974_vm14 = vcmp.eq.s32.totalorder %v1964_v63, 14 }
 0x27f   : >> { %v1968_v7 = vsel %vm1966_vm8, %v4033_v51, %v4076_v19  ;;  %v2027_v16 = vmul.f32 %v2025_v50, %v4043_v59  ;;  %vm1976_vm15 = vmor %vm1972_vm5, %vm1974_vm14  ;;  %v1982_v55 = vand.u32 1, %v1964_v63  ;;  %v1990_v22 = vand.u32 2, %v1964_v63 }
 0x280   : >> { %v1958_v17 = vmul.f32 %v1950_v1, %v1930_v3  ;;  %v1960_v57 = vmul.f32 %v1956_v62, %v1942_v52  ;;  %vm1970_vm9 = vcmp.lt.s32.totalorder %v1964_v63, 4  ;;  %v1978_v11 = vsel %vm1976_vm15, %v4033_v51, %v4041_v20 }
 0x281   : >> { %v2029_v58 = vadd.f32 %v2027_v16, %v1961_v2  ;;  %v1980_v5 = vsel %vm1970_vm9, %v4076_v19, %v1978_v11  ;;  %v1984_v21 = vmul.u32 2, %v1982_v55  ;;  %v1992_v18 = vsub.s32 1, %v1990_v22 }
 0x282   : >> { %v1962_v6 = vadd.f32 %v1960_v57, %v1958_v17  ;;  %v2039_v20 = vstv %s4207_s25  ;;  %v2049_v22 = vstv (%p508_p1), %s3511_s16  ;;  %s2157_s25 = sshll.u32 (%p508_p1), %s2154_s2, 4  ;;  %s2158_s25 = int_to_ptr.hbm [resolvable:$true] %s2157_s25 }
 0x283   : >> { %v2031_v23 = vsub.f32 %v2029_v58, %v4164_v53  ;;  %v1986_v60 = vsub.s32 1, %v1984_v21  ;;  %v1994_v14 = vcvt.s32.f32 %v1992_v18  ;;  %vm2055_vm3 = vweird.f32 (%p508_p1), %v2049_v22  ;;  %s3183_s19 = sshra.s32 (%p508_p1), %s2158_s25, 4  ;;  %s3184_s19 = int_to_ptr.hbm [resolvable:$true] %s3183_s19 }
 0x284   : > { %v2061_v36 = vand.u32 (%p508_p1), 2147483648, %v2049_v22  ;;  %v2059_v38 = vand.u32 (%p508_p1), 2147483647, %v2049_v22  ;;  %p3190_p3 = scmp.lt.s32.totalorder (%p508_p1), %s3184_s19, %s4290_s8 }
 0x285   : >> { %v2033_v61 = vmul.f32 %v2031_v23, %v4080_v47  ;;  %v1988_v3 = vcvt.s32.f32 %v1986_v60  ;;  %v1998_v51 = vmul.f32 %v1994_v14, %v1980_v5 }
 0x286   : > { %v2062_v39 = vor.u32 (%p508_p1), 1.1754944e-38, %v2061_v36  ;;  %vm2060_vm10 = vcmp.eq.f32.partialorder (%p508_p1), %v2059_v38, 8.507059e+37 }
 0x287   : >> { %v2035_v56 = vadd.f32 %v2033_v61, %v4164_v53  ;;  %v1996_v0 = vmul.f32 %v1988_v3, %v1968_v7 }
 0x289   : >> { %v2037_v2 = vsub.f32 %v2035_v56, %v4135_v49  ;;  %v2000_v12 = vadd.f32 %v1998_v51, %v1996_v0 }
 0x28b   : >> { %v2040_v19 = vmul.f32 %v2039_v20, %v2037_v2  ;;  %v2026_v4 = vsub.f32 %v2000_v12, %v1962_v6 }
 0x28d   : >> { %v2042_v48 = vadd.f32 %v2040_v19, %v4135_v49  ;;  %v2028_v13 = vmul.f32 %v2026_v4, %v4043_v59 }
 0x28f   : >> { %v2045_v52 = vmul.f32 %v2044_v10, %v2042_v48  ;;  %v2030_v26 = vadd.f32 %v2028_v13, %v1962_v6  ;;  %v2072_v6 = vstv (%p508_p1), %s3514_s18  ;;  %v2131_v13 = vstv (%p508_p1), %s3524_s11  ;;  %s3185_s11 = scalar_lea.hbm (%p508_p1), %s3184_s19, 16 }
 0x290   : > { %p3186_p5 = scmp.ne.s32.totalorder (%p508_p1), %s3184_s19, %s3185_s11 }
 0x291   : >> { %v2047_v47 = vadd.f32 %v3287_v46, %v2045_v52   ;;  %v2032_v54 = vsub.f32 %v2030_v26, %v4188_v15 }
 0x292   : > { %p3187_p7 = pnand (%p508_p1), %p3186_p5, %p3458_p2 }
 0x293   : >> { %v2034_v53 = vmul.f32 %v2032_v54, %v4108_v9  ;;  %v4366_v46 = vmov %v2047_v47 }
 0x294   : > { %v3304_v46 = vmov (%p508_p1), 2.0   ;;  %p3188_p8 = pneg (%p508_p1), %p3187_p7 }
 0x295   : >> { %v2036_v8 = vadd.f32 %v2034_v53, %v4188_v15  ;;  %3037 = vrcp.f32 (%p508_p1), %v3304_v46  ;;  %v2134_v53 = vstv (%p508_p1), %s3527_s23 }
 0x296   : > { %3039 = vrcp.f32 (%p508_p1), %v2049_v22 }
 0x297   : >> { %v2038_v63 = vsub.f32 %v2036_v8, %v4154_v25 }
 0x299   : >> { %v2041_v24 = vmul.f32 %v2039_v20, %v2038_v63 }
 0x29b   : >> { %v2043_v62 = vadd.f32 %v2041_v24, %v4154_v25  ;;  %v3038_v59 = vpop.eup (%p508_p1), %3037  ;;  %v2083_v25 = vstv (%p508_p1), %s2082_s4  ;;  %s3189_s4 = scalar_lea.hbm (%p508_p1), %s4290_s8, 32 }
 0x29c   : > { %v2086_v9 = vmul.f32 (%p508_p1), 2.0, %v3038_v59  ;;  %v2084_v7 = vand.u32 (%p508_p1), 2147483647, %v2083_v25  ;;  %vm2090_vm1 = vweird.f32 (%p508_p1), %v3038_v59  ;;  %v3040_v28 = vpop.eup (%p508_p1), %3039  ;;  %v2099_v29 = vand.u32 (%p508_p1), 2147483648, %v2083_v25 }
 0x29d   : >> { %v2046_v50 = vmul.f32 %v2044_v10, %v2043_v62  ;;  %510 = sbr.rel (!%p508_p1) target bundleno = 97 (0x61), region = 133  ;;  %v2051_v32 = vmul.f32 (%p508_p1), %v3040_v28, %v2049_v22  ;;  %vm2056_vm4 = vweird.f32 (%p508_p1), %v3040_v28 }
 0x29e   : > { %v2087_v15 = vsub.f32 (%p508_p1), 1.0, %v2086_v9  ;;  %vm2057_vm6 = vmor (%p508_p1), %vm2055_vm3, %vm2056_vm4 }
 0x29f   : >> { %v2048_v49 = vadd.f32 %v3283_v45, %v2046_v50   ;;  %v2052_v34 = vsub.f32 (%p508_p1), 1.0, %v2051_v32 }
 0x2a0   : > { %v2088_v1 = vmul.f32 (%p508_p1), %v3038_v59, %v2087_v15 }
 0x2a1   : >> { %v4365_v45 = vmov %v2048_v49  ;;  %v2053_v35 = vmul.f32 (%p508_p1), %v3040_v28, %v2052_v34  ;;  %p3191_p1 = scmp.lt.s32.totalorder (%p508_p1), %s3189_s4, %s3185_s11 }
 0x2a2   : > { %v2089_v16 = vadd.f32 %v3038_v59, %v2088_v1  ;;  %s2116_s5 = scalar_select %p2080_p9, 1, 0 }
 0x2a3   : > { %v2054_v37 = vadd.f32 %v3040_v28, %v2053_v35  ;;  %s2126_s15 = scalar_select %p2125_p12, 1, 0 }
 0x2a4   : > { %v2091_v55 = vsel %vm2090_vm1, %v3038_v59, %v2089_v16  ;;  %v2117_v0 = vstv %s2116_s5  ;;  %p3192_p9 = por %p3191_p1, %p3190_p3 }
 0x2a5   : > { %v2092_v17 = vmul.f32 %v2091_v55, %v2084_v7  ;;  %v2058_v40 = vsel %vm2057_vm6, %v3040_v28, %v2054_v37  ;;  %v2127_v2 = vstv %s2126_s15  ;;  %vm2118_vm11 = vcmp.eq.s32.totalorder %v2117_v0, 1 }
 0x2a6   : > { %v2063_v41 = vsel %vm2060_vm10, %v2062_v39, %v2058_v40  ;;  %vm2128_vm0 = vcmp.eq.s32.totalorder %v2127_v2, 1 }
 0x2a7   : > { %v2093_v57 = vfloor.f32 %v2092_v17  ;;  %v2064_v42 = vmul.f32 %v2063_v41, %v2047_v47  ;;  %v2065_v43 = vmul.f32 %v2063_v41, %v2048_v49 }
 0x2a9   : > { %v2094_v11 = vmul.f32 2.0, %v2093_v57  ;;  %v2066_v44 = vand.u32 2147483647, %v2064_v42  ;;  %v2067_v45 = vand.u32 2147483647, %v2065_v43  ;;  %vm2121_vm7 = vcmp.lt.f32.partialorder %v2064_v42, 0.0 }
 0x2aa   : > { %vm2122_vm13 = vcmp.lt.f32.partialorder %v2065_v43, 0.0 }
 0x2ab   : > { %v2095_v27 = vsub.f32 %v2084_v7, %v2094_v11  ;;  %3041 = vlog2.f32 %v2066_v44 }
 0x2ac   : > { %3043 = vlog2.f32 %v2067_v45 }
 0x2ad   : > { %vm2096_vm2 = vcmp.eq.f32.partialorder %v2095_v27, 2.0 }
 0x2ae   : > { %v2097_v30 = vsel %vm2096_vm2, 0.0, %v2095_v27 }
 0x2af   : > { %v2098_v31 = vand.u32 2147483647, %v2097_v30 }
 0x2b1   : > { %v2100_v33 = vor.u32 %v2099_v29, %v2098_v31  ;;  %v3042_v58 = vpop.eup %3041 }
 0x2b2   : > { %v3044_v5 = vpop.eup %3043  ;;  %v2069_v21 = vmul.f32 0.6931472, %v3042_v58 }
 0x2b3   : > { %2875 = vpush %v2100_v33  ;;  %v2071_v18 = vmul.f32 0.6931472, %v3044_v5 }
 0x2b4   : > { %v2073_v23 = vmul.f32 %v2072_v6, %v2069_v21 }
 0x2b5   : > { %v2074_v60 = vmul.f32 %v2072_v6, %v2071_v18 }
 0x2b6   : > { %v2075_v14 = vmul.f32 1.442695, %v2073_v23 }
 0x2b7   : > { %v2077_v61 = vmul.f32 1.442695, %v2074_v60 }
 0x2b8   : > { %3045 = vpow2.f32 %v2075_v14 }
 0x2b9   : > { %3047 = vpow2.f32 %v2077_v61 }
 0x2be   : > { %v3046_v3 = vpop.eup %3045 }
 0x2bf   : > { %v3048_v56 = vpop.eup %3047  ;;  %v2109_v51 = vsub.f32 0.0, %v3046_v3 }
 0x2c0   : > { %v2110_v20 = vsub.f32 0.0, %v3048_v56 }
 0x2e4   : > { %s2876_s16 = spop %2875 }
 0x2e5   : > { %p2102_p10 = scmp.ne.f32.partialorder %s2876_s16, 0.0  ;;  %p2103_p11 = scmp.lt.f32.partialorder %s2876_s16, 0.0 }
 0x2e6   : > { %s2106_s17 = sadd.f32 2.0, %s2876_s16 }
 0x2e7   : > { %p2104_p13 = pnand %p2103_p11, %p2102_p10  ;;  %p3193_p10 = pnand %p3192_p9, %p3188_p8 }
 0x2e9   : > { %s4375_s16 = smov (!%p2104_p13, %s2876_s16), %s2106_s17 }
 0x2ea   : > { %p2108_p0 = scmp.eq.f32.partialorder %s4375_s16, 1.0 }
 0x2ec   : > { %s2111_s20 = scalar_select %p2108_p0, 1, 0 }
 0x2ee   : > { %v2112_v12 = vstv %s2111_s20 }
 0x2ef   : > { %vm2113_vm12 = vcmp.eq.s32.totalorder %v2112_v12, 1 }
 0x2f0   : > { %v2114_v19 = vsel %vm2113_vm12, %v2109_v51, %v3046_v3  ;;  %v2115_v4 = vsel %vm2113_vm12, %v2110_v20, %v3048_v56 }
 0x2f1   : > { %v2119_v10 = vsel %vm2118_vm11, %v2114_v19, nan  ;;  %v2120_v48 = vsel %vm2118_vm11, %v2115_v4, nan }
 0x2f2   : > { %v2123_v52 = vsel %vm2121_vm7, %v2119_v10, %v3046_v3  ;;  %v2124_v26 = vsel %vm2122_vm13, %v2120_v48, %v3048_v56 }
 0x2f3   : > { %v2129_v47 = vsel %vm2128_vm0, 1.0, %v2123_v52  ;;  %v2130_v54 = vsel %vm2128_vm0, 1.0, %v2124_v26 }
 0x2f4   : > { %v2132_v8 = vmax.f32 %v2131_v13, %v2129_v47  ;;  %v2133_v63 = vmax.f32 %v2131_v13, %v2130_v54 }
 0x2f6   : > { %v2135_v24 = vmin.f32 %v2134_v53, %v2132_v8  ;;  %v2136_v62 = vmin.f32 %v2134_v53, %v2133_v63 }
 0x2f8   : > { %2137 = vst [vmem:[%s3636_s26] sm:$0xff] %v2135_v24 }
 0x2f9   : > { %2138 = vst [vmem:[%s3636_s26 + $0x8] sm:$0xff] %v2136_v62 }
 0x2fa   : > { %3196 = shalt.err (!%p3193_p10)
}
 0x2fb   : > { %s3305_s6 = smov 128   ;;  %s3306_s26 = smov 8  }
 0x2fc   : > { %2903 = dma.vmem_to_hbm [thread:$0]  (%p3458_p2), %s2156_s30, 256, %s2158_s25, %s2140_s0, %s3305_s6, %s3305_s6, %s3306_s26  }
 0x2fd PF: > { %s2172_s17 = sand.u32 1, %s3259_s27   ;;  %p2929_p11 = pnand %p2340_p4, %p3465_p6 }
 0x2fe   : > { %s2173_s5 = scalar_lea.sflag [#allocation4], %s2172_s17 }
 0x2ff   : > { %p2930_p12 = pneg %p2929_p11 }
 0x301   : > { %3254 = dma.done.wait (%p2930_p12), %s2173_s5, 256  }
 0x302   : > { %3256 = vsyncadd (%p2930_p12), %s2173_s5, 4294967040  ;;  %s28_s10 = sadd.s32 1, %s3279_s10   ;;  %s4367_s27 = smov %s3263_s28 }
 0x303   : > { %p25_p13 = scmp.ge.s32.totalorder %s28_s10, 4   ;;  %s4368_s28 = smov %s3267_s29 }
 0x304   : > { %s4369_s29 = smov %s3463_s13  ;;  %s4370_s30 = smov %s3275_s9 }
 0x305   : > { %s4371_s9 = smov %s4373_s12  ;;  %27 = sbr.rel (!%p25_p13) target bundleno = 18 (0x12), region = 144 }
 0x30a   :  { %2179 = vsyncpa [#allocation3], 1 }
 0x30b   :  { %2181 = vsyncpa [#allocation3 + $0x1], 1 }
 0x30c   :  { %2182 = vsyncpa [#allocation4], 1 }
 0x30d   :  { %2184 = vsyncpa [#allocation4 + $0x1], 1 }
 0x30e   :  { %2185 = vsyncpa [#allocation5], 1 }
 0x30f   :  { %2187 = vsyncpa [#allocation5 + $0x1], 1 }
 0x310   :  { %2188 = vsyncpa [#allocation8], 1 }
 0x311   :  { %2189 = vsyncpa [#allocation11], 1 }
 0x312   :  { %2190 = vsyncpa [#allocation14], 1 }

</bundles_post_ra>
